<compile_context>
chip_gen: v6e
topology: v6e:2x2x1
jax: 0.10.0
libtpu: 0.0.40
codegen_flags: <defaults>
</compile_context>

<pallas_src>
import numpy as np
from math import pi

import jax
import jax.numpy as jnp
from jax.experimental import pallas as pl
from jax.experimental.pallas import tpu as pltpu

# ----------------------------- config (small, structurally faithful) --------
HIDDEN = 64          # hidden_size
N_BLOCKS = 4         # n_blocks  -> 3 ResnetBlockFC blocks
SKIPS = (2,)         # skip connection after block index 1 (idx+1 == 2)
Z_DIM = 32           # z_dim
RGB_OUT = 16         # rgb_out_dim
L_POS = 4            # n_freq_posenc
L_VIEW = 2           # n_freq_posenc_views
DOWNSCALE = 2.0      # downscale_p_by
DIM_EMBED = 3 * L_POS * 2        # 24
DIM_EMBED_VIEW = 3 * L_VIEW * 2  # 12
IN_CAT = DIM_EMBED + DIM_EMBED_VIEW   # 36  ([p_enc | r_enc])
OUT_PAD = 128        # lane-dense packed output width (feat 0..15, sigma at 16)

B = 2                # batch
N = 256              # points per batch element (one full tile per grid step)


# ----------------------------- Pallas kernel --------------------------------
def decoder_kernel(
    enc_ref, z_ref,                    # (1,N,36) bf16, (1,3,H) f32
    w0, b0,                            # (36,192) bf16, (1,192) f32  fc_in|fc_p_skips|fc_view
    bw0, bb0, bw1, bb1,                # (nb,H,H) bf16, (nb,1,H) f32, ...
    w_head, b_head,                    # (H,128) bf16, (1,128) f32   feat_view|sigma_out
    w_out, b_out,                      # (H,128) bf16, (1,128) f32   feat_out (padded)
    out_ref,                           # (1,N,128) f32  [:, :16]=feat, [:, 16]=sigma
):
    f32, bf16 = jnp.float32, jnp.bfloat16
    H = HIDDEN

    enc = enc_ref[0]                   # (N, 36) bf16  = [p_enc | r_enc]
    z = z_ref[0]                       # (3, H)  f32   rows: fc_z(zs), fc_z_skips(zs), fc_z_view(za)
    zf, zs, zv = z[0:1, :], z[1:2, :], z[2:3, :]

    # fused fc_in | fc_p_skips[0] | fc_view: one block-diag (36,192) MXU pass
    h0 = jnp.dot(enc, w0[...], preferred_element_type=f32) + b0[...]
    net = h0[:, 0:H] * zf              # fc_in(p) * fc_z(z_shape)
    p_skip = h0[:, H:2 * H]            # fc_p_skips[0](p)   (off the critical chain)
    view_add = h0[:, 2 * H:3 * H]      # fc_view(ray_d)     (vreg-boundary slice)

    # ResnetBlockFC stack (identity shortcut: size_in == size_out == H)
    for i in range(N_BLOCKS - 1):
        h = jnp.dot(jax.nn.relu(net).astype(bf16), bw0[i],
                    preferred_element_type=f32) + bb0[i]
        dx = jnp.dot(jax.nn.relu(h).astype(bf16), bw1[i],
                     preferred_element_type=f32) + bb1[i]
        net = net + dx
        if (i + 1) in SKIPS and i < N_BLOCKS - 2:
            net = net + zs + p_skip    # fc_z_skips(z_shape) + fc_p_skips(p)

    # fused feat_view | sigma_out head as one 128-lane slab
    # (lanes 0..H-1 = feat_view, lane H = sigma, lanes H+1.. are exactly zero).
    head = jnp.dot(net.astype(bf16), w_head[...],
                   preferred_element_type=f32) + b_head[...]
    sigma = head[:, H:H + 1]                        # (N, 1)
    net = head[:, 0:H] + zv + view_add              # feat_view + fc_z_view + fc_view
    net = jax.nn.relu(net).astype(bf16)

    # feat_out padded to a lane-dense 128-wide slab; columns >= RGB_OUT of
    # w_out/b_out are exactly zero, so packing sigma into lane RGB_OUT is safe.
    feat = jnp.dot(net, w_out[...], preferred_element_type=f32) + b_out[...]
    lane = jax.lax.broadcasted_iota(jnp.int32, (1, OUT_PAD), 1)
    out_ref[0] = feat + (lane == RGB_OUT).astype(f32) * sigma


# ----------------------------- glue ------------------------------------------
def transform_points(p, n_freq):
    # reference-only explicit positional encoding (matches the PyTorch module)
    p = p / DOWNSCALE
    feats = []
    for i in range(n_freq):
        arg = (2.0 ** i) * pi * p
        feats.append(jnp.sin(arg))
        feats.append(jnp.cos(arg))
    return jnp.concatenate(feats, axis=-1)


def resnet_fc_z(x, prm):
    # ResnetBlockFC(z_dim, hidden): has a linear (no-bias) shortcut
    w0, b0, w1, b1, ws = prm
    h = jax.nn.relu(x) @ w0 + b0
    dx = jax.nn.relu(h) @ w1 + b1
    return x @ ws + dx


def build_freq_phase():
    """Encoding as a single matmul+sin:  enc = sin([p | rd_hat] @ F + phase).
    Column order matches the reference: per freq i -> [sin(xyz), cos(xyz)]."""
    F = np.zeros((6, IN_CAT), np.float32)
    ph = np.zeros((IN_CAT,), np.float32)

    def fill(row0, col0, n_freq):
        for i in range(n_freq):
            for j in range(6):
                c = col0 + 6 * i + j
                F[row0 + (j % 3), c] = (2.0 ** i) * pi / DOWNSCALE
                ph[c] = 0.5 * pi if j >= 3 else 0.0   # cos(x) == sin(x + pi/2)

    fill(0, 0, L_POS)
    fill(3, DIM_EMBED, L_VIEW)
    return jnp.asarray(F), jnp.asarray(ph)


def init_params(key):
    keys = list(jax.random.split(key, 64))
    kit = iter(keys)

    def lin(din, dout):
        kw, kb = jax.random.split(next(kit))
        lim = 1.0 / np.sqrt(din)
        w = jax.random.uniform(kw, (din, dout), jnp.float32, -lim, lim)
        bb = jax.random.uniform(kb, (1, dout), jnp.float32, -lim, lim)
        return w, bb

    params = {}
    params["fc_in"] = lin(DIM_EMBED, HIDDEN)
    params["fc_z"] = lin(Z_DIM, HIDDEN)
    blocks = []
    for _ in range(N_BLOCKS - 1):
        w0, b0 = lin(HIDDEN, HIDDEN)
        w1, b1 = lin(HIDDEN, HIDDEN)
        blocks.append((w0, b0, w1, b1))
    params["blocks"] = blocks
    size_h = min(Z_DIM, HIDDEN)
    w0, b0 = lin(Z_DIM, size_h)
    w1, b1 = lin(size_h, HIDDEN)
    ws, _ = lin(Z_DIM, HIDDEN)          # shortcut, bias=False
    params["fc_z_skip"] = (w0, b0, w1, b1, ws)
    params["fc_p_skip"] = lin(DIM_EMBED, HIDDEN)
    params["sigma_out"] = lin(HIDDEN, 1)
    params["fc_z_view"] = lin(Z_DIM, HIDDEN)
    params["feat_view"] = lin(HIDDEN, HIDDEN)
    params["fc_view"] = lin(DIM_EMBED_VIEW, HIDDEN)
    params["feat_out"] = lin(HIDDEN, RGB_OUT)
    return params


def prepare_decoder(params):
    """One-time weight fusion / packing / bf16 cast (hoisted out of the
    per-forward path)."""
    f32, bf16 = jnp.float32, jnp.bfloat16
    H, De = HIDDEN, DIM_EMBED

    # block-diagonal first-layer weight: rows 0..23 -> [fc_in | fc_p_skips | 0],
    # rows 24..35 -> [0 | 0 | fc_view]
    w0 = jnp.zeros((IN_CAT, 3 * H), f32)
    w0 = w0.at[:De, 0:H].set(params["fc_in"][0])
    w0 = w0.at[:De, H:2 * H].set(params["fc_p_skip"][0])
    w0 = w0.at[De:, 2 * H:3 * H].set(params["fc_view"][0])
    b0 = jnp.concatenate([params["fc_in"][1], params["fc_p_skip"][1],
                          params["fc_view"][1]], axis=1)

    bw0 = jnp.stack([blk[0] for blk in params["blocks"]]).astype(bf16)
    bb0 = jnp.stack([blk[1] for blk in params["blocks"]])
    bw1 = jnp.stack([blk[2] for blk in params["blocks"]]).astype(bf16)
    bb1 = jnp.stack([blk[3] for blk in params["blocks"]])

    # fused head: feat_view -> lanes [0,H), sigma_out -> lane H, rest zero
    w_head = jnp.zeros((H, OUT_PAD), f32)
    w_head = w_head.at[:, 0:H].set(params["feat_view"][0])
    w_head = w_head.at[:, H:H + 1].set(params["sigma_out"][0])
    b_head = jnp.zeros((1, OUT_PAD), f32)
    b_head = b_head.at[:, 0:H].set(params["feat_view"][1])
    b_head = b_head.at[:, H:H + 1].set(params["sigma_out"][1])

    # feat_out padded to a lane-dense 128-wide slab (cols >= RGB_OUT exactly 0)
    w_out = jnp.zeros((H, OUT_PAD), f32).at[:, :RGB_OUT].set(params["feat_out"][0])
    b_out = jnp.zeros((1, OUT_PAD), f32).at[:, :RGB_OUT].set(params["feat_out"][1])

    freq, phase = build_freq_phase()
    return {
        "w0": w0.astype(bf16), "b0": b0,
        "bw0": bw0, "bb0": bb0, "bw1": bw1, "bb1": bb1,
        "w_head": w_head.astype(bf16), "b_head": b_head,
        "w_out": w_out.astype(bf16), "b_out": b_out,
        "freq": freq, "phase": phase,
        "fc_z": params["fc_z"],
        "fc_z_skip": params["fc_z_skip"],
        "fc_z_view": params["fc_z_view"],
    }


def decoder_forward(prep, p_in, ray_d, z_shape, z_app):
    bf16 = jnp.bfloat16
    Bsz, Npts, _ = p_in.shape

    # per-batch latent projections (tiny), merged into one (B,3,H) input
    zf = z_shape @ prep["fc_z"][0] + prep["fc_z"][1]
    zs = resnet_fc_z(z_shape, prep["fc_z_skip"])
    zv = z_app @ prep["fc_z_view"][0] + prep["fc_z_view"][1]
    z_all = jnp.stack([zf, zs, zv], axis=1)                        # (B,3,H) f32

    # fused positional encoding (one matmul + one sin, f32; bf16 only at the end)
    rd = ray_d * jax.lax.rsqrt(jnp.sum(ray_d * ray_d, axis=-1, keepdims=True))
    x = jnp.concatenate([p_in, rd], axis=-1)                       # (B,N,6)
    enc = jnp.sin(x @ prep["freq"] + prep["phase"]).astype(bf16)   # (B,N,36)

    weight_keys = ("w0", "b0", "bw0", "bb0", "bw1", "bb1",
                   "w_head", "b_head", "w_out", "b_out")
    weight_args = [prep[k] for k in weight_keys]

    def fullspec(w):
        nd = w.ndim
        return pl.BlockSpec(w.shape, lambda b, _nd=nd: (0,) * _nd)

    in_specs = [
        pl.BlockSpec((1, Npts, IN_CAT), lambda b: (b, 0, 0)),
        pl.BlockSpec((1, 3, HIDDEN), lambda b: (b, 0, 0)),
    ] + [fullspec(w) for w in weight_args]

    flops = 2 * Bsz * Npts * (IN_CAT * 3 * HIDDEN
                              + (N_BLOCKS - 1) * 2 * HIDDEN * HIDDEN
                              + 2 * HIDDEN * OUT_PAD)
    bytes_accessed = (Bsz * Npts * IN_CAT * 2 + Bsz * 3 * HIDDEN * 4
                      + (IN_CAT * 3 * HIDDEN + 6 * HIDDEN * HIDDEN
                         + 2 * HIDDEN * OUT_PAD) * 2
                      + (3 * HIDDEN + 6 * HIDDEN + 2 * OUT_PAD) * 4
                      + Bsz * Npts * OUT_PAD * 4)

    packed = pl.pallas_call(
        decoder_kernel,
        grid=(Bsz,),
        in_specs=in_specs,
        out_specs=pl.BlockSpec((1, Npts, OUT_PAD), lambda b: (b, 0, 0)),
        out_shape=jax.ShapeDtypeStruct((Bsz, Npts, OUT_PAD), jnp.float32),
        compiler_params=pltpu.CompilerParams(
            # 2-way parallel keeps both v7x TensorCores busy; costs one extra
            # ~0.35us pipeline step on single-core v5e/v6e (accepted).
            dimension_semantics=("parallel",)),
        cost_estimate=pl.CostEstimate(flops=flops, transcendentals=0,
                                      bytes_accessed=bytes_accessed),
    )(enc, z_all, *weight_args)

    return packed[..., :RGB_OUT], packed[..., RGB_OUT]


# ----------------------------- pure-JAX reference ----------------------------
def reference_forward(params, p_in, ray_d, z_shape, z_app):
    p = transform_points(p_in, L_POS)
    zf = z_shape @ params["fc_z"][0] + params["fc_z"][1]
    zs = resnet_fc_z(z_shape, params["fc_z_skip"])
    zv = z_app @ params["fc_z_view"][0] + params["fc_z_view"][1]

    net = p @ params["fc_in"][0] + params["fc_in"][1]
    net = net * zf[:, None, :]
    for i in range(N_BLOCKS - 1):
        w0, b0, w1, b1 = params["blocks"][i]
        h = jax.nn.relu(net) @ w0 + b0
        dx = jax.nn.relu(h) @ w1 + b1
        net = net + dx
        if (i + 1) in SKIPS and i < N_BLOCKS - 2:
            net = net + zs[:, None, :]
            net = net + p @ params["fc_p_skip"][0] + params["fc_p_skip"][1]
    sigma = (net @ params["sigma_out"][0] + params["sigma_out"][1])[..., 0]
    net = net @ params["feat_view"][0] + params["feat_view"][1]
    net = net + zv[:, None, :]
    rd = ray_d / jnp.linalg.norm(ray_d, axis=-1, keepdims=True)
    r_enc = transform_points(rd, L_VIEW)
    net = net + r_enc @ params["fc_view"][0] + params["fc_view"][1]
    net = jax.nn.relu(net)
    feat = net @ params["feat_out"][0] + params["feat_out"][1]
    return feat, sigma


# ----------------------------- main ------------------------------------------
if __name__ == "__main__":
    key = jax.random.PRNGKey(0)
    k_p, k_r, k_zs, k_za, k_w = jax.random.split(key, 5)

    p_in = jax.random.normal(k_p, (B, N, 3), jnp.float32)
    ray_d = jax.random.normal(k_r, (B, N, 3), jnp.float32)
    z_shape = jax.random.normal(k_zs, (B, Z_DIM), jnp.float32)
    z_app = jax.random.normal(k_za, (B, Z_DIM), jnp.float32)

    params = init_params(k_w)
    prep = prepare_decoder(params)          # one-time fusion/cast (hoisted)

    fwd = jax.jit(decoder_forward)
    feat, sigma = fwd(prep, p_in, ray_d, z_shape, z_app)
    jax.block_until_ready((feat, sigma))

    feat_ref, sigma_ref = reference_forward(params, p_in, ray_d, z_shape, z_app)
    jax.block_until_ready((feat_ref, sigma_ref))

    assert feat.shape == (B, N, RGB_OUT) and sigma.shape == (B, N)
    # tolerance accounts for bf16 MXU operands (f32 accumulation)
    assert np.allclose(np.asarray(feat), np.asarray(feat_ref),
                       atol=2e-2, rtol=2e-2), "feat mismatch"
    assert np.allclose(np.asarray(sigma), np.asarray(sigma_ref),
                       atol=2e-2, rtol=2e-2), "sigma mismatch"

    print("KERNEL_OK")
</pallas_src>

<mosaic_0001>
module attributes {stable_mosaic.version = 11 : i64} {
  func.func @decoder_kernel(%arg0: i32, %arg1: memref<1x256x36xbf16, #tpu.memory_space<vmem>>, %arg2: memref<1x3x64xf32, #tpu.memory_space<vmem>>, %arg3: memref<36x192xbf16, #tpu.memory_space<vmem>>, %arg4: memref<1x192xf32, #tpu.memory_space<vmem>>, %arg5: memref<3x64x64xbf16, #tpu.memory_space<vmem>>, %arg6: memref<3x1x64xf32, #tpu.memory_space<vmem>>, %arg7: memref<3x64x64xbf16, #tpu.memory_space<vmem>>, %arg8: memref<3x1x64xf32, #tpu.memory_space<vmem>>, %arg9: memref<64x128xbf16, #tpu.memory_space<vmem>>, %arg10: memref<1x128xf32, #tpu.memory_space<vmem>>, %arg11: memref<64x128xbf16, #tpu.memory_space<vmem>>, %arg12: memref<1x128xf32, #tpu.memory_space<vmem>>, %arg13: memref<1x256x128xf32, #tpu.memory_space<vmem>>) attributes {dimension_semantics = [#tpu.dimension_semantics<parallel>], iteration_bounds = array<i64: 2>, scalar_prefetch = 0 : i64, scratch_operands = 0 : i64, tpu.core_type = #tpu.core_type<tc>, window_params = [{transform_indices = @transform_0, window_bounds = array<i64: 1, 256, 36>}, {transform_indices = @transform_1, window_bounds = array<i64: 1, 3, 64>}, {pipeline_mode = #tpu.pipeline_mode<synchronous>, transform_indices = @transform_2, window_bounds = array<i64: 36, 192>}, {pipeline_mode = #tpu.pipeline_mode<synchronous>, transform_indices = @transform_3, window_bounds = array<i64: 1, 192>}, {pipeline_mode = #tpu.pipeline_mode<synchronous>, transform_indices = @transform_4, window_bounds = array<i64: 3, 64, 64>}, {pipeline_mode = #tpu.pipeline_mode<synchronous>, transform_indices = @transform_5, window_bounds = array<i64: 3, 1, 64>}, {pipeline_mode = #tpu.pipeline_mode<synchronous>, transform_indices = @transform_6, window_bounds = array<i64: 3, 64, 64>}, {pipeline_mode = #tpu.pipeline_mode<synchronous>, transform_indices = @transform_7, window_bounds = array<i64: 3, 1, 64>}, {pipeline_mode = #tpu.pipeline_mode<synchronous>, transform_indices = @transform_8, window_bounds = array<i64: 64, 128>}, {pipeline_mode = #tpu.pipeline_mode<synchronous>, transform_indices = @transform_9, window_bounds = array<i64: 1, 128>}, {pipeline_mode = #tpu.pipeline_mode<synchronous>, transform_indices = @transform_10, window_bounds = array<i64: 64, 128>}, {pipeline_mode = #tpu.pipeline_mode<synchronous>, transform_indices = @transform_11, window_bounds = array<i64: 1, 128>}, {transform_indices = @transform_12, window_bounds = array<i64: 1, 256, 128>}]} {
    %c0 = arith.constant 0 : index
    %c0_0 = arith.constant 0 : index
    %c0_1 = arith.constant 0 : index
    %0 = vector.load %arg1[%c0, %c0_0, %c0_1] : memref<1x256x36xbf16, #tpu.memory_space<vmem>>, vector<1x256x36xbf16>
    %1 = vector.shape_cast %0 : vector<1x256x36xbf16> to vector<256x36xbf16>
    %c0_2 = arith.constant 0 : index
    %c0_3 = arith.constant 0 : index
    %c0_4 = arith.constant 0 : index
    %2 = vector.load %arg2[%c0_2, %c0_3, %c0_4] : memref<1x3x64xf32, #tpu.memory_space<vmem>>, vector<1x3x64xf32>
    %3 = vector.shape_cast %2 : vector<1x3x64xf32> to vector<3x64xf32>
    %4 = vector.extract_strided_slice %3 {offsets = [0, 0], sizes = [1, 64], strides = [1, 1]} : vector<3x64xf32> to vector<1x64xf32>
    %5 = vector.extract_strided_slice %3 {offsets = [1, 0], sizes = [1, 64], strides = [1, 1]} : vector<3x64xf32> to vector<1x64xf32>
    %6 = vector.extract_strided_slice %3 {offsets = [2, 0], sizes = [1, 64], strides = [1, 1]} : vector<3x64xf32> to vector<1x64xf32>
    %c0_5 = arith.constant 0 : index
    %c0_6 = arith.constant 0 : index
    %7 = vector.load %arg3[%c0_5, %c0_6] : memref<36x192xbf16, #tpu.memory_space<vmem>>, vector<36x192xbf16>
    %cst = arith.constant dense<0.000000e+00> : vector<256x192xf32>
    %8 = tpu.matmul %1, %7, %cst {dimension_numbers = #tpu.dot_dimension_numbers<[1], [0], [0], [1], [0, 0, 1, 1], [], []>} : vector<256x36xbf16>, vector<36x192xbf16>, vector<256x192xf32> -> vector<256x192xf32>
    %c0_7 = arith.constant 0 : index
    %c0_8 = arith.constant 0 : index
    %9 = vector.load %arg4[%c0_7, %c0_8] : memref<1x192xf32, #tpu.memory_space<vmem>>, vector<1x192xf32>
    %10 = vector.broadcast %9 : vector<1x192xf32> to vector<256x192xf32>
    %11 = arith.addf %8, %10 : vector<256x192xf32>
    %12 = vector.extract_strided_slice %11 {offsets = [0, 0], sizes = [256, 64], strides = [1, 1]} : vector<256x192xf32> to vector<256x64xf32>
    %13 = vector.broadcast %4 : vector<1x64xf32> to vector<256x64xf32>
    %14 = arith.mulf %12, %13 : vector<256x64xf32>
    %15 = vector.extract_strided_slice %11 {offsets = [0, 64], sizes = [256, 64], strides = [1, 1]} : vector<256x192xf32> to vector<256x64xf32>
    %16 = vector.extract_strided_slice %11 {offsets = [0, 128], sizes = [256, 64], strides = [1, 1]} : vector<256x192xf32> to vector<256x64xf32>
    %cst_9 = arith.constant 0.000000e+00 : f32
    %17 = vector.broadcast %cst_9 : f32 to vector<256x64xf32>
    %18 = arith.maximumf %14, %17 : vector<256x64xf32>
    %19 = arith.truncf %18 : vector<256x64xf32> to vector<256x64xbf16>
    %c0_10 = arith.constant 0 : index
    %c0_11 = arith.constant 0 : index
    %c0_12 = arith.constant 0 : index
    %20 = vector.load %arg5[%c0_10, %c0_11, %c0_12] : memref<3x64x64xbf16, #tpu.memory_space<vmem>>, vector<1x64x64xbf16>
    %21 = vector.shape_cast %20 : vector<1x64x64xbf16> to vector<64x64xbf16>
    %cst_13 = arith.constant dense<0.000000e+00> : vector<256x64xf32>
    %22 = tpu.matmul %19, %21, %cst_13 {dimension_numbers = #tpu.dot_dimension_numbers<[1], [0], [0], [1], [0, 0, 1, 1], [], []>} : vector<256x64xbf16>, vector<64x64xbf16>, vector<256x64xf32> -> vector<256x64xf32>
    %c0_14 = arith.constant 0 : index
    %c0_15 = arith.constant 0 : index
    %c0_16 = arith.constant 0 : index
    %23 = vector.load %arg6[%c0_14, %c0_15, %c0_16] : memref<3x1x64xf32, #tpu.memory_space<vmem>>, vector<1x1x64xf32>
    %24 = vector.shape_cast %23 : vector<1x1x64xf32> to vector<1x64xf32>
    %25 = vector.broadcast %24 : vector<1x64xf32> to vector<256x64xf32>
    %26 = arith.addf %22, %25 : vector<256x64xf32>
    %cst_17 = arith.constant 0.000000e+00 : f32
    %27 = vector.broadcast %cst_17 : f32 to vector<256x64xf32>
    %28 = arith.maximumf %26, %27 : vector<256x64xf32>
    %29 = arith.truncf %28 : vector<256x64xf32> to vector<256x64xbf16>
    %c0_18 = arith.constant 0 : index
    %c0_19 = arith.constant 0 : index
    %c0_20 = arith.constant 0 : index
    %30 = vector.load %arg7[%c0_18, %c0_19, %c0_20] : memref<3x64x64xbf16, #tpu.memory_space<vmem>>, vector<1x64x64xbf16>
    %31 = vector.shape_cast %30 : vector<1x64x64xbf16> to vector<64x64xbf16>
    %cst_21 = arith.constant dense<0.000000e+00> : vector<256x64xf32>
    %32 = tpu.matmul %29, %31, %cst_21 {dimension_numbers = #tpu.dot_dimension_numbers<[1], [0], [0], [1], [0, 0, 1, 1], [], []>} : vector<256x64xbf16>, vector<64x64xbf16>, vector<256x64xf32> -> vector<256x64xf32>
    %c0_22 = arith.constant 0 : index
    %c0_23 = arith.constant 0 : index
    %c0_24 = arith.constant 0 : index
    %33 = vector.load %arg8[%c0_22, %c0_23, %c0_24] : memref<3x1x64xf32, #tpu.memory_space<vmem>>, vector<1x1x64xf32>
    %34 = vector.shape_cast %33 : vector<1x1x64xf32> to vector<1x64xf32>
    %35 = vector.broadcast %34 : vector<1x64xf32> to vector<256x64xf32>
    %36 = arith.addf %32, %35 : vector<256x64xf32>
    %37 = arith.addf %14, %36 : vector<256x64xf32>
    %cst_25 = arith.constant 0.000000e+00 : f32
    %38 = vector.broadcast %cst_25 : f32 to vector<256x64xf32>
    %39 = arith.maximumf %37, %38 : vector<256x64xf32>
    %40 = arith.truncf %39 : vector<256x64xf32> to vector<256x64xbf16>
    %c1 = arith.constant 1 : index
    %c0_26 = arith.constant 0 : index
    %c0_27 = arith.constant 0 : index
    %41 = vector.load %arg5[%c1, %c0_26, %c0_27] : memref<3x64x64xbf16, #tpu.memory_space<vmem>>, vector<1x64x64xbf16>
    %42 = vector.shape_cast %41 : vector<1x64x64xbf16> to vector<64x64xbf16>
    %cst_28 = arith.constant dense<0.000000e+00> : vector<256x64xf32>
    %43 = tpu.matmul %40, %42, %cst_28 {dimension_numbers = #tpu.dot_dimension_numbers<[1], [0], [0], [1], [0, 0, 1, 1], [], []>} : vector<256x64xbf16>, vector<64x64xbf16>, vector<256x64xf32> -> vector<256x64xf32>
    %c1_29 = arith.constant 1 : index
    %c0_30 = arith.constant 0 : index
    %c0_31 = arith.constant 0 : index
    %44 = vector.load %arg6[%c1_29, %c0_30, %c0_31] : memref<3x1x64xf32, #tpu.memory_space<vmem>>, vector<1x1x64xf32>
    %45 = vector.shape_cast %44 : vector<1x1x64xf32> to vector<1x64xf32>
    %46 = vector.broadcast %45 : vector<1x64xf32> to vector<256x64xf32>
    %47 = arith.addf %43, %46 : vector<256x64xf32>
    %cst_32 = arith.constant 0.000000e+00 : f32
    %48 = vector.broadcast %cst_32 : f32 to vector<256x64xf32>
    %49 = arith.maximumf %47, %48 : vector<256x64xf32>
    %50 = arith.truncf %49 : vector<256x64xf32> to vector<256x64xbf16>
    %c1_33 = arith.constant 1 : index
    %c0_34 = arith.constant 0 : index
    %c0_35 = arith.constant 0 : index
    %51 = vector.load %arg7[%c1_33, %c0_34, %c0_35] : memref<3x64x64xbf16, #tpu.memory_space<vmem>>, vector<1x64x64xbf16>
    %52 = vector.shape_cast %51 : vector<1x64x64xbf16> to vector<64x64xbf16>
    %cst_36 = arith.constant dense<0.000000e+00> : vector<256x64xf32>
    %53 = tpu.matmul %50, %52, %cst_36 {dimension_numbers = #tpu.dot_dimension_numbers<[1], [0], [0], [1], [0, 0, 1, 1], [], []>} : vector<256x64xbf16>, vector<64x64xbf16>, vector<256x64xf32> -> vector<256x64xf32>
    %c1_37 = arith.constant 1 : index
    %c0_38 = arith.constant 0 : index
    %c0_39 = arith.constant 0 : index
    %54 = vector.load %arg8[%c1_37, %c0_38, %c0_39] : memref<3x1x64xf32, #tpu.memory_space<vmem>>, vector<1x1x64xf32>
    %55 = vector.shape_cast %54 : vector<1x1x64xf32> to vector<1x64xf32>
    %56 = vector.broadcast %55 : vector<1x64xf32> to vector<256x64xf32>
    %57 = arith.addf %53, %56 : vector<256x64xf32>
    %58 = arith.addf %37, %57 : vector<256x64xf32>
    %59 = vector.broadcast %5 : vector<1x64xf32> to vector<256x64xf32>
    %60 = arith.addf %58, %59 : vector<256x64xf32>
    %61 = arith.addf %60, %15 : vector<256x64xf32>
    %cst_40 = arith.constant 0.000000e+00 : f32
    %62 = vector.broadcast %cst_40 : f32 to vector<256x64xf32>
    %63 = arith.maximumf %61, %62 : vector<256x64xf32>
    %64 = arith.truncf %63 : vector<256x64xf32> to vector<256x64xbf16>
    %c2 = arith.constant 2 : index
    %c0_41 = arith.constant 0 : index
    %c0_42 = arith.constant 0 : index
    %65 = vector.load %arg5[%c2, %c0_41, %c0_42] : memref<3x64x64xbf16, #tpu.memory_space<vmem>>, vector<1x64x64xbf16>
    %66 = vector.shape_cast %65 : vector<1x64x64xbf16> to vector<64x64xbf16>
    %cst_43 = arith.constant dense<0.000000e+00> : vector<256x64xf32>
    %67 = tpu.matmul %64, %66, %cst_43 {dimension_numbers = #tpu.dot_dimension_numbers<[1], [0], [0], [1], [0, 0, 1, 1], [], []>} : vector<256x64xbf16>, vector<64x64xbf16>, vector<256x64xf32> -> vector<256x64xf32>
    %c2_44 = arith.constant 2 : index
    %c0_45 = arith.constant 0 : index
    %c0_46 = arith.constant 0 : index
    %68 = vector.load %arg6[%c2_44, %c0_45, %c0_46] : memref<3x1x64xf32, #tpu.memory_space<vmem>>, vector<1x1x64xf32>
    %69 = vector.shape_cast %68 : vector<1x1x64xf32> to vector<1x64xf32>
    %70 = vector.broadcast %69 : vector<1x64xf32> to vector<256x64xf32>
    %71 = arith.addf %67, %70 : vector<256x64xf32>
    %cst_47 = arith.constant 0.000000e+00 : f32
    %72 = vector.broadcast %cst_47 : f32 to vector<256x64xf32>
    %73 = arith.maximumf %71, %72 : vector<256x64xf32>
    %74 = arith.truncf %73 : vector<256x64xf32> to vector<256x64xbf16>
    %c2_48 = arith.constant 2 : index
    %c0_49 = arith.constant 0 : index
    %c0_50 = arith.constant 0 : index
    %75 = vector.load %arg7[%c2_48, %c0_49, %c0_50] : memref<3x64x64xbf16, #tpu.memory_space<vmem>>, vector<1x64x64xbf16>
    %76 = vector.shape_cast %75 : vector<1x64x64xbf16> to vector<64x64xbf16>
    %cst_51 = arith.constant dense<0.000000e+00> : vector<256x64xf32>
    %77 = tpu.matmul %74, %76, %cst_51 {dimension_numbers = #tpu.dot_dimension_numbers<[1], [0], [0], [1], [0, 0, 1, 1], [], []>} : vector<256x64xbf16>, vector<64x64xbf16>, vector<256x64xf32> -> vector<256x64xf32>
    %c2_52 = arith.constant 2 : index
    %c0_53 = arith.constant 0 : index
    %c0_54 = arith.constant 0 : index
    %78 = vector.load %arg8[%c2_52, %c0_53, %c0_54] : memref<3x1x64xf32, #tpu.memory_space<vmem>>, vector<1x1x64xf32>
    %79 = vector.shape_cast %78 : vector<1x1x64xf32> to vector<1x64xf32>
    %80 = vector.broadcast %79 : vector<1x64xf32> to vector<256x64xf32>
    %81 = arith.addf %77, %80 : vector<256x64xf32>
    %82 = arith.addf %61, %81 : vector<256x64xf32>
    %83 = arith.truncf %82 : vector<256x64xf32> to vector<256x64xbf16>
    %c0_55 = arith.constant 0 : index
    %c0_56 = arith.constant 0 : index
    %84 = vector.load %arg9[%c0_55, %c0_56] : memref<64x128xbf16, #tpu.memory_space<vmem>>, vector<64x128xbf16>
    %cst_57 = arith.constant dense<0.000000e+00> : vector<256x128xf32>
    %85 = tpu.matmul %83, %84, %cst_57 {dimension_numbers = #tpu.dot_dimension_numbers<[1], [0], [0], [1], [0, 0, 1, 1], [], []>} : vector<256x64xbf16>, vector<64x128xbf16>, vector<256x128xf32> -> vector<256x128xf32>
    %c0_58 = arith.constant 0 : index
    %c0_59 = arith.constant 0 : index
    %86 = vector.load %arg10[%c0_58, %c0_59] : memref<1x128xf32, #tpu.memory_space<vmem>>, vector<1x128xf32>
    %87 = vector.broadcast %86 : vector<1x128xf32> to vector<256x128xf32>
    %88 = arith.addf %85, %87 : vector<256x128xf32>
    %89 = vector.extract_strided_slice %88 {offsets = [0, 64], sizes = [256, 1], strides = [1, 1]} : vector<256x128xf32> to vector<256x1xf32>
    %90 = vector.extract_strided_slice %88 {offsets = [0, 0], sizes = [256, 64], strides = [1, 1]} : vector<256x128xf32> to vector<256x64xf32>
    %91 = vector.broadcast %6 : vector<1x64xf32> to vector<256x64xf32>
    %92 = arith.addf %90, %91 : vector<256x64xf32>
    %93 = arith.addf %92, %16 : vector<256x64xf32>
    %cst_60 = arith.constant 0.000000e+00 : f32
    %94 = vector.broadcast %cst_60 : f32 to vector<256x64xf32>
    %95 = arith.maximumf %93, %94 : vector<256x64xf32>
    %96 = arith.truncf %95 : vector<256x64xf32> to vector<256x64xbf16>
    %c0_61 = arith.constant 0 : index
    %c0_62 = arith.constant 0 : index
    %97 = vector.load %arg11[%c0_61, %c0_62] : memref<64x128xbf16, #tpu.memory_space<vmem>>, vector<64x128xbf16>
    %cst_63 = arith.constant dense<0.000000e+00> : vector<256x128xf32>
    %98 = tpu.matmul %96, %97, %cst_63 {dimension_numbers = #tpu.dot_dimension_numbers<[1], [0], [0], [1], [0, 0, 1, 1], [], []>} : vector<256x64xbf16>, vector<64x128xbf16>, vector<256x128xf32> -> vector<256x128xf32>
    %c0_64 = arith.constant 0 : index
    %c0_65 = arith.constant 0 : index
    %99 = vector.load %arg12[%c0_64, %c0_65] : memref<1x128xf32, #tpu.memory_space<vmem>>, vector<1x128xf32>
    %100 = vector.broadcast %99 : vector<1x128xf32> to vector<256x128xf32>
    %101 = arith.addf %98, %100 : vector<256x128xf32>
    %102 = tpu.iota {dimensions = array<i32: 1>} : vector<1x128xi32>
    %c16_i32 = arith.constant 16 : i32
    %103 = vector.broadcast %c16_i32 : i32 to vector<1x128xi32>
    %104 = arith.cmpi eq, %102, %103 : vector<1x128xi32>
    %105 = arith.extui %104 : vector<1x128xi1> to vector<1x128xi32>
    %106 = arith.sitofp %105 : vector<1x128xi32> to vector<1x128xf32>
    %107 = vector.broadcast %106 : vector<1x128xf32> to vector<256x128xf32>
    %108 = vector.broadcast %89 : vector<256x1xf32> to vector<256x128xf32>
    %109 = arith.mulf %107, %108 : vector<256x128xf32>
    %110 = arith.addf %101, %109 : vector<256x128xf32>
    %c0_66 = arith.constant 0 : index
    %c0_67 = arith.constant 0 : index
    %c0_68 = arith.constant 0 : index
    %111 = vector.load %arg13[%c0_66, %c0_67, %c0_68] : memref<1x256x128xf32, #tpu.memory_space<vmem>>, vector<1x256x128xf32>
    %112 = vector.shape_cast %111 : vector<1x256x128xf32> to vector<256x128xf32>
    %113 = vector.shape_cast %110 : vector<256x128xf32> to vector<1x256x128xf32>
    tpu.vector_store %arg13[%c0_66, %c0_67, %c0_68], %113 {strides = array<i32>} : memref<1x256x128xf32, #tpu.memory_space<vmem>>, vector<1x256x128xf32>,
    return
  }
  func.func @transform_0(%arg0: i32) -> (i32, i32, i32) {
    %c0_i32 = arith.constant 0 : i32
    %c0_i32_0 = arith.constant 0 : i32
    %c0_i32_1 = arith.constant 0 : i32
    return %arg0, %c0_i32, %c0_i32_0 : i32, i32, i32
  }
  func.func @transform_1(%arg0: i32) -> (i32, i32, i32) {
    %c0_i32 = arith.constant 0 : i32
    %c0_i32_0 = arith.constant 0 : i32
    %c0_i32_1 = arith.constant 0 : i32
    return %arg0, %c0_i32, %c0_i32_0 : i32, i32, i32
  }
  func.func @transform_2(%arg0: i32) -> (i32, i32) {
    %c0_i32 = arith.constant 0 : i32
    %c0_i32_0 = arith.constant 0 : i32
    %c0_i32_1 = arith.constant 0 : i32
    return %c0_i32, %c0_i32_0 : i32, i32
  }
  func.func @transform_3(%arg0: i32) -> (i32, i32) {
    %c0_i32 = arith.constant 0 : i32
    %c0_i32_0 = arith.constant 0 : i32
    %c0_i32_1 = arith.constant 0 : i32
    return %c0_i32, %c0_i32_0 : i32, i32
  }
  func.func @transform_4(%arg0: i32) -> (i32, i32, i32) {
    %c0_i32 = arith.constant 0 : i32
    %c0_i32_0 = arith.constant 0 : i32
    %c0_i32_1 = arith.constant 0 : i32
    %c0_i32_2 = arith.constant 0 : i32
    return %c0_i32, %c0_i32_0, %c0_i32_1 : i32, i32, i32
  }
  func.func @transform_5(%arg0: i32) -> (i32, i32, i32) {
    %c0_i32 = arith.constant 0 : i32
    %c0_i32_0 = arith.constant 0 : i32
    %c0_i32_1 = arith.constant 0 : i32
    %c0_i32_2 = arith.constant 0 : i32
    return %c0_i32, %c0_i32_0, %c0_i32_1 : i32, i32, i32
  }
  func.func @transform_6(%arg0: i32) -> (i32, i32, i32) {
    %c0_i32 = arith.constant 0 : i32
    %c0_i32_0 = arith.constant 0 : i32
    %c0_i32_1 = arith.constant 0 : i32
    %c0_i32_2 = arith.constant 0 : i32
    return %c0_i32, %c0_i32_0, %c0_i32_1 : i32, i32, i32
  }
  func.func @transform_7(%arg0: i32) -> (i32, i32, i32) {
    %c0_i32 = arith.constant 0 : i32
    %c0_i32_0 = arith.constant 0 : i32
    %c0_i32_1 = arith.constant 0 : i32
    %c0_i32_2 = arith.constant 0 : i32
    return %c0_i32, %c0_i32_0, %c0_i32_1 : i32, i32, i32
  }
  func.func @transform_8(%arg0: i32) -> (i32, i32) {
    %c0_i32 = arith.constant 0 : i32
    %c0_i32_0 = arith.constant 0 : i32
    %c0_i32_1 = arith.constant 0 : i32
    return %c0_i32, %c0_i32_0 : i32, i32
  }
  func.func @transform_9(%arg0: i32) -> (i32, i32) {
    %c0_i32 = arith.constant 0 : i32
    %c0_i32_0 = arith.constant 0 : i32
    %c0_i32_1 = arith.constant 0 : i32
    return %c0_i32, %c0_i32_0 : i32, i32
  }
  func.func @transform_10(%arg0: i32) -> (i32, i32) {
    %c0_i32 = arith.constant 0 : i32
    %c0_i32_0 = arith.constant 0 : i32
    %c0_i32_1 = arith.constant 0 : i32
    return %c0_i32, %c0_i32_0 : i32, i32
  }
  func.func @transform_11(%arg0: i32) -> (i32, i32) {
    %c0_i32 = arith.constant 0 : i32
    %c0_i32_0 = arith.constant 0 : i32
    %c0_i32_1 = arith.constant 0 : i32
    return %c0_i32, %c0_i32_0 : i32, i32
  }
  func.func @transform_12(%arg0: i32) -> (i32, i32, i32) {
    %c0_i32 = arith.constant 0 : i32
    %c0_i32_0 = arith.constant 0 : i32
    %c0_i32_1 = arith.constant 0 : i32
    return %arg0, %c0_i32, %c0_i32_0 : i32, i32, i32
  }
}

</mosaic_0001>

<bundles_post_ra>
// kernel: decoder_forward.1
= control target key start
LH: loop header
LB: loop body
LE: loop exit
PB: predicated region body
PF: predicated region fallthrough
CT: control target
= control target key end

     0   :  { %s4792_s21 = smov 0   ;;  %s6177_s0 = inlined_call_operand.vmem [shape: bf16[2,256,36], index: 0, kind: input, shape index: {}]   ;;  %s6178_s1 = inlined_call_operand.vmem [shape: f32[2,3,64], index: 1, kind: input, shape index: {}]   ;;  %s6179_s2 = inlined_call_operand.vmem [shape: bf16[36,192], index: 2, kind: input, shape index: {}]   ;;  %s6180_s3 = inlined_call_operand.vmem [shape: f32[1,192], index: 3, kind: input, shape index: {}]   ;;  %s6181_s4 = inlined_call_operand.vmem [shape: bf16[3,64,64], index: 4, kind: input, shape index: {}]   ;;  %s6182_s5 = inlined_call_operand.vmem [shape: f32[3,1,64], index: 5, kind: input, shape index: {}]   ;;  %s6183_s6 = inlined_call_operand.vmem [shape: bf16[3,64,64], index: 6, kind: input, shape index: {}]   ;;  %s6184_s7 = inlined_call_operand.vmem [shape: f32[3,1,64], index: 7, kind: input, shape index: {}]   ;;  %s6185_s8 = inlined_call_operand.vmem [shape: bf16[64,128], index: 8, kind: input, shape index: {}]   ;;  %s6186_s9 = inlined_call_operand.vmem [shape: f32[1,128], index: 9, kind: input, shape index: {}]   ;;  %s6187_s10 = inlined_call_operand.vmem [shape: bf16[64,128], index: 10, kind: input, shape index: {}]   ;;  %s6188_s11 = inlined_call_operand.vmem [shape: f32[1,128], index: 11, kind: input, shape index: {}]   ;;  %s6189_s12 = inlined_call_operand.vmem [shape: f32[2,256,128], index: 12, kind: output, shape index: {}]  }
   0x1 LB: > { %s3905_s22 = sadd.s32 4294967295, %s4721_s21   ;;  %p3909_p0 = scmp.ge.s32.totalorder %s4721_s21, 1  ;;  %s4721_s21 = sphi %s4792_s21, %s22_s21  }
   0x2   : > { %p371_p1 = scmp.lt.s32.totalorder %s4721_s21, 3 }
   0x4   : > { %p372_p2 = pnand %p3909_p0, %p371_p1 }
   0x6   : > { %375 = sbr.rel (%p372_p2) target bundleno = 2009 (0x7d9), region = 68 }
   0xb   : > { %v469_v0 = vld [vmem:[%s6179_s2 + $0x20] sm:$0x33]  ;;  %vm636_vm0 = vcmask 1041408   ;;  %v6190_v1 = vlaneseq  ;;  %v4659_v4 = vld [vmem:[%s6179_s2 + $0x14] ss:$8 sps:$4 sm:$0xff]   ;;  %v4723_v5 = vmov 0  }
   0xc   : > { %v3936_v2 = vcombine.high %v469_v0, %v469_v0  ;;  %v3935_v3 = vcombine.low %v469_v0, %v469_v0  ;;  %675 = vmatprep.mubr.bf16.mxu0 %v4723_v5  ;;  %p417_p3 = scmp.lt.s32.totalorder %s3905_s22, 1  ;;  %v4661_v8 = vld [vmem:[%s6179_s2 + $0x10] ss:$8 sps:$4 sm:$0xff]   ;;  %v4662_v9 = vld [vmem:[%s6179_s2 + $0x4] ss:$8 sps:$4 sm:$0xff]   ;;  %vm587_vm1 = vcmask 293888  }
   0xd   : > { %v4808_v6 = vshrl.u32 %v6190_v1, 7  ;;  %v4664_v12 = vld [vmem:[%s6179_s2] ss:$8 sps:$4 sm:$0xff]   ;;  %v4681_v23 = vld [vmem:[%s6181_s4 + $0x18] sm:$0xff]   ;;  %v4682_v25 = vld [vmem:[%s6181_s4 + $0x10] sm:$0xff]   ;;  %s4724_s18 = smov 64  }
   0xe   : > { %3937 = vmatprep.subr.msk.bf16.mxu0 %vm636_vm0, %v3936_v2  ;;  %v638_v7 = vsel %vm636_vm0, %v3935_v3, 0  ;;  %s6237_s22 = smov (!%p417_p3, %s3905_s22), 1  ;;  %4323 = vmatprep.subr.bf16.mxu1 %v4681_v23  ;;  %v4683_v26 = vld [vmem:[%s6181_s4 + $0x8] sm:$0xff]   ;;  %v4684_v28 = vld [vmem:[%s6181_s4] sm:$0xff]   ;;  %vm959_vm2 = vcmask 523264  }
   0xf   : > { %654 = vmatpush1.bf16.msra.mxu0 %v638_v7  ;;  %v3215_v10 = vsub.s32 2, %v4808_v6  ;;  %s4161_s13 = sshll.u32 %s6237_s22, 7  ;;  %s3912_s14 = sshll.u32 %s6237_s22, 2  ;;  %4324 = vmatpush3.bf16.msra.mxu1 %v4681_v23  ;;  %v474_v34 = vsub.s32 0, %v4808_v6  ;;  %v470_v35 = vld [vmem:[%s6180_s3] sm:$0x3] }
  0x10   : > { %655 = vmatprep.subr.bf16.mxu0 %v4659_v4  ;;  %s4824_s17 = scalar_lea.vmem %s6177_s0, %s4161_s13  ;;  %s4829_s20 = scalar_lea.vmem %s6178_s1, %s3912_s14  ;;  %4325 = vmatprep.subr.bf16.mxu1 %v4682_v25 }
  0x11   : > { %v4832_v11 = vld [vmem:[%s4829_s20] sm:$0x7]  ;;  %v4666_v15 = vld [vmem:[%s4824_s17 + $0x8] sm:$0xff]   ;;  %v4667_v16 = vld [vmem:[%s4824_s17 + $0x10] sm:$0xff]   ;;  %v4903_v36 = vrot.slane %v470_v35, %v474_v34 }
  0x12   : > { %v4838_v13 = vrot.slane %v4832_v11, %v3215_v10  ;;  %v4665_v14 = vld [vmem:[%s4824_s17] sm:$0xff]   ;;  %v4668_v17 = vld [vmem:[%s4824_s17 + $0x18] sm:$0xff]   ;;  %v4670_v19 = vld [vmem:[%s4824_s17 + $0x28] sm:$0xff]   ;;  %v4906_v38 = vrot.slane %v4832_v11, %v474_v34 }
  0x13   : > { %656 = vmatpush1.bf16.msra.mxu0 %v4661_v8  ;;  %v4669_v18 = vld [vmem:[%s4824_s17 + $0x20] sm:$0xff]   ;;  %v4671_v20 = vld [vmem:[%s4824_s17 + $0x30] sm:$0xff]   ;;  %v4672_v21 = vld [vmem:[%s4824_s17 + $0x38] sm:$0xff]   ;;  %4326 = vmatpush3.bf16.msra.mxu1 %v4682_v25 }
  0x14   : > { %657 = vmatprep.subr.bf16.mxu0 %v4662_v9  ;;  %v4673_v22 = vld [vmem:[%s4824_s17 + $0x40] sm:$0xff]   ;;  %v4674_v24 = vld [vmem:[%s4824_s17 + $0x48] sm:$0xff]   ;;  %v4675_v27 = vld [vmem:[%s4824_s17 + $0x50] sm:$0xff]   ;;  %4327 = vmatprep.subr.bf16.mxu1 %v4683_v26 }
  0x15   : > { %v4676_v29 = vld [vmem:[%s4824_s17 + $0x58] sm:$0xff]   ;;  %v4677_v30 = vld [vmem:[%s4824_s17 + $0x60] sm:$0xff]   ;;  %v4678_v31 = vld [vmem:[%s4824_s17 + $0x68] sm:$0xff]  }
  0x16   : > { %v4679_v32 = vld [vmem:[%s4824_s17 + $0x70] sm:$0xff]   ;;  %v4680_v33 = vld [vmem:[%s4824_s17 + $0x78] sm:$0xff]  }
  0x17   : > { %658 = vmatpush1.bf16.msra.mxu0 %v4664_v12  ;;  %4328 = vmatpush3.bf16.msra.mxu1 %v4683_v26 }
  0x18   : > { %4329 = vmatprep.subr.bf16.mxu1 %v4684_v28 }
  0x1a   : > { %3938 = vmatmul.mubr.msk.bf16.vlgmr.msra.gmra.mxu0 %vm587_vm1, %v4665_v14 }
  0x1b   : > { %685 = vmatprep.mubr.bf16.mxu0 %v4723_v5  ;;  %4330 = vmatpush3.bf16.msra.mxu1 %v4684_v28 }
  0x22   : > { %3939 = vmatmul.mubr.msk.bf16.gmra.mxu0 %vm587_vm1, %v4666_v15 }
  0x23   : > { %695 = vmatprep.mubr.bf16.mxu0 %v4723_v5 }
  0x2a   : > { %3940 = vmatmul.mubr.msk.bf16.gmra.mxu0 %vm587_vm1, %v4667_v16 }
  0x2b   : > { %705 = vmatprep.mubr.bf16.mxu0 %v4723_v5 }
  0x32   : > { %3941 = vmatmul.mubr.msk.bf16.gmra.mxu0 %vm587_vm1, %v4668_v17 }
  0x33   : > { %715 = vmatprep.mubr.bf16.mxu0 %v4723_v5 }
  0x3a   : > { %3942 = vmatmul.mubr.msk.bf16.gmra.mxu0 %vm587_vm1, %v4669_v18 }
  0x3b   : > { %725 = vmatprep.mubr.bf16.mxu0 %v4723_v5 }
  0x42   : > { %3943 = vmatmul.mubr.msk.bf16.gmra.mxu0 %vm587_vm1, %v4670_v19 }
  0x43   : > { %735 = vmatprep.mubr.bf16.mxu0 %v4723_v5 }
  0x4a   : > { %3944 = vmatmul.mubr.msk.bf16.gmra.mxu0 %vm587_vm1, %v4671_v20 }
  0x4b   : > { %745 = vmatprep.mubr.bf16.mxu0 %v4723_v5 }
  0x52   : > { %3945 = vmatmul.mubr.msk.bf16.gmra.mxu0 %vm587_vm1, %v4672_v21 }
  0x53   : > { %755 = vmatprep.mubr.bf16.mxu0 %v4723_v5 }
  0x5a   : > { %3946 = vmatmul.mubr.msk.bf16.gmra.mxu0 %vm587_vm1, %v4673_v22 }
  0x5b   : > { %765 = vmatprep.mubr.bf16.mxu0 %v4723_v5 }
  0x62   : > { %3947 = vmatmul.mubr.msk.bf16.gmra.mxu0 %vm587_vm1, %v4674_v24 }
  0x63   : > { %775 = vmatprep.mubr.bf16.mxu0 %v4723_v5 }
  0x6a   : > { %3948 = vmatmul.mubr.msk.bf16.gmra.mxu0 %vm587_vm1, %v4675_v27 }
  0x6b   : > { %785 = vmatprep.mubr.bf16.mxu0 %v4723_v5 }
  0x72   : > { %3949 = vmatmul.mubr.msk.bf16.gmra.mxu0 %vm587_vm1, %v4676_v29 }
  0x73   : > { %795 = vmatprep.mubr.bf16.mxu0 %v4723_v5 }
  0x7a   : > { %3950 = vmatmul.mubr.msk.bf16.gmra.mxu0 %vm587_vm1, %v4677_v30 }
  0x7b   : > { %805 = vmatprep.mubr.bf16.mxu0 %v4723_v5 }
  0x82   : > { %3951 = vmatmul.mubr.msk.bf16.gmra.mxu0 %vm587_vm1, %v4678_v31 }
  0x83   : > { %815 = vmatprep.mubr.bf16.mxu0 %v4723_v5 }
  0x8a   : > { %3952 = vmatmul.mubr.msk.bf16.gmra.mxu0 %vm587_vm1, %v4679_v32 }
  0x8b   : > { %825 = vmatprep.mubr.bf16.mxu0 %v4723_v5 }
  0x92   : > { %3953 = vmatmul.mubr.msk.bf16.gmra.mxu0 %vm587_vm1, %v4680_v33 }
  0xda   : > { %v677_v37 = vpop.f32.mrf.mxu0 }
  0xdb   : > { %v678_v39 = vadd.f32 %v677_v37, %v4903_v36 }
  0xdc   : > { %v4909_v40 = vpop.f32.mrf.mxu0 }
  0xdd   : > { %2193 = vrot.lane.b32.xlu0 %v678_v39, %s4724_s18  ;;  %v4913_v42 = vmul.f32 %v4906_v38, %v678_v39 }
  0xde   : > { %v681_v41 = vpop.f32.mrf.mxu0 }
  0xdf   : > { %v682_v43 = vadd.f32 %v681_v41, %v4903_v36  ;;  %v872_v48 = vmax.f32 %v4913_v42, 0.0 }
  0xe0   : > { %v4916_v44 = vpop.f32.mrf.mxu0 }
  0xe1   : > { %v4919_v45 = vmul.f32 %v4906_v38, %v682_v43  ;;  %2195 = vrot.lane.b32.xlu0 %v682_v43, %s4724_s18 }
  0xe2   : > { %v687_v46 = vpop.f32.mrf.mxu0 }
  0xe3   : > { %v688_v47 = vadd.f32 %v687_v46, %v4903_v36  ;;  %v873_v49 = vmax.f32 %v4919_v45, 0.0 }
  0xe4   : > { %v4925_v50 = vpop.f32.mrf.mxu0 }
  0xe5   : > { %2197 = vrot.lane.b32.xlu1 %v688_v47, %s4724_s18  ;;  %v904_v51 = vpack.c.bf16 %v873_v49, %v872_v48  ;;  %v4929_v53 = vmul.f32 %v4906_v38, %v688_v47 }
  0xe6   : > { %v691_v52 = vpop.f32.mrf.mxu0 }
  0xe7   : > { %v692_v54 = vadd.f32 %v691_v52, %v4903_v36  ;;  %4331 = vmatprep.mubr.msk.bf16.mxu1 %vm959_vm2, %v904_v51  ;;  %v874_v58 = vmax.f32 %v4929_v53, 0.0 }
  0xe8   : > { %v4933_v55 = vpop.f32.mrf.mxu0 }
  0xe9   : > { %v4936_v56 = vmul.f32 %v4906_v38, %v692_v54  ;;  %2199 = vrot.lane.b32.xlu1 %v692_v54, %s4724_s18 }
  0xea   : > { %v697_v57 = vpop.f32.mrf.mxu0 }
  0xeb   : > { %v875_v59 = vmax.f32 %v4936_v56, 0.0  ;;  %v698_v60 = vadd.f32 %v697_v57, %v4903_v36 }
  0xec   : > { %v4942_v61 = vpop.f32.mrf.mxu0 }
  0xed   : > { %v905_v62 = vpack.c.bf16 %v875_v59, %v874_v58  ;;  %2201 = vrot.lane.b32.xlu0 %v698_v60, %s4724_s18  ;;  %v4946_v0 = vmul.f32 %v4906_v38, %v698_v60 }
  0xee   : > { %v701_v63 = vpop.f32.mrf.mxu0 }
  0xef   : > { %v702_v2 = vadd.f32 %v701_v63, %v4903_v36  ;;  %4332 = vmatmul.mubr.msk.bf16.vlgmr.msra.gmra.mxu1 %vm959_vm2, %v905_v62  ;;  %v876_v7 = vmax.f32 %v4946_v0, 0.0 }
  0xf0   : > { %v4950_v3 = vpop.f32.mrf.mxu0 }
  0xf1   : > { %v4953_v4 = vmul.f32 %v4906_v38, %v702_v2  ;;  %2203 = vrot.lane.b32.xlu1 %v702_v2, %s4724_s18 }
  0xf2   : > { %v707_v5 = vpop.f32.mrf.mxu0 }
  0xf3   : > { %v877_v8 = vmax.f32 %v4953_v4, 0.0  ;;  %v708_v9 = vadd.f32 %v707_v5, %v4903_v36 }
  0xf4   : > { %v4959_v10 = vpop.f32.mrf.mxu0 }
  0xf5   : > { %v906_v11 = vpack.c.bf16 %v877_v8, %v876_v7  ;;  %2205 = vrot.lane.b32.xlu0 %v708_v9, %s4724_s18  ;;  %v4963_v14 = vmul.f32 %v4906_v38, %v708_v9 }
  0xf6   : > { %v711_v12 = vpop.f32.mrf.mxu0 }
  0xf7   : > { %v712_v15 = vadd.f32 %v711_v12, %v4903_v36  ;;  %4335 = vmatprep.mubr.msk.bf16.mxu1 %vm959_vm2, %v906_v11  ;;  %v878_v19 = vmax.f32 %v4963_v14, 0.0 }
  0xf8   : > { %v4967_v16 = vpop.f32.mrf.mxu0 }
  0xf9   : > { %v4970_v17 = vmul.f32 %v4906_v38, %v712_v15  ;;  %2207 = vrot.lane.b32.xlu1 %v712_v15, %s4724_s18 }
  0xfa   : > { %v717_v18 = vpop.f32.mrf.mxu0 }
  0xfb   : > { %v879_v20 = vmax.f32 %v4970_v17, 0.0  ;;  %v718_v21 = vadd.f32 %v717_v18, %v4903_v36 }
  0xfc   : > { %v4976_v22 = vpop.f32.mrf.mxu0 }
  0xfd   : > { %v907_v23 = vpack.c.bf16 %v879_v20, %v878_v19  ;;  %2209 = vrot.lane.b32.xlu0 %v718_v21, %s4724_s18  ;;  %v4980_v25 = vmul.f32 %v4906_v38, %v718_v21 }
  0xfe   : > { %v721_v24 = vpop.f32.mrf.mxu0 }
  0xff   : > { %v722_v26 = vadd.f32 %v721_v24, %v4903_v36  ;;  %4336 = vmatmul.mubr.msk.bf16.gmra.mxu1 %vm959_vm2, %v907_v23  ;;  %v880_v30 = vmax.f32 %v4980_v25, 0.0 }
 0x100   : > { %v4984_v27 = vpop.f32.mrf.mxu0 }
 0x101   : > { %6192 = vst [vmem:[#allocation2_spill] sm:$0xff] %v4984_v27  ;;  %v4987_v28 = vmul.f32 %v4906_v38, %v722_v26  ;;  %2211 = vrot.lane.b32.xlu1 %v722_v26, %s4724_s18 }
 0x102   : > { %v727_v29 = vpop.f32.mrf.mxu0 }
 0x103   : > { %v881_v31 = vmax.f32 %v4987_v28, 0.0  ;;  %v728_v32 = vadd.f32 %v727_v29, %v4903_v36 }
 0x104   : > { %v4993_v33 = vpop.f32.mrf.mxu0 }
 0x105   : > { %v908_v34 = vpack.c.bf16 %v881_v31, %v880_v30  ;;  %2213 = vrot.lane.b32.xlu0 %v728_v32, %s4724_s18  ;;  %v4997_v37 = vmul.f32 %v4906_v38, %v728_v32 }
 0x106   : > { %v731_v35 = vpop.f32.mrf.mxu0 }
 0x107   : > { %v732_v39 = vadd.f32 %v731_v35, %v4903_v36  ;;  %4339 = vmatprep.mubr.msk.bf16.mxu1 %vm959_vm2, %v908_v34  ;;  %v882_v47 = vmax.f32 %v4997_v37, 0.0 }
 0x108   : > { %v5001_v41 = vpop.f32.mrf.mxu0 }
 0x109   : > { %v5004_v43 = vmul.f32 %v4906_v38, %v732_v39  ;;  %2215 = vrot.lane.b32.xlu1 %v732_v39, %s4724_s18 }
 0x10a   : > { %v737_v46 = vpop.f32.mrf.mxu0 }
 0x10b   : > { %v883_v48 = vmax.f32 %v5004_v43, 0.0  ;;  %v738_v49 = vadd.f32 %v737_v46, %v4903_v36 }
 0x10c   : > { %v5010_v51 = vpop.f32.mrf.mxu0 }
 0x10d   : > { %6193 = vst [vmem:[#allocation3_spill] sm:$0xff] %v5010_v51  ;;  %v909_v52 = vpack.c.bf16 %v883_v48, %v882_v47  ;;  %2217 = vrot.lane.b32.xlu0 %v738_v49, %s4724_s18  ;;  %v5014_v57 = vmul.f32 %v4906_v38, %v738_v49 }
 0x10e   : > { %v741_v54 = vpop.f32.mrf.mxu0 }
 0x10f   : > { %v742_v58 = vadd.f32 %v741_v54, %v4903_v36  ;;  %4340 = vmatmul.mubr.msk.bf16.gmra.mxu1 %vm959_vm2, %v909_v52  ;;  %v884_v63 = vmax.f32 %v5014_v57, 0.0 }
 0x110   : > { %v5018_v59 = vpop.f32.mrf.mxu0 }
 0x111   : > { %6194 = vst [vmem:[#allocation4_spill] sm:$0xff] %v5018_v59  ;;  %v5021_v60 = vmul.f32 %v4906_v38, %v742_v58  ;;  %2219 = vrot.lane.b32.xlu1 %v742_v58, %s4724_s18 }
 0x112   : > { %v747_v62 = vpop.f32.mrf.mxu0 }
 0x113   : > { %v885_v2 = vmax.f32 %v5021_v60, 0.0  ;;  %v748_v5 = vadd.f32 %v747_v62, %v4903_v36 }
 0x114   : > { %v5027_v7 = vpop.f32.mrf.mxu0 }
 0x115   : > { %6195 = vst [vmem:[#allocation5_spill] sm:$0xff] %v5027_v7  ;;  %v910_v8 = vpack.c.bf16 %v885_v2, %v884_v63  ;;  %2221 = vrot.lane.b32.xlu0 %v748_v5, %s4724_s18  ;;  %v5031_v11 = vmul.f32 %v4906_v38, %v748_v5 }
 0x116   : > { %v751_v9 = vpop.f32.mrf.mxu0 }
 0x117   : > { %v752_v12 = vadd.f32 %v751_v9, %v4903_v36  ;;  %4343 = vmatprep.mubr.msk.bf16.mxu1 %vm959_vm2, %v910_v8  ;;  %v886_v20 = vmax.f32 %v5031_v11, 0.0 }
 0x118   : > { %v5035_v15 = vpop.f32.mrf.mxu0 }
 0x119   : > { %6196 = vst [vmem:[#allocation6_spill] sm:$0xff] %v5035_v15  ;;  %v5038_v18 = vmul.f32 %v4906_v38, %v752_v12  ;;  %2223 = vrot.lane.b32.xlu1 %v752_v12, %s4724_s18  ;;  %v4685_v12 = vld [vmem:[%s6183_s6 + $0x18] sm:$0xff]  }
 0x11a   : > { %v757_v19 = vpop.f32.mrf.mxu0  ;;  %4363 = vmatprep.subr.bf16.mxu1 %v4685_v12 }
 0x11b   : > { %v887_v21 = vmax.f32 %v5038_v18, 0.0  ;;  %v758_v23 = vadd.f32 %v757_v19, %v4903_v36  ;;  %4364 = vmatpush3.bf16.msra.mxu1 %v4685_v12  ;;  %v4688_v12 = vld [vmem:[%s6183_s6] sm:$0xff]  }
 0x11c   : > { %v5044_v24 = vpop.f32.mrf.mxu0 }
 0x11d   : > { %6197 = vst [vmem:[#allocation7_spill] sm:$0xff] %v5044_v24  ;;  %v911_v26 = vpack.c.bf16 %v887_v21, %v886_v20  ;;  %2225 = vrot.lane.b32.xlu0 %v758_v23, %s4724_s18  ;;  %v5048_v30 = vmul.f32 %v4906_v38, %v758_v23 }
 0x11e   : > { %v761_v29 = vpop.f32.mrf.mxu0 }
 0x11f   : > { %v762_v31 = vadd.f32 %v761_v29, %v4903_v36  ;;  %4344 = vmatmul.mubr.msk.bf16.gmra.mxu1 %vm959_vm2, %v911_v26  ;;  %v888_v39 = vmax.f32 %v5048_v30, 0.0  ;;  %v4686_v29 = vld [vmem:[%s6183_s6 + $0x10] sm:$0xff]  }
 0x120   : > { %v5052_v32 = vpop.f32.mrf.mxu0  ;;  %4365 = vmatprep.subr.bf16.mxu1 %v4686_v29 }
 0x121   : > { %6198 = vst [vmem:[#allocation8_spill] sm:$0xff] %v5052_v32  ;;  %v5055_v34 = vmul.f32 %v4906_v38, %v762_v31  ;;  %2227 = vrot.lane.b32.xlu1 %v762_v31, %s4724_s18  ;;  %4366 = vmatpush3.bf16.msra.mxu1 %v4686_v29 }
 0x122   : > { %v767_v35 = vpop.f32.mrf.mxu0 }
 0x123   : > { %v889_v46 = vmax.f32 %v5055_v34, 0.0  ;;  %v768_v47 = vadd.f32 %v767_v35, %v4903_v36 }
 0x124   : > { %v5061_v48 = vpop.f32.mrf.mxu0 }
 0x125   : > { %6199 = vst [vmem:[#allocation9_spill] sm:$0xff] %v5061_v48  ;;  %v912_v49 = vpack.c.bf16 %v889_v46, %v888_v39  ;;  %2229 = vrot.lane.b32.xlu0 %v768_v47, %s4724_s18  ;;  %v5065_v54 = vmul.f32 %v4906_v38, %v768_v47 }
 0x126   : > { %v771_v52 = vpop.f32.mrf.mxu0 }
 0x127   : > { %v772_v58 = vadd.f32 %v771_v52, %v4903_v36  ;;  %4347 = vmatprep.mubr.msk.bf16.mxu1 %vm959_vm2, %v912_v49  ;;  %v890_v5 = vmax.f32 %v5065_v54, 0.0  ;;  %v4687_v52 = vld [vmem:[%s6183_s6 + $0x8] sm:$0xff]  }
 0x128   : > { %v5069_v62 = vpop.f32.mrf.mxu0  ;;  %4367 = vmatprep.subr.bf16.mxu1 %v4687_v52 }
 0x129   : > { %6200 = vst [vmem:[#allocation10_spill] sm:$0xff] %v5069_v62  ;;  %v5072_v63 = vmul.f32 %v4906_v38, %v772_v58  ;;  %2231 = vrot.lane.b32.xlu1 %v772_v58, %s4724_s18  ;;  %4368 = vmatpush3.bf16.msra.mxu1 %v4687_v52 }
 0x12a   : > { %v777_v2 = vpop.f32.mrf.mxu0  ;;  %4369 = vmatprep.subr.bf16.mxu1 %v4688_v12 }
 0x12b   : > { %v891_v8 = vmax.f32 %v5072_v63, 0.0  ;;  %v778_v9 = vadd.f32 %v777_v2, %v4903_v36 }
 0x12c   : > { %v5081_v19 = vpop.f32.mrf.mxu0 }
 0x12d   : > { %6201 = vst [vmem:[#allocation11_spill] sm:$0xff] %v5081_v19  ;;  %v913_v20 = vpack.c.bf16 %v891_v8, %v890_v5  ;;  %2233 = vrot.lane.b32.xlu0 %v778_v9, %s4724_s18  ;;  %v5085_v23 = vmul.f32 %v4906_v38, %v778_v9  ;;  %4370 = vmatpush3.bf16.msra.mxu1 %v4688_v12 }
 0x12e   : > { %v781_v21 = vpop.f32.mrf.mxu0 }
 0x12f   : > { %v782_v26 = vadd.f32 %v781_v21, %v4903_v36  ;;  %4348 = vmatmul.mubr.msk.bf16.gmra.mxu1 %vm959_vm2, %v913_v20  ;;  %v892_v46 = vmax.f32 %v5085_v23, 0.0 }
 0x130   : > { %v5092_v31 = vpop.f32.mrf.mxu0 }
 0x131   : > { %6202 = vst [vmem:[#allocation12_spill] sm:$0xff] %v5092_v31  ;;  %v5095_v35 = vmul.f32 %v4906_v38, %v782_v26  ;;  %2235 = vrot.lane.b32.xlu1 %v782_v26, %s4724_s18 }
 0x132   : > { %v787_v39 = vpop.f32.mrf.mxu0 }
 0x133   : > { %v893_v47 = vmax.f32 %v5095_v35, 0.0  ;;  %v788_v49 = vadd.f32 %v787_v39, %v4903_v36 }
 0x134   : > { %v5104_v58 = vpop.f32.mrf.mxu0 }
 0x135   : > { %6203 = vst [vmem:[#allocation13_spill] sm:$0xff] %v5104_v58  ;;  %v914_v2 = vpack.c.bf16 %v893_v47, %v892_v46  ;;  %2237 = vrot.lane.b32.xlu0 %v788_v49, %s4724_s18  ;;  %v5108_v8 = vmul.f32 %v4906_v38, %v788_v49 }
 0x136   : > { %v791_v5 = vpop.f32.mrf.mxu0 }
 0x137   : > { %v792_v9 = vadd.f32 %v791_v5, %v4903_v36  ;;  %4351 = vmatprep.mubr.msk.bf16.mxu1 %vm959_vm2, %v914_v2  ;;  %v894_v29 = vmax.f32 %v5108_v8, 0.0 }
 0x138   : > { %v5115_v20 = vpop.f32.mrf.mxu0 }
 0x139   : > { %6204 = vst [vmem:[#allocation14_spill] sm:$0xff] %v5115_v20  ;;  %v5118_v21 = vmul.f32 %v4906_v38, %v792_v9  ;;  %2239 = vrot.lane.b32.xlu1 %v792_v9, %s4724_s18 }
 0x13a   : > { %v797_v26 = vpop.f32.mrf.mxu0 }
 0x13b   : > { %v895_v39 = vmax.f32 %v5118_v21, 0.0  ;;  %v798_v46 = vadd.f32 %v797_v26, %v4903_v36 }
 0x13c   : > { %v5124_v47 = vpop.f32.mrf.mxu0 }
 0x13d   : > { %6205 = vst [vmem:[#allocation15_spill] sm:$0xff] %v5124_v47  ;;  %v915_v49 = vpack.c.bf16 %v895_v39, %v894_v29  ;;  %2241 = vrot.lane.b32.xlu0 %v798_v46, %s4724_s18  ;;  %v5128_v2 = vmul.f32 %v4906_v38, %v798_v46 }
 0x13e   : > { %v801_v52 = vpop.f32.mrf.mxu0 }
 0x13f   : > { %v802_v5 = vadd.f32 %v801_v52, %v4903_v36  ;;  %4352 = vmatmul.mubr.msk.bf16.gmra.mxu1 %vm959_vm2, %v915_v49  ;;  %v896_v29 = vmax.f32 %v5128_v2, 0.0 }
 0x140   : > { %v5132_v9 = vpop.f32.mrf.mxu0 }
 0x141   : > { %6206 = vst [vmem:[#allocation16_spill] sm:$0xff] %v5132_v9  ;;  %v5135_v12 = vmul.f32 %v4906_v38, %v802_v5  ;;  %2243 = vrot.lane.b32.xlu1 %v802_v5, %s4724_s18 }
 0x142   : > { %v807_v26 = vpop.f32.mrf.mxu0 }
 0x143   : > { %v897_v39 = vmax.f32 %v5135_v12, 0.0  ;;  %v808_v1 = vadd.f32 %v807_v26, %v4903_v36 }
 0x144   : > { %v5141_v46 = vpop.f32.mrf.mxu0 }
 0x145   : > { %6207 = vst [vmem:[#allocation17_spill] sm:$0xff] %v5141_v46  ;;  %v916_v47 = vpack.c.bf16 %v897_v39, %v896_v29  ;;  %2245 = vrot.lane.b32.xlu0 %v808_v1, %s4724_s18  ;;  %v5145_v52 = vmul.f32 %v4906_v38, %v808_v1 }
 0x146   : > { %v811_v49 = vpop.f32.mrf.mxu0 }
 0x147   : > { %v812_v9 = vadd.f32 %v811_v49, %v4903_v36  ;;  %4355 = vmatprep.mubr.msk.bf16.mxu1 %vm959_vm2, %v916_v47  ;;  %v898_v29 = vmax.f32 %v5145_v52, 0.0 }
 0x148   : > { %v5149_v5 = vpop.f32.mrf.mxu0 }
 0x149   : > { %6208 = vst [vmem:[#allocation18_spill] sm:$0xff] %v5149_v5  ;;  %v5152_v31 = vmul.f32 %v4906_v38, %v812_v9  ;;  %2247 = vrot.lane.b32.xlu1 %v812_v9, %s4724_s18 }
 0x14a   : > { %v817_v26 = vpop.f32.mrf.mxu0 }
 0x14b   : > { %v899_v39 = vmax.f32 %v5152_v31, 0.0  ;;  %v818_v46 = vadd.f32 %v817_v26, %v4903_v36 }
 0x14c   : > { %v5158_v1 = vpop.f32.mrf.mxu0 }
 0x14d   : > { %6209 = vst [vmem:[#allocation19_spill] sm:$0xff] %v5158_v1  ;;  %v917_v58 = vpack.c.bf16 %v899_v39, %v898_v29  ;;  %2249 = vrot.lane.b32.xlu0 %v818_v46, %s4724_s18  ;;  %v5162_v49 = vmul.f32 %v4906_v38, %v818_v46 }
 0x14e   : > { %v821_v47 = vpop.f32.mrf.mxu0 }
 0x14f   : > { %v822_v5 = vadd.f32 %v821_v47, %v4903_v36  ;;  %4356 = vmatmul.mubr.msk.bf16.gmra.mxu1 %vm959_vm2, %v917_v58  ;;  %v900_v29 = vmax.f32 %v5162_v49, 0.0 }
 0x150   : > { %v5166_v9 = vpop.f32.mrf.mxu0 }
 0x151   : > { %6210 = vst [vmem:[#allocation20_spill] sm:$0xff] %v5166_v9  ;;  %v5169_v20 = vmul.f32 %v4906_v38, %v822_v5  ;;  %2251 = vrot.lane.b32.xlu1 %v822_v5, %s4724_s18 }
 0x152   : > { %v827_v26 = vpop.f32.mrf.mxu0 }
 0x153   : > { %v901_v39 = vmax.f32 %v5169_v20, 0.0  ;;  %v828_v1 = vadd.f32 %v827_v26, %v4903_v36 }
 0x154   : > { %v5175_v46 = vpop.f32.mrf.mxu0 }
 0x155   : > { %6211 = vst [vmem:[#allocation21_spill] sm:$0xff] %v5175_v46  ;;  %v918_v19 = vpack.c.bf16 %v901_v39, %v900_v29  ;;  %2253 = vrot.lane.b32.xlu0 %v828_v1, %s4724_s18  ;;  %v5179_v47 = vmul.f32 %v4906_v38, %v828_v1  ;;  %v4689_v1 = vld [vmem:[%s6181_s4 + $0x38] sm:$0xff]  }
 0x156   : > { %v831_v58 = vpop.f32.mrf.mxu0  ;;  %4403 = vmatprep.subr.bf16.mxu0 %v4689_v1 }
 0x157   : > { %v832_v9 = vadd.f32 %v831_v58, %v4903_v36  ;;  %4359 = vmatprep.mubr.msk.bf16.mxu1 %vm959_vm2, %v918_v19  ;;  %v902_v26 = vmax.f32 %v5179_v47, 0.0  ;;  %v4690_v36 = vld [vmem:[%s6181_s4 + $0x30] sm:$0xff]   ;;  %4404 = vmatpush3.bf16.msra.mxu0 %v4689_v1 }
 0x158   : > { %4405 = vmatprep.subr.bf16.mxu0 %v4690_v36 }
 0x159   : > { %v5184_v5 = vmul.f32 %v4906_v38, %v832_v9  ;;  %2255 = vrot.lane.b32.xlu1 %v832_v9, %s4724_s18  ;;  %v5199_v9 = vld [vmem:[%s6182_s5] ss:$0 sm:$0xff] }
 0x15b   : > { %v903_v46 = vmax.f32 %v5184_v5, 0.0  ;;  %4406 = vmatpush3.bf16.msra.mxu0 %v4690_v36 }
 0x15d   : > { %v919_v29 = vpack.c.bf16 %v903_v46, %v902_v26 }
 0x15f   : > { %4360 = vmatmul.mubr.msk.bf16.gmra.mxu1 %vm959_vm2, %v919_v29 }
 0x1af   : > { %v4333_v19 = vpop.f32.mrf.mxu1 }
 0x1b0   : > { %v1051_v26 = vadd.f32 %v4333_v19, %v5199_v9 }
 0x1b1   : > { %v1042_v38 = vpop.f32.mrf.mxu1 }
 0x1b2   : > { %v1043_v46 = vadd.f32 %v5199_v9, %v1042_v38  ;;  %v1171_v24 = vmax.f32 %v1051_v26, 0.0 }
 0x1b3   : > { %v4334_v39 = vpop.f32.mrf.mxu1 }
 0x1b4   : > { %v1054_v58 = vadd.f32 %v4334_v39, %v5199_v9  ;;  %v1169_v1 = vmax.f32 %v1043_v46, 0.0 }
 0x1b5   : > { %v1045_v29 = vpop.f32.mrf.mxu1 }
 0x1b6   : > { %v1046_v32 = vadd.f32 %v5199_v9, %v1045_v29  ;;  %v1172_v48 = vmax.f32 %v1054_v58, 0.0 }
 0x1b8   : > { %v1170_v62 = vmax.f32 %v1046_v32, 0.0  ;;  %v1202_v7 = vpack.c.bf16 %v1172_v48, %v1171_v24 }
 0x1ba   : > { %v1201_v59 = vpack.c.bf16 %v1170_v62, %v1169_v1 }
 0x1bc   : > { %4371 = vmatprep.mubr.msk.bf16.mxu1 %vm959_vm2, %v1201_v59 }
 0x1bd   : > { %4372 = vmatmul.mubr.msk.bf16.vlgmr.msra.gmra.mxu1 %vm959_vm2, %v1202_v7 }
 0x1bf   : > { %v4337_v15 = vpop.f32.mrf.mxu1 }
 0x1c0   : > { %v1067_v39 = vadd.f32 %v4337_v15, %v5199_v9 }
 0x1c1   : > { %v1058_v38 = vpop.f32.mrf.mxu1 }
 0x1c2   : > { %v1059_v36 = vadd.f32 %v5199_v9, %v1058_v38  ;;  %v1175_v24 = vmax.f32 %v1067_v39, 0.0 }
 0x1c3   : > { %v4338_v51 = vpop.f32.mrf.mxu1 }
 0x1c4   : > { %v1070_v19 = vadd.f32 %v4338_v51, %v5199_v9  ;;  %v1173_v58 = vmax.f32 %v1059_v36, 0.0 }
 0x1c5   : > { %v1061_v29 = vpop.f32.mrf.mxu1 }
 0x1c6   : > { %v1062_v46 = vadd.f32 %v5199_v9, %v1061_v29  ;;  %v1176_v32 = vmax.f32 %v1070_v19, 0.0 }
 0x1c8   : > { %v1174_v62 = vmax.f32 %v1062_v46, 0.0  ;;  %v1204_v59 = vpack.c.bf16 %v1176_v32, %v1175_v24 }
 0x1ca   : > { %v1203_v48 = vpack.c.bf16 %v1174_v62, %v1173_v58 }
 0x1cc   : > { %4375 = vmatprep.mubr.msk.bf16.mxu1 %vm959_vm2, %v1203_v48 }
 0x1cd   : > { %4376 = vmatmul.mubr.msk.bf16.gmra.mxu1 %vm959_vm2, %v1204_v59 }
 0x1cf   : > { %v4341_v7 = vpop.f32.mrf.mxu1 }
 0x1d0   : > { %v1083_v38 = vadd.f32 %v4341_v7, %v5199_v9 }
 0x1d1   : > { %v1074_v26 = vpop.f32.mrf.mxu1 }
 0x1d2   : > { %v1075_v51 = vadd.f32 %v5199_v9, %v1074_v26  ;;  %v1179_v32 = vmax.f32 %v1083_v38, 0.0 }
 0x1d3   : > { %v4342_v1 = vpop.f32.mrf.mxu1 }
 0x1d4   : > { %v1086_v15 = vadd.f32 %v4342_v1, %v5199_v9  ;;  %v1177_v39 = vmax.f32 %v1075_v51, 0.0 }
 0x1d5   : > { %v1077_v29 = vpop.f32.mrf.mxu1 }
 0x1d6   : > { %v1078_v36 = vadd.f32 %v5199_v9, %v1077_v29  ;;  %v1180_v19 = vmax.f32 %v1086_v15, 0.0 }
 0x1d8   : > { %v1178_v46 = vmax.f32 %v1078_v36, 0.0  ;;  %v1206_v62 = vpack.c.bf16 %v1180_v19, %v1179_v32 }
 0x1da   : > { %v1205_v58 = vpack.c.bf16 %v1178_v46, %v1177_v39 }
 0x1dc   : > { %4379 = vmatprep.mubr.msk.bf16.mxu1 %vm959_vm2, %v1205_v58 }
 0x1dd   : > { %4380 = vmatmul.mubr.msk.bf16.gmra.mxu1 %vm959_vm2, %v1206_v62 }
 0x1df   : > { %v4345_v24 = vpop.f32.mrf.mxu1 }
 0x1e0   : > { %v1099_v1 = vadd.f32 %v4345_v24, %v5199_v9 }
 0x1e1   : > { %v1090_v48 = vpop.f32.mrf.mxu1 }
 0x1e2   : > { %v1091_v26 = vadd.f32 %v5199_v9, %v1090_v48  ;;  %v1183_v19 = vmax.f32 %v1099_v1, 0.0 }
 0x1e3   : > { %v4346_v59 = vpop.f32.mrf.mxu1 }
 0x1e4   : > { %v1102_v7 = vadd.f32 %v4346_v59, %v5199_v9  ;;  %v1181_v38 = vmax.f32 %v1091_v26, 0.0 }
 0x1e5   : > { %v1093_v29 = vpop.f32.mrf.mxu1 }
 0x1e6   : > { %v1094_v51 = vadd.f32 %v5199_v9, %v1093_v29  ;;  %v1184_v15 = vmax.f32 %v1102_v7, 0.0 }
 0x1e8   : > { %v1182_v36 = vmax.f32 %v1094_v51, 0.0  ;;  %v1208_v46 = vpack.c.bf16 %v1184_v15, %v1183_v19 }
 0x1ea   : > { %v1207_v39 = vpack.c.bf16 %v1182_v36, %v1181_v38 }
 0x1ec   : > { %4383 = vmatprep.mubr.msk.bf16.mxu1 %vm959_vm2, %v1207_v39 }
 0x1ed   : > { %4384 = vmatmul.mubr.msk.bf16.gmra.mxu1 %vm959_vm2, %v1208_v46 }
 0x1ef   : > { %v4349_v32 = vpop.f32.mrf.mxu1 }
 0x1f0   : > { %v1115_v59 = vadd.f32 %v4349_v32, %v5199_v9  ;;  %v4691_v32 = vld [vmem:[%s6181_s4 + $0x28] sm:$0xff]  }
 0x1f1   : > { %v1106_v58 = vpop.f32.mrf.mxu1  ;;  %4407 = vmatprep.subr.bf16.mxu0 %v4691_v32 }
 0x1f2   : > { %v1107_v48 = vadd.f32 %v5199_v9, %v1106_v58  ;;  %v1187_v15 = vmax.f32 %v1115_v59, 0.0  ;;  %4408 = vmatpush3.bf16.msra.mxu0 %v4691_v32 }
 0x1f3   : > { %v4350_v62 = vpop.f32.mrf.mxu1 }
 0x1f4   : > { %v1118_v24 = vadd.f32 %v4350_v62, %v5199_v9  ;;  %v1185_v1 = vmax.f32 %v1107_v48, 0.0 }
 0x1f5   : > { %v1109_v29 = vpop.f32.mrf.mxu1 }
 0x1f6   : > { %v1110_v26 = vadd.f32 %v5199_v9, %v1109_v29  ;;  %v1188_v7 = vmax.f32 %v1118_v24, 0.0 }
 0x1f8   : > { %v1186_v51 = vmax.f32 %v1110_v26, 0.0  ;;  %v1210_v36 = vpack.c.bf16 %v1188_v7, %v1187_v15  ;;  %v4692_v26 = vld [vmem:[%s6181_s4 + $0x20] sm:$0xff]  }
 0x1f9   : > { %4409 = vmatprep.subr.bf16.mxu0 %v4692_v26 }
 0x1fa   : > { %v1209_v38 = vpack.c.bf16 %v1186_v51, %v1185_v1  ;;  %4410 = vmatpush3.bf16.msra.mxu0 %v4692_v26 }
 0x1fc   : > { %4387 = vmatprep.mubr.msk.bf16.mxu1 %vm959_vm2, %v1209_v38 }
 0x1fd   : > { %4388 = vmatmul.mubr.msk.bf16.gmra.mxu1 %vm959_vm2, %v1210_v36 }
 0x1ff   : > { %v4353_v19 = vpop.f32.mrf.mxu1 }
 0x200   : > { %v1131_v48 = vadd.f32 %v4353_v19, %v5199_v9 }
 0x201   : > { %v1122_v39 = vpop.f32.mrf.mxu1 }
 0x202   : > { %v1123_v58 = vadd.f32 %v5199_v9, %v1122_v39  ;;  %v1191_v51 = vmax.f32 %v1131_v48, 0.0 }
 0x203   : > { %v4354_v46 = vpop.f32.mrf.mxu1 }
 0x204   : > { %v1134_v62 = vadd.f32 %v4354_v46, %v5199_v9  ;;  %v1189_v7 = vmax.f32 %v1123_v58, 0.0 }
 0x205   : > { %v1125_v24 = vpop.f32.mrf.mxu1 }
 0x206   : > { %v1126_v59 = vadd.f32 %v5199_v9, %v1125_v24  ;;  %v1192_v29 = vmax.f32 %v1134_v62, 0.0 }
 0x208   : > { %v1190_v1 = vmax.f32 %v1126_v59, 0.0  ;;  %v1212_v38 = vpack.c.bf16 %v1192_v29, %v1191_v51 }
 0x20a   : > { %v1211_v15 = vpack.c.bf16 %v1190_v1, %v1189_v7 }
 0x20c   : > { %4391 = vmatprep.mubr.msk.bf16.mxu1 %vm959_vm2, %v1211_v15 }
 0x20d   : > { %4392 = vmatmul.mubr.msk.bf16.gmra.mxu1 %vm959_vm2, %v1212_v38 }
 0x20f   : > { %v4357_v36 = vpop.f32.mrf.mxu1 }
 0x210   : > { %v1147_v62 = vadd.f32 %v4357_v36, %v5199_v9 }
 0x211   : > { %v1138_v19 = vpop.f32.mrf.mxu1 }
 0x212   : > { %v1139_v46 = vadd.f32 %v5199_v9, %v1138_v19  ;;  %v1195_v29 = vmax.f32 %v1147_v62, 0.0 }
 0x213   : > { %v4358_v39 = vpop.f32.mrf.mxu1 }
 0x214   : > { %v1150_v32 = vadd.f32 %v4358_v39, %v5199_v9  ;;  %v1193_v59 = vmax.f32 %v1139_v46, 0.0 }
 0x215   : > { %v1141_v58 = vpop.f32.mrf.mxu1 }
 0x216   : > { %v1142_v48 = vadd.f32 %v5199_v9, %v1141_v58  ;;  %v1196_v24 = vmax.f32 %v1150_v32, 0.0 }
 0x218   : > { %v1194_v26 = vmax.f32 %v1142_v48, 0.0  ;;  %v1214_v1 = vpack.c.bf16 %v1196_v24, %v1195_v29 }
 0x21a   : > { %v1213_v7 = vpack.c.bf16 %v1194_v26, %v1193_v59 }
 0x21c   : > { %4395 = vmatprep.mubr.msk.bf16.mxu1 %vm959_vm2, %v1213_v7  ;;  %v4693_v7 = vld [vmem:[%s6183_s6 + $0x38] sm:$0xff]  }
 0x21d   : > { %4396 = vmatmul.mubr.msk.bf16.gmra.mxu1 %vm959_vm2, %v1214_v1  ;;  %v5261_v1 = vld [vmem:[%s6184_s7] ss:$0 sm:$0xff]  ;;  %4443 = vmatprep.subr.bf16.mxu1 %v4693_v7 }
 0x21e   : > { %4444 = vmatpush3.bf16.msra.mxu1 %v4693_v7 }
 0x21f   : > { %v4361_v51 = vpop.f32.mrf.mxu1 }
 0x220   : > { %v1163_v39 = vadd.f32 %v4361_v51, %v5199_v9 }
 0x221   : > { %v1154_v15 = vpop.f32.mrf.mxu1 }
 0x222   : > { %v1155_v19 = vadd.f32 %v5199_v9, %v1154_v15  ;;  %v1199_v24 = vmax.f32 %v1163_v39, 0.0 }
 0x223   : > { %v4362_v38 = vpop.f32.mrf.mxu1 }
 0x224   : > { %v1166_v36 = vadd.f32 %v4362_v38, %v5199_v9  ;;  %v1197_v62 = vmax.f32 %v1155_v19, 0.0 }
 0x225   : > { %v1157_v58 = vpop.f32.mrf.mxu1 }
 0x226   : > { %v1158_v46 = vadd.f32 %v5199_v9, %v1157_v58  ;;  %v1200_v32 = vmax.f32 %v1166_v36, 0.0 }
 0x228   : > { %v1198_v48 = vmax.f32 %v1158_v46, 0.0  ;;  %v1216_v26 = vpack.c.bf16 %v1200_v32, %v1199_v24 }
 0x22a   : > { %v1215_v59 = vpack.c.bf16 %v1198_v48, %v1197_v62 }
 0x22c   : > { %4399 = vmatprep.mubr.msk.bf16.mxu1 %vm959_vm2, %v1215_v59 }
 0x22d   : > { %4400 = vmatmul.mubr.msk.bf16.gmra.mxu1 %vm959_vm2, %v1216_v26 }
 0x27d   : > { %v4373_v29 = vpop.f32.mrf.mxu1 }
 0x27e   : > { %v1347_v15 = vadd.f32 %v4373_v29, %v5261_v1 }
 0x27f   : > { %v1338_v9 = vpop.f32.mrf.mxu1 }
 0x280   : > { %v1339_v51 = vadd.f32 %v5261_v1, %v1338_v9  ;;  %v5274_v32 = vadd.f32 %v1347_v15, %v4929_v53 }
 0x281   : > { %v4374_v38 = vpop.f32.mrf.mxu1 }
 0x282   : > { %v1350_v19 = vadd.f32 %v4374_v38, %v5261_v1  ;;  %v5267_v39 = vadd.f32 %v1339_v51, %v4913_v42  ;;  %v1499_v42 = vmax.f32 %v5274_v32, 0.0 }
 0x283   : > { %v1341_v36 = vpop.f32.mrf.mxu1 }
 0x284   : > { %v5270_v58 = vadd.f32 %v1350_v19, %v4936_v56  ;;  %v1342_v46 = vadd.f32 %v5261_v1, %v1341_v36  ;;  %v1497_v24 = vmax.f32 %v5267_v39, 0.0 }
 0x286   : > { %v5277_v62 = vadd.f32 %v1342_v46, %v4919_v45  ;;  %v1500_v48 = vmax.f32 %v5270_v58, 0.0 }
 0x288   : > { %v1498_v59 = vmax.f32 %v5277_v62, 0.0  ;;  %v1530_v29 = vpack.c.bf16 %v1500_v48, %v1499_v42 }
 0x28a   : > { %v1529_v26 = vpack.c.bf16 %v1498_v59, %v1497_v24 }
 0x28c   : > { %4411 = vmatprep.mubr.msk.bf16.mxu0 %vm959_vm2, %v1529_v26 }
 0x28d   : > { %v4377_v56 = vpop.f32.mrf.mxu1  ;;  %4412 = vmatmul.mubr.msk.bf16.vlgmr.msra.gmra.mxu0 %vm959_vm2, %v1530_v29 }
 0x28e   : > { %v1363_v45 = vadd.f32 %v4377_v56, %v5261_v1 }
 0x28f   : > { %v1354_v53 = vpop.f32.mrf.mxu1 }
 0x290   : > { %v1355_v7 = vadd.f32 %v5261_v1, %v1354_v53  ;;  %v5296_v46 = vadd.f32 %v1363_v45, %v4963_v14 }
 0x291   : > { %v4378_v9 = vpop.f32.mrf.mxu1 }
 0x292   : > { %v1366_v51 = vadd.f32 %v4378_v9, %v5261_v1  ;;  %v5289_v38 = vadd.f32 %v1355_v7, %v4946_v0  ;;  %v1503_v0 = vmax.f32 %v5296_v46, 0.0 }
 0x293   : > { %v1357_v15 = vpop.f32.mrf.mxu1 }
 0x294   : > { %v5292_v19 = vadd.f32 %v1366_v51, %v4970_v17  ;;  %v1358_v36 = vadd.f32 %v5261_v1, %v1357_v15  ;;  %v1501_v59 = vmax.f32 %v5289_v38, 0.0 }
 0x296   : > { %v5299_v48 = vadd.f32 %v1358_v36, %v4953_v4  ;;  %v1504_v24 = vmax.f32 %v5292_v19, 0.0 }
 0x298   : > { %v1502_v42 = vmax.f32 %v5299_v48, 0.0  ;;  %v1532_v29 = vpack.c.bf16 %v1504_v24, %v1503_v0 }
 0x29a   : > { %v1531_v26 = vpack.c.bf16 %v1502_v42, %v1501_v59 }
 0x29c   : > { %4415 = vmatprep.mubr.msk.bf16.mxu0 %vm959_vm2, %v1531_v26 }
 0x29d   : > { %v4381_v17 = vpop.f32.mrf.mxu1  ;;  %4416 = vmatmul.mubr.msk.bf16.gmra.mxu0 %vm959_vm2, %v1532_v29 }
 0x29e   : > { %v1379_v4 = vadd.f32 %v4381_v17, %v5261_v1 }
 0x29f   : > { %v1370_v14 = vpop.f32.mrf.mxu1 }
 0x2a0   : > { %v1371_v56 = vadd.f32 %v5261_v1, %v1370_v14  ;;  %v5318_v36 = vadd.f32 %v1379_v4, %v4997_v37 }
 0x2a1   : > { %v4382_v53 = vpop.f32.mrf.mxu1 }
 0x2a2   : > { %v1382_v7 = vadd.f32 %v4382_v53, %v5261_v1  ;;  %v5311_v9 = vadd.f32 %v1371_v56, %v4980_v25  ;;  %v1507_v25 = vmax.f32 %v5318_v36, 0.0 }
 0x2a3   : > { %v1373_v45 = vpop.f32.mrf.mxu1 }
 0x2a4   : > { %v5314_v51 = vadd.f32 %v1382_v7, %v5004_v43  ;;  %v1374_v15 = vadd.f32 %v5261_v1, %v1373_v45  ;;  %v1505_v42 = vmax.f32 %v5311_v9, 0.0 }
 0x2a6   : > { %v5321_v24 = vadd.f32 %v1374_v15, %v4987_v28  ;;  %v1508_v59 = vmax.f32 %v5314_v51, 0.0 }
 0x2a8   : > { %v1506_v0 = vmax.f32 %v5321_v24, 0.0  ;;  %v1534_v29 = vpack.c.bf16 %v1508_v59, %v1507_v25 }
 0x2aa   : > { %v1533_v26 = vpack.c.bf16 %v1506_v0, %v1505_v42 }
 0x2ac   : > { %4419 = vmatprep.mubr.msk.bf16.mxu0 %vm959_vm2, %v1533_v26 }
 0x2ad   : > { %v4385_v43 = vpop.f32.mrf.mxu1  ;;  %4420 = vmatmul.mubr.msk.bf16.gmra.mxu0 %vm959_vm2, %v1534_v29 }
 0x2ae   : > { %v1395_v28 = vadd.f32 %v4385_v43, %v5261_v1 }
 0x2af   : > { %v1386_v37 = vpop.f32.mrf.mxu1 }
 0x2b0   : > { %v1387_v17 = vadd.f32 %v5261_v1, %v1386_v37  ;;  %v5340_v15 = vadd.f32 %v1395_v28, %v5031_v11 }
 0x2b1   : > { %v4386_v14 = vpop.f32.mrf.mxu1 }
 0x2b2   : > { %v1398_v56 = vadd.f32 %v4386_v14, %v5261_v1  ;;  %v5333_v53 = vadd.f32 %v1387_v17, %v5014_v57  ;;  %v1511_v57 = vmax.f32 %v5340_v15, 0.0 }
 0x2b3   : > { %v1389_v4 = vpop.f32.mrf.mxu1 }
 0x2b4   : > { %v5336_v7 = vadd.f32 %v1398_v56, %v5038_v18  ;;  %v1390_v45 = vadd.f32 %v5261_v1, %v1389_v4  ;;  %v1509_v0 = vmax.f32 %v5333_v53, 0.0 }
 0x2b6   : > { %v5343_v59 = vadd.f32 %v1390_v45, %v5021_v60  ;;  %v1512_v42 = vmax.f32 %v5336_v7, 0.0 }
 0x2b8   : > { %v1510_v25 = vmax.f32 %v5343_v59, 0.0  ;;  %v1536_v29 = vpack.c.bf16 %v1512_v42, %v1511_v57 }
 0x2ba   : > { %v1535_v26 = vpack.c.bf16 %v1510_v25, %v1509_v0 }
 0x2bc   : > { %4423 = vmatprep.mubr.msk.bf16.mxu0 %vm959_vm2, %v1535_v26 }
 0x2bd   : > { %v4389_v18 = vpop.f32.mrf.mxu1  ;;  %4424 = vmatmul.mubr.msk.bf16.gmra.mxu0 %vm959_vm2, %v1536_v29 }
 0x2be   : > { %v1411_v60 = vadd.f32 %v4389_v18, %v5261_v1 }
 0x2bf   : > { %v1402_v11 = vpop.f32.mrf.mxu1 }
 0x2c0   : > { %v1403_v43 = vadd.f32 %v5261_v1, %v1402_v11  ;;  %v5362_v45 = vadd.f32 %v1411_v60, %v5065_v54  ;;  %v4695_v60 = vld [vmem:[%s6183_s6 + $0x28] sm:$0xff]  }
 0x2c1   : > { %v4390_v37 = vpop.f32.mrf.mxu1 }
 0x2c2   : > { %v1414_v17 = vadd.f32 %v4390_v37, %v5261_v1  ;;  %v5355_v14 = vadd.f32 %v1403_v43, %v5048_v30  ;;  %v1515_v30 = vmax.f32 %v5362_v45, 0.0 }
 0x2c3   : > { %v1405_v28 = vpop.f32.mrf.mxu1 }
 0x2c4   : > { %v5358_v56 = vadd.f32 %v1414_v17, %v5072_v63  ;;  %v1406_v4 = vadd.f32 %v5261_v1, %v1405_v28  ;;  %v1513_v25 = vmax.f32 %v5355_v14, 0.0 }
 0x2c6   : > { %v5365_v42 = vadd.f32 %v1406_v4, %v5055_v34  ;;  %v1516_v0 = vmax.f32 %v5358_v56, 0.0  ;;  %v4694_v34 = vld [vmem:[%s6183_s6 + $0x30] sm:$0xff]  }
 0x2c7   : > { %4445 = vmatprep.subr.bf16.mxu1 %v4694_v34 }
 0x2c8   : > { %v1514_v57 = vmax.f32 %v5365_v42, 0.0  ;;  %v1538_v29 = vpack.c.bf16 %v1516_v0, %v1515_v30  ;;  %4446 = vmatpush3.bf16.msra.mxu1 %v4694_v34 }
 0x2c9   : > { %4447 = vmatprep.subr.bf16.mxu1 %v4695_v60 }
 0x2ca   : > { %v1537_v26 = vpack.c.bf16 %v1514_v57, %v1513_v25  ;;  %v4696_v57 = vld [vmem:[%s6183_s6 + $0x20] sm:$0xff]  }
 0x2cc   : > { %4427 = vmatprep.mubr.msk.bf16.mxu0 %vm959_vm2, %v1537_v26  ;;  %4448 = vmatpush3.bf16.msra.mxu1 %v4695_v60 }
 0x2cd   : > { %v4393_v63 = vpop.f32.mrf.mxu1  ;;  %4428 = vmatmul.mubr.msk.bf16.gmra.mxu0 %vm959_vm2, %v1538_v29  ;;  %4449 = vmatprep.subr.bf16.mxu1 %v4696_v57 }
 0x2ce   : > { %v1427_v11 = vadd.f32 %v4393_v63, %v5261_v1 }
 0x2cf   : > { %v1418_v54 = vpop.f32.mrf.mxu1 }
 0x2d0   : > { %v1419_v18 = vadd.f32 %v5261_v1, %v1418_v54  ;;  %v5390_v25 = vadd.f32 %v1427_v11, %v5108_v8  ;;  %4450 = vmatpush3.bf16.msra.mxu1 %v4696_v57 }
 0x2d1   : > { %v4394_v43 = vpop.f32.mrf.mxu1 }
 0x2d2   : > { %v1430_v37 = vadd.f32 %v4394_v43, %v5261_v1  ;;  %v5383_v28 = vadd.f32 %v1419_v18, %v5085_v23  ;;  %v1519_v29 = vmax.f32 %v5390_v25, 0.0 }
 0x2d3   : > { %v1421_v17 = vpop.f32.mrf.mxu1 }
 0x2d4   : > { %v5386_v4 = vadd.f32 %v1430_v37, %v5118_v21  ;;  %v1422_v0 = vadd.f32 %v5261_v1, %v1421_v17  ;;  %v1517_v23 = vmax.f32 %v5383_v28, 0.0 }
 0x2d6   : > { %v5396_v30 = vadd.f32 %v1422_v0, %v5095_v35  ;;  %v1520_v26 = vmax.f32 %v5386_v4, 0.0 }
 0x2d8   : > { %v1518_v21 = vmax.f32 %v5396_v30, 0.0  ;;  %v1540_v8 = vpack.c.bf16 %v1520_v26, %v1519_v29 }
 0x2da   : > { %v1539_v63 = vpack.c.bf16 %v1518_v21, %v1517_v23 }
 0x2dc   : > { %4431 = vmatprep.mubr.msk.bf16.mxu0 %vm959_vm2, %v1539_v63 }
 0x2dd   : > { %v4397_v34 = vpop.f32.mrf.mxu1  ;;  %4432 = vmatmul.mubr.msk.bf16.gmra.mxu0 %vm959_vm2, %v1540_v8 }
 0x2de   : > { %v1443_v18 = vadd.f32 %v4397_v34, %v5261_v1 }
 0x2df   : > { %v1434_v54 = vpop.f32.mrf.mxu1 }
 0x2e0   : > { %v1435_v35 = vadd.f32 %v5261_v1, %v1434_v54  ;;  %v5415_v57 = vadd.f32 %v1443_v18, %v5145_v52 }
 0x2e1   : > { %v4398_v11 = vpop.f32.mrf.mxu1 }
 0x2e2   : > { %v1446_v43 = vadd.f32 %v4398_v11, %v5261_v1  ;;  %v5408_v37 = vadd.f32 %v1435_v35, %v5128_v2  ;;  %v1523_v2 = vmax.f32 %v5415_v57, 0.0 }
 0x2e3   : > { %v1437_v60 = vpop.f32.mrf.mxu1 }
 0x2e4   : > { %v5411_v17 = vadd.f32 %v1446_v43, %v5152_v31  ;;  %v1438_v0 = vadd.f32 %v5261_v1, %v1437_v60  ;;  %v1521_v21 = vmax.f32 %v5408_v37, 0.0 }
 0x2e6   : > { %v5418_v26 = vadd.f32 %v1438_v0, %v5135_v12  ;;  %v1524_v23 = vmax.f32 %v5411_v17, 0.0 }
 0x2e8   : > { %v1522_v29 = vmax.f32 %v5418_v26, 0.0  ;;  %v1542_v8 = vpack.c.bf16 %v1524_v23, %v1523_v2 }
 0x2ea   : > { %v1541_v63 = vpack.c.bf16 %v1522_v29, %v1521_v21 }
 0x2ec   : > { %4435 = vmatprep.mubr.msk.bf16.mxu0 %vm959_vm2, %v1541_v63 }
 0x2ed   : > { %v4401_v31 = vpop.f32.mrf.mxu1  ;;  %4436 = vmatmul.mubr.msk.bf16.gmra.mxu0 %vm959_vm2, %v1542_v8 }
 0x2ee   : > { %v1459_v12 = vadd.f32 %v4401_v31, %v5261_v1 }
 0x2ef   : > { %v1450_v52 = vpop.f32.mrf.mxu1 }
 0x2f0   : > { %v1451_v34 = vadd.f32 %v5261_v1, %v1450_v52  ;;  %v5437_v0 = vadd.f32 %v1459_v12, %v5179_v47 }
 0x2f1   : > { %v4402_v54 = vpop.f32.mrf.mxu1 }
 0x2f2   : > { %v1462_v35 = vadd.f32 %v4402_v54, %v5261_v1  ;;  %v5430_v11 = vadd.f32 %v1451_v34, %v5162_v49  ;;  %v1527_v49 = vmax.f32 %v5437_v0, 0.0 }
 0x2f3   : > { %v1453_v18 = vpop.f32.mrf.mxu1 }
 0x2f4   : > { %v5433_v43 = vadd.f32 %v1462_v35, %v5184_v5  ;;  %v1454_v60 = vadd.f32 %v5261_v1, %v1453_v18  ;;  %v1525_v29 = vmax.f32 %v5430_v11, 0.0  ;;  %v5448_v5 = vpop.f32.mrf.mxu0 }
 0x2f5   : > { %6212 = vst [vmem:[#allocation22_spill] sm:$0xff] %v5448_v5 }
 0x2f6   : > { %v5440_v23 = vadd.f32 %v1454_v60, %v5169_v20  ;;  %v1528_v21 = vmax.f32 %v5433_v43, 0.0  ;;  %v5453_v20 = vld [vmem:[%s6182_s5 + $0x1] ss:$0 sm:$0xff] }
 0x2f8   : > { %v1526_v2 = vmax.f32 %v5440_v23, 0.0  ;;  %v1544_v8 = vpack.c.bf16 %v1528_v21, %v1527_v49 }
 0x2fa   : > { %v1543_v63 = vpack.c.bf16 %v1526_v2, %v1525_v29 }
 0x2fc   : > { %4439 = vmatprep.mubr.msk.bf16.mxu0 %vm959_vm2, %v1543_v63 }
 0x2fd   : > { %4440 = vmatmul.mubr.msk.bf16.gmra.mxu0 %vm959_vm2, %v1544_v8 }
 0x34d   : > { %v4413_v47 = vpop.f32.mrf.mxu0 }
 0x34e   : > { %v1677_v12 = vadd.f32 %v4413_v47, %v5453_v20 }
 0x34f   : > { %v1668_v1 = vpop.f32.mrf.mxu0 }
 0x350   : > { %v1669_v52 = vadd.f32 %v5453_v20, %v1668_v1  ;;  %v1797_v29 = vmax.f32 %v1677_v12, 0.0 }
 0x351   : > { %v4414_v31 = vpop.f32.mrf.mxu0 }
 0x352   : > { %v1680_v34 = vadd.f32 %v4414_v31, %v5453_v20  ;;  %v1795_v60 = vmax.f32 %v1669_v52, 0.0 }
 0x353   : > { %v1671_v54 = vpop.f32.mrf.mxu0 }
 0x354   : > { %v1672_v35 = vadd.f32 %v5453_v20, %v1671_v54  ;;  %v1798_v18 = vmax.f32 %v1680_v34, 0.0 }
 0x356   : > { %v1796_v21 = vmax.f32 %v1672_v35, 0.0  ;;  %v1828_v49 = vpack.c.bf16 %v1798_v18, %v1797_v29 }
 0x358   : > { %v1827_v2 = vpack.c.bf16 %v1796_v21, %v1795_v60 }
 0x35a   : > { %4451 = vmatprep.mubr.msk.bf16.mxu1 %vm959_vm2, %v1827_v2 }
 0x35b   : > { %4452 = vmatmul.mubr.msk.bf16.vlgmr.msra.gmra.mxu1 %vm959_vm2, %v1828_v49 }
 0x35d   : > { %v4417_v63 = vpop.f32.mrf.mxu0 }
 0x35e   : > { %v1693_v5 = vadd.f32 %v4417_v63, %v5453_v20 }
 0x35f   : > { %v1684_v8 = vpop.f32.mrf.mxu0 }
 0x360   : > { %v1685_v31 = vadd.f32 %v5453_v20, %v1684_v8  ;;  %v1801_v18 = vmax.f32 %v1693_v5, 0.0 }
 0x361   : > { %v4418_v1 = vpop.f32.mrf.mxu0 }
 0x362   : > { %v1696_v47 = vadd.f32 %v4418_v1, %v5453_v20  ;;  %v1799_v12 = vmax.f32 %v1685_v31, 0.0 }
 0x363   : > { %v1687_v54 = vpop.f32.mrf.mxu0 }
 0x364   : > { %v1688_v52 = vadd.f32 %v5453_v20, %v1687_v54  ;;  %v1802_v34 = vmax.f32 %v1696_v47, 0.0 }
 0x366   : > { %v1800_v35 = vmax.f32 %v1688_v52, 0.0  ;;  %v1830_v21 = vpack.c.bf16 %v1802_v34, %v1801_v18 }
 0x368   : > { %v1829_v60 = vpack.c.bf16 %v1800_v35, %v1799_v12 }
 0x36a   : > { %4455 = vmatprep.mubr.msk.bf16.mxu1 %vm959_vm2, %v1829_v60 }
 0x36b   : > { %4456 = vmatmul.mubr.msk.bf16.gmra.mxu1 %vm959_vm2, %v1830_v21 }
 0x36d   : > { %v4421_v29 = vpop.f32.mrf.mxu0 }
 0x36e   : > { %v1709_v1 = vadd.f32 %v4421_v29, %v5453_v20 }
 0x36f   : > { %v1700_v2 = vpop.f32.mrf.mxu0 }
 0x370   : > { %v1701_v8 = vadd.f32 %v5453_v20, %v1700_v2  ;;  %v1805_v34 = vmax.f32 %v1709_v1, 0.0 }
 0x371   : > { %v4422_v49 = vpop.f32.mrf.mxu0 }
 0x372   : > { %v1712_v63 = vadd.f32 %v4422_v49, %v5453_v20  ;;  %v1803_v5 = vmax.f32 %v1701_v8, 0.0 }
 0x373   : > { %v1703_v54 = vpop.f32.mrf.mxu0 }
 0x374   : > { %v1704_v31 = vadd.f32 %v5453_v20, %v1703_v54  ;;  %v1806_v47 = vmax.f32 %v1712_v63, 0.0 }
 0x376   : > { %v1804_v52 = vmax.f32 %v1704_v31, 0.0  ;;  %v1832_v35 = vpack.c.bf16 %v1806_v47, %v1805_v34 }
 0x378   : > { %v1831_v12 = vpack.c.bf16 %v1804_v52, %v1803_v5 }
 0x37a   : > { %4459 = vmatprep.mubr.msk.bf16.mxu1 %vm959_vm2, %v1831_v12 }
 0x37b   : > { %4460 = vmatmul.mubr.msk.bf16.gmra.mxu1 %vm959_vm2, %v1832_v35 }
 0x37d   : > { %v4425_v18 = vpop.f32.mrf.mxu0 }
 0x37e   : > { %v1725_v49 = vadd.f32 %v4425_v18, %v5453_v20 }
 0x37f   : > { %v1716_v60 = vpop.f32.mrf.mxu0 }
 0x380   : > { %v1717_v2 = vadd.f32 %v5453_v20, %v1716_v60  ;;  %v1809_v47 = vmax.f32 %v1725_v49, 0.0 }
 0x381   : > { %v4426_v21 = vpop.f32.mrf.mxu0 }
 0x382   : > { %v1728_v29 = vadd.f32 %v4426_v21, %v5453_v20  ;;  %v1807_v1 = vmax.f32 %v1717_v2, 0.0 }
 0x383   : > { %v1719_v54 = vpop.f32.mrf.mxu0 }
 0x384   : > { %v1720_v8 = vadd.f32 %v5453_v20, %v1719_v54  ;;  %v1810_v63 = vmax.f32 %v1728_v29, 0.0 }
 0x386   : > { %v1808_v31 = vmax.f32 %v1720_v8, 0.0  ;;  %v1834_v52 = vpack.c.bf16 %v1810_v63, %v1809_v47 }
 0x388   : > { %v1833_v5 = vpack.c.bf16 %v1808_v31, %v1807_v1 }
 0x38a   : > { %4463 = vmatprep.mubr.msk.bf16.mxu1 %vm959_vm2, %v1833_v5  ;;  %v4697_v5 = vld [vmem:[%s6181_s4 + $0x58] sm:$0xff]  }
 0x38b   : > { %4464 = vmatmul.mubr.msk.bf16.gmra.mxu1 %vm959_vm2, %v1834_v52  ;;  %4483 = vmatprep.subr.bf16.mxu0 %v4697_v5 }
 0x38c   : > { %4484 = vmatpush3.bf16.msra.mxu0 %v4697_v5 }
 0x38d   : > { %v4429_v34 = vpop.f32.mrf.mxu0 }
 0x38e   : > { %v1741_v21 = vadd.f32 %v4429_v34, %v5453_v20 }
 0x38f   : > { %v1732_v12 = vpop.f32.mrf.mxu0 }
 0x390   : > { %v1733_v60 = vadd.f32 %v5453_v20, %v1732_v12  ;;  %v1813_v63 = vmax.f32 %v1741_v21, 0.0  ;;  %v4698_v12 = vld [vmem:[%s6181_s4 + $0x50] sm:$0xff]  }
 0x391   : > { %v4430_v35 = vpop.f32.mrf.mxu0  ;;  %4485 = vmatprep.subr.bf16.mxu0 %v4698_v12 }
 0x392   : > { %v1744_v18 = vadd.f32 %v4430_v35, %v5453_v20  ;;  %v1811_v49 = vmax.f32 %v1733_v60, 0.0  ;;  %4486 = vmatpush3.bf16.msra.mxu0 %v4698_v12 }
 0x393   : > { %v1735_v54 = vpop.f32.mrf.mxu0 }
 0x394   : > { %v1736_v2 = vadd.f32 %v5453_v20, %v1735_v54  ;;  %v1814_v29 = vmax.f32 %v1744_v18, 0.0 }
 0x396   : > { %v1812_v8 = vmax.f32 %v1736_v2, 0.0  ;;  %v1836_v31 = vpack.c.bf16 %v1814_v29, %v1813_v63  ;;  %v4699_v29 = vld [vmem:[%s6181_s4 + $0x48] sm:$0xff]  }
 0x397   : > { %4487 = vmatprep.subr.bf16.mxu0 %v4699_v29 }
 0x398   : > { %v1835_v1 = vpack.c.bf16 %v1812_v8, %v1811_v49  ;;  %4488 = vmatpush3.bf16.msra.mxu0 %v4699_v29 }
 0x39a   : > { %4467 = vmatprep.mubr.msk.bf16.mxu1 %vm959_vm2, %v1835_v1 }
 0x39b   : > { %4468 = vmatmul.mubr.msk.bf16.gmra.mxu1 %vm959_vm2, %v1836_v31 }
 0x39d   : > { %v4433_v47 = vpop.f32.mrf.mxu0 }
 0x39e   : > { %v1757_v18 = vadd.f32 %v4433_v47, %v5453_v20  ;;  %v4700_v47 = vld [vmem:[%s6181_s4 + $0x40] sm:$0xff]  }
 0x39f   : > { %v1748_v52 = vpop.f32.mrf.mxu0  ;;  %4489 = vmatprep.subr.bf16.mxu0 %v4700_v47 }
 0x3a0   : > { %v1749_v35 = vadd.f32 %v5453_v20, %v1748_v52  ;;  %v1817_v63 = vmax.f32 %v1757_v18, 0.0  ;;  %4490 = vmatpush3.bf16.msra.mxu0 %v4700_v47 }
 0x3a1   : > { %v4434_v34 = vpop.f32.mrf.mxu0 }
 0x3a2   : > { %v1760_v60 = vadd.f32 %v4434_v34, %v5453_v20  ;;  %v1815_v49 = vmax.f32 %v1749_v35, 0.0 }
 0x3a3   : > { %v1751_v21 = vpop.f32.mrf.mxu0 }
 0x3a4   : > { %v1752_v54 = vadd.f32 %v5453_v20, %v1751_v21  ;;  %v1818_v2 = vmax.f32 %v1760_v60, 0.0 }
 0x3a6   : > { %v1816_v8 = vmax.f32 %v1752_v54, 0.0  ;;  %v1838_v31 = vpack.c.bf16 %v1818_v2, %v1817_v63 }
 0x3a8   : > { %v1837_v1 = vpack.c.bf16 %v1816_v8, %v1815_v49 }
 0x3aa   : > { %4471 = vmatprep.mubr.msk.bf16.mxu1 %vm959_vm2, %v1837_v1 }
 0x3ab   : > { %4472 = vmatmul.mubr.msk.bf16.gmra.mxu1 %vm959_vm2, %v1838_v31 }
 0x3ad   : > { %v4437_v5 = vpop.f32.mrf.mxu0 }
 0x3ae   : > { %v1773_v60 = vadd.f32 %v4437_v5, %v5453_v20 }
 0x3af   : > { %v1764_v52 = vpop.f32.mrf.mxu0 }
 0x3b0   : > { %v1765_v12 = vadd.f32 %v5453_v20, %v1764_v52  ;;  %v1821_v49 = vmax.f32 %v1773_v60, 0.0 }
 0x3b1   : > { %v4438_v34 = vpop.f32.mrf.mxu0 }
 0x3b2   : > { %v1776_v35 = vadd.f32 %v4438_v34, %v5453_v20  ;;  %v1819_v2 = vmax.f32 %v1765_v12, 0.0 }
 0x3b3   : > { %v1767_v18 = vpop.f32.mrf.mxu0 }
 0x3b4   : > { %v1768_v21 = vadd.f32 %v5453_v20, %v1767_v18  ;;  %v1822_v54 = vmax.f32 %v1776_v35, 0.0 }
 0x3b6   : > { %v1820_v29 = vmax.f32 %v1768_v21, 0.0  ;;  %v1840_v63 = vpack.c.bf16 %v1822_v54, %v1821_v49  ;;  %v5518_v49 = vld [vmem:[%s6184_s7 + $0x1] ss:$0 sm:$0xff] }
 0x3b8   : > { %v1839_v8 = vpack.c.bf16 %v1820_v29, %v1819_v2 }
 0x3ba   : > { %4475 = vmatprep.mubr.msk.bf16.mxu1 %vm959_vm2, %v1839_v8 }
 0x3bb   : > { %4476 = vmatmul.mubr.msk.bf16.gmra.mxu1 %vm959_vm2, %v1840_v63 }
 0x3bd   : > { %v4441_v1 = vpop.f32.mrf.mxu0 }
 0x3be   : > { %v1789_v34 = vadd.f32 %v4441_v1, %v5453_v20 }
 0x3bf   : > { %v1780_v31 = vpop.f32.mrf.mxu0 }
 0x3c0   : > { %v1781_v52 = vadd.f32 %v5453_v20, %v1780_v31  ;;  %v1825_v54 = vmax.f32 %v1789_v34, 0.0 }
 0x3c1   : > { %v4442_v47 = vpop.f32.mrf.mxu0 }
 0x3c2   : > { %v1792_v5 = vadd.f32 %v4442_v47, %v5453_v20  ;;  %v1823_v60 = vmax.f32 %v1781_v52, 0.0  ;;  %v4713_v47 = vld [vmem:[%s4829_s20] sm:$0x7]  ;;  %s4162_s20 = sshll.u32 %s6237_s22, 8 }
 0x3c3   : > { %v1783_v18 = vpop.f32.mrf.mxu0  ;;  %s6078_s18 = scalar_lea.vmem %s6189_s12, %s4162_s20 }
 0x3c4   : > { %v1784_v12 = vadd.f32 %v5453_v20, %v1783_v18  ;;  %v1826_v35 = vmax.f32 %v1792_v5, 0.0  ;;  %v6191_v20 = vsub.s32 1, %v4808_v6  ;;  %v2198_v5 = vpop.permute.xlu1 %2197 }
 0x3c6   : > { %v1824_v21 = vmax.f32 %v1784_v12, 0.0  ;;  %v1842_v29 = vpack.c.bf16 %v1826_v35, %v1825_v54  ;;  %v5526_v52 = vrot.slane %v4713_v47, %v6191_v20  ;;  %v4701_v12 = vld [vmem:[%s6183_s6 + $0x58] sm:$0xff]  }
 0x3c7   : > { %4523 = vmatprep.subr.bf16.mxu1 %v4701_v12 }
 0x3c8   : > { %v1841_v2 = vpack.c.bf16 %v1824_v21, %v1823_v60  ;;  %v2194_v21 = vpop.permute.xlu0 %2193  ;;  %4524 = vmatpush3.bf16.msra.mxu1 %v4701_v12  ;;  %v2200_v47 = vpop.permute.xlu1 %2199 }
 0x3ca   : > { %4479 = vmatprep.mubr.msk.bf16.mxu1 %vm959_vm2, %v1841_v2 }
 0x3cb   : > { %4480 = vmatmul.mubr.msk.bf16.gmra.mxu1 %vm959_vm2, %v1842_v29 }
 0x3cc   : > { %v2196_v20 = vpop.permute.xlu0 %2195 }
 0x3d0   : > { %v2202_v27 = vpop.permute.xlu0 %2201 }
 0x41b   : > { %v4453_v8 = vpop.f32.mrf.mxu1 }
 0x41c   : > { %v1975_v63 = vadd.f32 %v4453_v8, %v5518_v49 }
 0x41d   : > { %v1966_v1 = vpop.f32.mrf.mxu1 }
 0x41e   : > { %v1967_v31 = vadd.f32 %v5518_v49, %v1966_v1  ;;  %v2095_v34 = vadd.f32 %v1975_v63, %v5274_v32 }
 0x41f   : > { %v4454_v18 = vpop.f32.mrf.mxu1 }
 0x420   : > { %v2093_v35 = vadd.f32 %v1967_v31, %v5267_v39  ;;  %v1978_v60 = vadd.f32 %v4454_v18, %v5518_v49  ;;  %v2131_v32 = vadd.f32 %v5526_v52, %v2095_v34 }
 0x421   : > { %v1969_v54 = vpop.f32.mrf.mxu1 }
 0x422   : > { %v2129_v2 = vadd.f32 %v5526_v52, %v2093_v35  ;;  %v2096_v29 = vadd.f32 %v1978_v60, %v5270_v58  ;;  %v1970_v8 = vadd.f32 %v5518_v49, %v1969_v54  ;;  %v5545_v35 = vadd.f32 %v2198_v5, %v2131_v32 }
 0x424   : > { %v2132_v63 = vadd.f32 %v5526_v52, %v2096_v29  ;;  %v2094_v1 = vadd.f32 %v1970_v8, %v5277_v62  ;;  %v5540_v39 = vadd.f32 %v2194_v21, %v2129_v2  ;;  %v2323_v62 = vmax.f32 %v5545_v35, 0.0 }
 0x426   : > { %v5542_v31 = vadd.f32 %v2200_v47, %v2132_v63  ;;  %v2130_v18 = vadd.f32 %v5526_v52, %v2094_v1  ;;  %v2321_v34 = vmax.f32 %v5540_v39, 0.0  ;;  %v2204_v47 = vpop.permute.xlu1 %2203 }
 0x428   : > { %v5547_v58 = vadd.f32 %v2196_v20, %v2130_v18  ;;  %v2324_v12 = vmax.f32 %v5542_v31, 0.0 }
 0x42a   : > { %v2322_v60 = vmax.f32 %v5547_v58, 0.0  ;;  %v2354_v29 = vpack.c.bf16 %v2324_v12, %v2323_v62 }
 0x42b   : > { %v4457_v54 = vpop.f32.mrf.mxu1 }
 0x42c   : > { %v1991_v21 = vadd.f32 %v4457_v54, %v5518_v49  ;;  %v2353_v2 = vpack.c.bf16 %v2322_v60, %v2321_v34 }
 0x42d   : > { %v1982_v8 = vpop.f32.mrf.mxu1 }
 0x42e   : > { %v1983_v63 = vadd.f32 %v5518_v49, %v1982_v8  ;;  %4491 = vmatprep.mubr.msk.bf16.mxu0 %vm959_vm2, %v2353_v2  ;;  %v2099_v20 = vadd.f32 %v1991_v21, %v5296_v46  ;;  %v2208_v21 = vpop.permute.xlu1 %2207  ;;  %v2206_v2 = vpop.permute.xlu0 %2205 }
 0x42f   : > { %v4458_v5 = vpop.f32.mrf.mxu1  ;;  %4492 = vmatmul.mubr.msk.bf16.vlgmr.msra.gmra.mxu0 %vm959_vm2, %v2354_v29 }
 0x430   : > { %v2097_v32 = vadd.f32 %v1983_v63, %v5289_v38  ;;  %v1994_v1 = vadd.f32 %v4458_v5, %v5518_v49  ;;  %v2135_v62 = vadd.f32 %v5526_v52, %v2099_v20 }
 0x431   : > { %v1985_v18 = vpop.f32.mrf.mxu1 }
 0x432   : > { %v2133_v34 = vadd.f32 %v5526_v52, %v2097_v32  ;;  %v2100_v12 = vadd.f32 %v1994_v1, %v5292_v19  ;;  %v1986_v60 = vadd.f32 %v5518_v49, %v1985_v18  ;;  %v5571_v63 = vadd.f32 %v2206_v2, %v2135_v62 }
 0x434   : > { %v2136_v46 = vadd.f32 %v5526_v52, %v2100_v12  ;;  %v2098_v54 = vadd.f32 %v1986_v60, %v5299_v48  ;;  %v5566_v38 = vadd.f32 %v2202_v27, %v2133_v34  ;;  %v2327_v48 = vmax.f32 %v5571_v63, 0.0 }
 0x436   : > { %v5568_v29 = vadd.f32 %v2208_v21, %v2136_v46  ;;  %v2134_v8 = vadd.f32 %v5526_v52, %v2098_v54  ;;  %v2325_v20 = vmax.f32 %v5566_v38, 0.0  ;;  %v2212_v21 = vpop.permute.xlu1 %2211 }
 0x438   : > { %v5573_v5 = vadd.f32 %v2204_v47, %v2134_v8  ;;  %v2328_v19 = vmax.f32 %v5568_v29, 0.0  ;;  %v2210_v8 = vpop.permute.xlu0 %2209 }
 0x43a   : > { %v2326_v32 = vmax.f32 %v5573_v5, 0.0  ;;  %v2356_v12 = vpack.c.bf16 %v2328_v19, %v2327_v48 }
 0x43b   : > { %v4461_v1 = vpop.f32.mrf.mxu1 }
 0x43c   : > { %v2007_v27 = vadd.f32 %v4461_v1, %v5518_v49  ;;  %v2355_v18 = vpack.c.bf16 %v2326_v32, %v2325_v20 }
 0x43d   : > { %v1998_v34 = vpop.f32.mrf.mxu1 }
 0x43e   : > { %v1999_v60 = vadd.f32 %v5518_v49, %v1998_v34  ;;  %4495 = vmatprep.mubr.msk.bf16.mxu0 %vm959_vm2, %v2355_v18  ;;  %v2103_v47 = vadd.f32 %v2007_v27, %v5318_v36  ;;  %v2216_v27 = vpop.permute.xlu1 %2215  ;;  %v2214_v18 = vpop.permute.xlu0 %2213 }
 0x43f   : > { %v4462_v62 = vpop.f32.mrf.mxu1  ;;  %4496 = vmatmul.mubr.msk.bf16.gmra.mxu0 %vm959_vm2, %v2356_v12 }
 0x440   : > { %v2101_v46 = vadd.f32 %v1999_v60, %v5311_v9  ;;  %v2010_v54 = vadd.f32 %v4462_v62, %v5518_v49  ;;  %v2139_v48 = vadd.f32 %v5526_v52, %v2103_v47 }
 0x441   : > { %v2001_v2 = vpop.f32.mrf.mxu1 }
 0x442   : > { %v2137_v20 = vadd.f32 %v5526_v52, %v2101_v46  ;;  %v2104_v19 = vadd.f32 %v2010_v54, %v5314_v51  ;;  %v2002_v32 = vadd.f32 %v5518_v49, %v2001_v2  ;;  %v5597_v60 = vadd.f32 %v2214_v18, %v2139_v48 }
 0x444   : > { %v2140_v36 = vadd.f32 %v5526_v52, %v2104_v19  ;;  %v2102_v1 = vadd.f32 %v2002_v32, %v5321_v24  ;;  %v5592_v9 = vadd.f32 %v2210_v8, %v2137_v20  ;;  %v2331_v24 = vmax.f32 %v5597_v60, 0.0 }
 0x446   : > { %v5594_v34 = vadd.f32 %v2216_v27, %v2140_v36  ;;  %v2138_v12 = vadd.f32 %v5526_v52, %v2102_v1  ;;  %v2329_v47 = vmax.f32 %v5592_v9, 0.0  ;;  %v2220_v27 = vpop.permute.xlu1 %2219 }
 0x448   : > { %v5599_v62 = vadd.f32 %v2212_v21, %v2138_v12  ;;  %v2332_v51 = vmax.f32 %v5594_v34, 0.0  ;;  %v2218_v12 = vpop.permute.xlu0 %2217 }
 0x44a   : > { %v2330_v46 = vmax.f32 %v5599_v62, 0.0  ;;  %v2358_v19 = vpack.c.bf16 %v2332_v51, %v2331_v24 }
 0x44b   : > { %v4465_v54 = vpop.f32.mrf.mxu1 }
 0x44c   : > { %v2023_v2 = vadd.f32 %v4465_v54, %v5518_v49  ;;  %v2357_v8 = vpack.c.bf16 %v2330_v46, %v2329_v47 }
 0x44d   : > { %v2014_v20 = vpop.f32.mrf.mxu1 }
 0x44e   : > { %v2015_v32 = vadd.f32 %v5518_v49, %v2014_v20  ;;  %4499 = vmatprep.mubr.msk.bf16.mxu0 %vm959_vm2, %v2357_v8  ;;  %v2107_v21 = vadd.f32 %v2023_v2, %v5340_v15  ;;  %v2224_v2 = vpop.permute.xlu1 %2223  ;;  %v2222_v8 = vpop.permute.xlu0 %2221 }
 0x44f   : > { %v4466_v48 = vpop.f32.mrf.mxu1  ;;  %4500 = vmatmul.mubr.msk.bf16.gmra.mxu0 %vm959_vm2, %v2358_v19 }
 0x450   : > { %v2105_v36 = vadd.f32 %v2015_v32, %v5333_v53  ;;  %v2026_v1 = vadd.f32 %v4466_v48, %v5518_v49  ;;  %v2143_v24 = vadd.f32 %v5526_v52, %v2107_v21 }
 0x451   : > { %v2017_v18 = vpop.f32.mrf.mxu1 }
 0x452   : > { %v2141_v47 = vadd.f32 %v5526_v52, %v2105_v36  ;;  %v2108_v51 = vadd.f32 %v2026_v1, %v5336_v7  ;;  %v2018_v46 = vadd.f32 %v5518_v49, %v2017_v18  ;;  %v5623_v32 = vadd.f32 %v2222_v8, %v2143_v24 }
 0x454   : > { %v2144_v15 = vadd.f32 %v5526_v52, %v2108_v51  ;;  %v2106_v54 = vadd.f32 %v2018_v46, %v5343_v59  ;;  %v5618_v53 = vadd.f32 %v2218_v12, %v2141_v47  ;;  %v2335_v59 = vmax.f32 %v5623_v32, 0.0 }
 0x456   : > { %v5620_v20 = vadd.f32 %v2224_v2, %v2144_v15  ;;  %v2142_v19 = vadd.f32 %v5526_v52, %v2106_v54  ;;  %v2333_v21 = vmax.f32 %v5618_v53, 0.0  ;;  %v2228_v2 = vpop.permute.xlu1 %2227 }
 0x458   : > { %v5625_v48 = vadd.f32 %v2220_v27, %v2142_v19  ;;  %v2336_v7 = vmax.f32 %v5620_v20, 0.0  ;;  %v2226_v19 = vpop.permute.xlu0 %2225 }
 0x45a   : > { %v2334_v36 = vmax.f32 %v5625_v48, 0.0  ;;  %v2360_v51 = vpack.c.bf16 %v2336_v7, %v2335_v59 }
 0x45b   : > { %v4469_v1 = vpop.f32.mrf.mxu1 }
 0x45c   : > { %v2039_v18 = vadd.f32 %v4469_v1, %v5518_v49  ;;  %v2359_v12 = vpack.c.bf16 %v2334_v36, %v2333_v21 }
 0x45d   : > { %v2030_v47 = vpop.f32.mrf.mxu1 }
 0x45e   : > { %v2031_v46 = vadd.f32 %v5518_v49, %v2030_v47  ;;  %4503 = vmatprep.mubr.msk.bf16.mxu0 %vm959_vm2, %v2359_v12  ;;  %v2111_v27 = vadd.f32 %v2039_v18, %v5362_v45  ;;  %v2232_v18 = vpop.permute.xlu1 %2231  ;;  %v2230_v12 = vpop.permute.xlu0 %2229 }
 0x45f   : > { %v4470_v24 = vpop.f32.mrf.mxu1  ;;  %4504 = vmatmul.mubr.msk.bf16.gmra.mxu0 %vm959_vm2, %v2360_v51 }
 0x460   : > { %v2109_v15 = vadd.f32 %v2031_v46, %v5355_v14  ;;  %v2042_v54 = vadd.f32 %v4470_v24, %v5518_v49  ;;  %v2147_v59 = vadd.f32 %v5526_v52, %v2111_v27 }
 0x461   : > { %v2033_v8 = vpop.f32.mrf.mxu1 }
 0x462   : > { %v2145_v21 = vadd.f32 %v5526_v52, %v2109_v15  ;;  %v2112_v7 = vadd.f32 %v2042_v54, %v5358_v56  ;;  %v2034_v36 = vadd.f32 %v5518_v49, %v2033_v8  ;;  %v5649_v46 = vadd.f32 %v2230_v12, %v2147_v59  ;;  %v2236_v12 = vpop.permute.xlu1 %2235 }
 0x464   : > { %v2148_v45 = vadd.f32 %v5526_v52, %v2112_v7  ;;  %v2110_v1 = vadd.f32 %v2034_v36, %v5365_v42  ;;  %v5644_v14 = vadd.f32 %v2226_v19, %v2145_v21  ;;  %v2339_v42 = vmax.f32 %v5649_v46, 0.0 }
 0x466   : > { %v5646_v47 = vadd.f32 %v2232_v18, %v2148_v45  ;;  %v2146_v51 = vadd.f32 %v5526_v52, %v2110_v1  ;;  %v2337_v27 = vmax.f32 %v5644_v14, 0.0  ;;  %v4702_v45 = vld [vmem:[%s6183_s6 + $0x50] sm:$0xff]  }
 0x467   : > { %4525 = vmatprep.subr.bf16.mxu1 %v4702_v45 }
 0x468   : > { %v5651_v24 = vadd.f32 %v2228_v2, %v2146_v51  ;;  %v2340_v56 = vmax.f32 %v5646_v47, 0.0  ;;  %4526 = vmatpush3.bf16.msra.mxu1 %v4702_v45 }
 0x46a   : > { %v2338_v15 = vmax.f32 %v5651_v24, 0.0  ;;  %v2362_v21 = vpack.c.bf16 %v2340_v56, %v2339_v42  ;;  %v2234_v56 = vpop.permute.xlu0 %2233 }
 0x46b   : > { %v4473_v54 = vpop.f32.mrf.mxu1 }
 0x46c   : > { %v2055_v8 = vadd.f32 %v4473_v54, %v5518_v49  ;;  %v2361_v19 = vpack.c.bf16 %v2338_v15, %v2337_v27  ;;  %v4703_v54 = vld [vmem:[%s6183_s6 + $0x48] sm:$0xff]  }
 0x46d   : > { %v2046_v7 = vpop.f32.mrf.mxu1  ;;  %4527 = vmatprep.subr.bf16.mxu1 %v4703_v54 }
 0x46e   : > { %v2047_v36 = vadd.f32 %v5518_v49, %v2046_v7  ;;  %4507 = vmatprep.mubr.msk.bf16.mxu0 %vm959_vm2, %v2361_v19  ;;  %v2115_v2 = vadd.f32 %v2055_v8, %v5390_v25  ;;  %v2240_v19 = vpop.permute.xlu1 %2239  ;;  %4528 = vmatpush3.bf16.msra.mxu1 %v4703_v54 }
 0x46f   : > { %v4474_v59 = vpop.f32.mrf.mxu1  ;;  %4508 = vmatmul.mubr.msk.bf16.gmra.mxu0 %vm959_vm2, %v2362_v21  ;;  %v2238_v21 = vpop.permute.xlu0 %2237 }
 0x470   : > { %v2113_v1 = vadd.f32 %v2047_v36, %v5383_v28  ;;  %v2058_v18 = vadd.f32 %v4474_v59, %v5518_v49  ;;  %v2151_v42 = vadd.f32 %v5526_v52, %v2115_v2  ;;  %v4704_v2 = vld [vmem:[%s6183_s6 + $0x40] sm:$0xff]  }
 0x471   : > { %v2049_v51 = vpop.f32.mrf.mxu1  ;;  %4529 = vmatprep.subr.bf16.mxu1 %v4704_v2 }
 0x472   : > { %v2149_v27 = vadd.f32 %v5526_v52, %v2113_v1  ;;  %v2116_v15 = vadd.f32 %v2058_v18, %v5386_v4  ;;  %v2050_v25 = vadd.f32 %v5518_v49, %v2049_v51  ;;  %v5681_v59 = vadd.f32 %v2238_v21, %v2151_v42  ;;  %4530 = vmatpush3.bf16.msra.mxu1 %v4704_v2  ;;  %v2244_v21 = vpop.permute.xlu1 %2243 }
 0x473   : > { %v2242_v2 = vpop.permute.xlu0 %2241 }
 0x474   : > { %v2152_v28 = vadd.f32 %v5526_v52, %v2116_v15  ;;  %v2114_v8 = vadd.f32 %v2050_v25, %v5396_v30  ;;  %v5676_v7 = vadd.f32 %v2234_v56, %v2149_v27  ;;  %v2343_v51 = vmax.f32 %v5681_v59, 0.0 }
 0x476   : > { %v5678_v36 = vadd.f32 %v2240_v19, %v2152_v28  ;;  %v2150_v4 = vadd.f32 %v5526_v52, %v2114_v8  ;;  %v2341_v1 = vmax.f32 %v5676_v7, 0.0 }
 0x478   : > { %v5686_v45 = vadd.f32 %v2236_v12, %v2150_v4  ;;  %v2344_v30 = vmax.f32 %v5678_v36, 0.0 }
 0x47a   : > { %v2342_v18 = vmax.f32 %v5686_v45, 0.0  ;;  %v2364_v25 = vpack.c.bf16 %v2344_v30, %v2343_v51 }
 0x47b   : > { %v4477_v56 = vpop.f32.mrf.mxu1 }
 0x47c   : > { %v2071_v27 = vadd.f32 %v4477_v56, %v5518_v49  ;;  %v2363_v15 = vpack.c.bf16 %v2342_v18, %v2341_v1 }
 0x47d   : > { %v2062_v42 = vpop.f32.mrf.mxu1 }
 0x47e   : > { %v2063_v54 = vadd.f32 %v5518_v49, %v2062_v42  ;;  %4511 = vmatprep.mubr.msk.bf16.mxu0 %vm959_vm2, %v2363_v15  ;;  %v2119_v12 = vadd.f32 %v2071_v27, %v5415_v57  ;;  %v2248_v27 = vpop.permute.xlu1 %2247  ;;  %v2246_v15 = vpop.permute.xlu0 %2245 }
 0x47f   : > { %v4478_v28 = vpop.f32.mrf.mxu1  ;;  %4512 = vmatmul.mubr.msk.bf16.gmra.mxu0 %vm959_vm2, %v2364_v25 }
 0x480   : > { %v2117_v8 = vadd.f32 %v2063_v54, %v5408_v37  ;;  %v2074_v19 = vadd.f32 %v4478_v28, %v5518_v49  ;;  %v2155_v51 = vadd.f32 %v5526_v52, %v2119_v12 }
 0x481   : > { %v2065_v4 = vpop.f32.mrf.mxu1 }
 0x482   : > { %v2153_v1 = vadd.f32 %v5526_v52, %v2117_v8  ;;  %v2120_v30 = vadd.f32 %v2074_v19, %v5411_v17  ;;  %v2066_v18 = vadd.f32 %v5518_v49, %v2065_v4  ;;  %v5710_v54 = vadd.f32 %v2246_v15, %v2155_v51 }
 0x484   : > { %v2156_v57 = vadd.f32 %v5526_v52, %v2120_v30  ;;  %v2118_v56 = vadd.f32 %v2066_v18, %v5418_v26  ;;  %v5705_v37 = vadd.f32 %v2242_v2, %v2153_v1  ;;  %v2347_v26 = vmax.f32 %v5710_v54, 0.0 }
 0x486   : > { %v5707_v25 = vadd.f32 %v2248_v27, %v2156_v57  ;;  %v2154_v42 = vadd.f32 %v5526_v52, %v2118_v56  ;;  %v2345_v12 = vmax.f32 %v5705_v37, 0.0  ;;  %v2252_v27 = vpop.permute.xlu1 %2251 }
 0x488   : > { %v5712_v28 = vadd.f32 %v2244_v21, %v2154_v42  ;;  %v2348_v17 = vmax.f32 %v5707_v25, 0.0  ;;  %v2250_v42 = vpop.permute.xlu0 %2249 }
 0x48a   : > { %v2346_v8 = vmax.f32 %v5712_v28, 0.0  ;;  %v2366_v1 = vpack.c.bf16 %v2348_v17, %v2347_v26 }
 0x48b   : > { %v4481_v19 = vpop.f32.mrf.mxu1 }
 0x48c   : > { %v2087_v4 = vadd.f32 %v4481_v19, %v5518_v49  ;;  %v2365_v2 = vpack.c.bf16 %v2346_v8, %v2345_v12 }
 0x48d   : > { %v2078_v30 = vpop.f32.mrf.mxu1 }
 0x48e   : > { %v2079_v18 = vadd.f32 %v5518_v49, %v2078_v30  ;;  %4515 = vmatprep.mubr.msk.bf16.mxu0 %vm959_vm2, %v2365_v2  ;;  %v2123_v21 = vadd.f32 %v2087_v4, %v5437_v0  ;;  %v2256_v4 = vpop.permute.xlu1 %2255  ;;  %v2254_v2 = vpop.permute.xlu0 %2253 }
 0x48f   : > { %v4482_v51 = vpop.f32.mrf.mxu1  ;;  %4516 = vmatmul.mubr.msk.bf16.gmra.mxu0 %vm959_vm2, %v2366_v1 }
 0x490   : > { %v2121_v57 = vadd.f32 %v2079_v18, %v5430_v11  ;;  %v2090_v56 = vadd.f32 %v4482_v51, %v5518_v49  ;;  %v2159_v26 = vadd.f32 %v5526_v52, %v2123_v21 }
 0x491   : > { %v2081_v15 = vpop.f32.mrf.mxu1 }
 0x492   : > { %v2157_v12 = vadd.f32 %v5526_v52, %v2121_v57  ;;  %v2124_v17 = vadd.f32 %v2090_v56, %v5433_v43  ;;  %v2082_v8 = vadd.f32 %v5518_v49, %v2081_v15  ;;  %v5736_v18 = vadd.f32 %v2254_v2, %v2159_v26 }
 0x494   : > { %v2160_v0 = vadd.f32 %v5526_v52, %v2124_v17  ;;  %v2122_v19 = vadd.f32 %v2082_v8, %v5440_v23  ;;  %v5731_v11 = vadd.f32 %v2250_v42, %v2157_v12  ;;  %v2351_v23 = vmax.f32 %v5736_v18, 0.0  ;;  %v5752_v42 = vld [vmem:[%s6182_s5 + $0x2] ss:$0 sm:$0xff] }
 0x496   : > { %v5733_v1 = vadd.f32 %v2256_v4, %v2160_v0  ;;  %v2158_v30 = vadd.f32 %v5526_v52, %v2122_v19  ;;  %v2349_v49 = vmax.f32 %v5731_v11, 0.0  ;;  %v4705_v52 = vld [vmem:[%s6185_s8 + $0x18] sm:$0xff]  }
 0x497   : > { %4563 = vmatprep.subr.bf16.mxu0 %v4705_v52 }
 0x498   : > { %v5738_v51 = vadd.f32 %v2252_v27, %v2158_v30  ;;  %v2352_v43 = vmax.f32 %v5733_v1, 0.0  ;;  %4564 = vmatpush3.bf16.msra.mxu0 %v4705_v52 }
 0x49a   : > { %v2350_v21 = vmax.f32 %v5738_v51, 0.0  ;;  %v2368_v56 = vpack.c.bf16 %v2352_v43, %v2351_v23 }
 0x49c   : > { %v2367_v57 = vpack.c.bf16 %v2350_v21, %v2349_v49 }
 0x49e   : > { %4519 = vmatprep.mubr.msk.bf16.mxu0 %vm959_vm2, %v2367_v57 }
 0x49f   : > { %4520 = vmatmul.mubr.msk.bf16.gmra.mxu0 %vm959_vm2, %v2368_v56 }
 0x4ef   : > { %v4493_v27 = vpop.f32.mrf.mxu0 }
 0x4f0   : > { %v2501_v26 = vadd.f32 %v4493_v27, %v5752_v42 }
 0x4f1   : > { %v2492_v15 = vpop.f32.mrf.mxu0 }
 0x4f2   : > { %v2493_v17 = vadd.f32 %v5752_v42, %v2492_v15  ;;  %v2621_v43 = vmax.f32 %v2501_v26, 0.0 }
 0x4f3   : > { %v4494_v12 = vpop.f32.mrf.mxu0 }
 0x4f4   : > { %v2504_v8 = vadd.f32 %v4494_v12, %v5752_v42  ;;  %v2619_v2 = vmax.f32 %v2493_v17, 0.0 }
 0x4f5   : > { %v2495_v0 = vpop.f32.mrf.mxu0 }
 0x4f6   : > { %v2496_v19 = vadd.f32 %v5752_v42, %v2495_v0  ;;  %v2622_v4 = vmax.f32 %v2504_v8, 0.0 }
 0x4f8   : > { %v2620_v30 = vmax.f32 %v2496_v19, 0.0  ;;  %v2652_v21 = vpack.c.bf16 %v2622_v4, %v2621_v43 }
 0x4fa   : > { %v2651_v49 = vpack.c.bf16 %v2620_v30, %v2619_v2 }
 0x4fc   : > { %4531 = vmatprep.mubr.msk.bf16.mxu1 %vm959_vm2, %v2651_v49 }
 0x4fd   : > { %4532 = vmatmul.mubr.msk.bf16.vlgmr.msra.gmra.mxu1 %vm959_vm2, %v2652_v21 }
 0x4ff   : > { %v4497_v23 = vpop.f32.mrf.mxu0 }
 0x500   : > { %v2517_v15 = vadd.f32 %v4497_v23, %v5752_v42 }
 0x501   : > { %v2508_v57 = vpop.f32.mrf.mxu0 }
 0x502   : > { %v2509_v52 = vadd.f32 %v5752_v42, %v2508_v57  ;;  %v2625_v19 = vmax.f32 %v2517_v15, 0.0 }
 0x503   : > { %v4498_v56 = vpop.f32.mrf.mxu0 }
 0x504   : > { %v2520_v27 = vadd.f32 %v4498_v56, %v5752_v42  ;;  %v2623_v26 = vmax.f32 %v2509_v52, 0.0 }
 0x505   : > { %v2511_v12 = vpop.f32.mrf.mxu0 }
 0x506   : > { %v2512_v17 = vadd.f32 %v5752_v42, %v2511_v12  ;;  %v2626_v8 = vmax.f32 %v2520_v27, 0.0 }
 0x508   : > { %v2624_v0 = vmax.f32 %v2512_v17, 0.0  ;;  %v2654_v2 = vpack.c.bf16 %v2626_v8, %v2625_v19 }
 0x50a   : > { %v2653_v4 = vpack.c.bf16 %v2624_v0, %v2623_v26 }
 0x50c   : > { %4535 = vmatprep.mubr.msk.bf16.mxu1 %vm959_vm2, %v2653_v4 }
 0x50d   : > { %4536 = vmatmul.mubr.msk.bf16.gmra.mxu1 %vm959_vm2, %v2654_v2 }
 0x50f   : > { %v4501_v30 = vpop.f32.mrf.mxu0 }
 0x510   : > { %v2533_v57 = vadd.f32 %v4501_v30, %v5752_v42 }
 0x511   : > { %v2524_v43 = vpop.f32.mrf.mxu0 }
 0x512   : > { %v2525_v21 = vadd.f32 %v5752_v42, %v2524_v43  ;;  %v2629_v17 = vmax.f32 %v2533_v57, 0.0 }
 0x513   : > { %v4502_v49 = vpop.f32.mrf.mxu0 }
 0x514   : > { %v2536_v23 = vadd.f32 %v4502_v49, %v5752_v42  ;;  %v2627_v15 = vmax.f32 %v2525_v21, 0.0 }
 0x515   : > { %v2527_v56 = vpop.f32.mrf.mxu0 }
 0x516   : > { %v2528_v52 = vadd.f32 %v5752_v42, %v2527_v56  ;;  %v2630_v27 = vmax.f32 %v2536_v23, 0.0 }
 0x518   : > { %v2628_v12 = vmax.f32 %v2528_v52, 0.0  ;;  %v2656_v26 = vpack.c.bf16 %v2630_v27, %v2629_v17 }
 0x51a   : > { %v2655_v8 = vpack.c.bf16 %v2628_v12, %v2627_v15 }
 0x51c   : > { %4539 = vmatprep.mubr.msk.bf16.mxu1 %vm959_vm2, %v2655_v8 }
 0x51d   : > { %4540 = vmatmul.mubr.msk.bf16.gmra.mxu1 %vm959_vm2, %v2656_v26 }
 0x51f   : > { %v4505_v0 = vpop.f32.mrf.mxu0 }
 0x520   : > { %v2549_v43 = vadd.f32 %v4505_v0, %v5752_v42 }
 0x521   : > { %v2540_v19 = vpop.f32.mrf.mxu0 }
 0x522   : > { %v2541_v2 = vadd.f32 %v5752_v42, %v2540_v19  ;;  %v2633_v52 = vmax.f32 %v2549_v43, 0.0 }
 0x523   : > { %v4506_v4 = vpop.f32.mrf.mxu0 }
 0x524   : > { %v2552_v30 = vadd.f32 %v4506_v4, %v5752_v42  ;;  %v2631_v57 = vmax.f32 %v2541_v2, 0.0 }
 0x525   : > { %v2543_v49 = vpop.f32.mrf.mxu0 }
 0x526   : > { %v2544_v21 = vadd.f32 %v5752_v42, %v2543_v49  ;;  %v2634_v23 = vmax.f32 %v2552_v30, 0.0 }
 0x528   : > { %v2632_v56 = vmax.f32 %v2544_v21, 0.0  ;;  %v2658_v15 = vpack.c.bf16 %v2634_v23, %v2633_v52 }
 0x52a   : > { %v2657_v27 = vpack.c.bf16 %v2632_v56, %v2631_v57  ;;  %v4706_v56 = vld [vmem:[%s6185_s8 + $0x10] sm:$0xff]  }
 0x52b   : > { %4565 = vmatprep.subr.bf16.mxu0 %v4706_v56 }
 0x52c   : > { %4543 = vmatprep.mubr.msk.bf16.mxu1 %vm959_vm2, %v2657_v27  ;;  %4566 = vmatpush3.bf16.msra.mxu0 %v4706_v56 }
 0x52d   : > { %4544 = vmatmul.mubr.msk.bf16.gmra.mxu1 %vm959_vm2, %v2658_v15  ;;  %v4707_v15 = vld [vmem:[%s6185_s8 + $0x8] sm:$0xff]  }
 0x52e   : > { %4567 = vmatprep.subr.bf16.mxu0 %v4707_v15 }
 0x52f   : > { %v4509_v12 = vpop.f32.mrf.mxu0 }
 0x530   : > { %v2565_v19 = vadd.f32 %v4509_v12, %v5752_v42  ;;  %4568 = vmatpush3.bf16.msra.mxu0 %v4707_v15 }
 0x531   : > { %v2556_v17 = vpop.f32.mrf.mxu0 }
 0x532   : > { %v2557_v26 = vadd.f32 %v5752_v42, %v2556_v17  ;;  %v2637_v21 = vmax.f32 %v2565_v19, 0.0  ;;  %v4708_v19 = vld [vmem:[%s6185_s8] sm:$0xff]  }
 0x533   : > { %v4510_v8 = vpop.f32.mrf.mxu0  ;;  %4569 = vmatprep.subr.bf16.mxu0 %v4708_v19 }
 0x534   : > { %v2568_v0 = vadd.f32 %v4510_v8, %v5752_v42  ;;  %v2635_v43 = vmax.f32 %v2557_v26, 0.0  ;;  %4570 = vmatpush3.bf16.msra.mxu0 %v4708_v19 }
 0x535   : > { %v2559_v4 = vpop.f32.mrf.mxu0 }
 0x536   : > { %v2560_v2 = vadd.f32 %v5752_v42, %v2559_v4  ;;  %v2638_v30 = vmax.f32 %v2568_v0, 0.0 }
 0x538   : > { %v2636_v49 = vmax.f32 %v2560_v2, 0.0  ;;  %v2660_v57 = vpack.c.bf16 %v2638_v30, %v2637_v21 }
 0x53a   : > { %v2659_v23 = vpack.c.bf16 %v2636_v49, %v2635_v43 }
 0x53c   : > { %4547 = vmatprep.mubr.msk.bf16.mxu1 %vm959_vm2, %v2659_v23 }
 0x53d   : > { %4548 = vmatmul.mubr.msk.bf16.gmra.mxu1 %vm959_vm2, %v2660_v57 }
 0x53f   : > { %v4513_v52 = vpop.f32.mrf.mxu0 }
 0x540   : > { %v2581_v26 = vadd.f32 %v4513_v52, %v5752_v42 }
 0x541   : > { %v2572_v27 = vpop.f32.mrf.mxu0 }
 0x542   : > { %v2573_v17 = vadd.f32 %v5752_v42, %v2572_v27  ;;  %v2641_v49 = vmax.f32 %v2581_v26, 0.0 }
 0x543   : > { %v4514_v12 = vpop.f32.mrf.mxu0 }
 0x544   : > { %v2584_v8 = vadd.f32 %v4514_v12, %v5752_v42  ;;  %v2639_v30 = vmax.f32 %v2573_v17, 0.0 }
 0x545   : > { %v2575_v0 = vpop.f32.mrf.mxu0 }
 0x546   : > { %v2576_v4 = vadd.f32 %v5752_v42, %v2575_v0  ;;  %v2642_v2 = vmax.f32 %v2584_v8, 0.0 }
 0x548   : > { %v2640_v43 = vmax.f32 %v2576_v4, 0.0  ;;  %v2662_v23 = vpack.c.bf16 %v2642_v2, %v2641_v49 }
 0x54a   : > { %v2661_v21 = vpack.c.bf16 %v2640_v43, %v2639_v30 }
 0x54c   : > { %4551 = vmatprep.mubr.msk.bf16.mxu1 %vm959_vm2, %v2661_v21 }
 0x54d   : > { %4552 = vmatmul.mubr.msk.bf16.gmra.mxu1 %vm959_vm2, %v2662_v23 }
 0x54f   : > { %v4517_v57 = vpop.f32.mrf.mxu0 }
 0x550   : > { %v2597_v12 = vadd.f32 %v4517_v57, %v5752_v42 }
 0x551   : > { %v2588_v56 = vpop.f32.mrf.mxu0 }
 0x552   : > { %v2589_v27 = vadd.f32 %v5752_v42, %v2588_v56  ;;  %v2645_v4 = vmax.f32 %v2597_v12, 0.0 }
 0x553   : > { %v4518_v52 = vpop.f32.mrf.mxu0 }
 0x554   : > { %v2600_v15 = vadd.f32 %v4518_v52, %v5752_v42  ;;  %v2643_v26 = vmax.f32 %v2589_v27, 0.0 }
 0x555   : > { %v2591_v8 = vpop.f32.mrf.mxu0 }
 0x556   : > { %v2592_v17 = vadd.f32 %v5752_v42, %v2591_v8  ;;  %v2646_v0 = vmax.f32 %v2600_v15, 0.0 }
 0x558   : > { %v2644_v19 = vmax.f32 %v2592_v17, 0.0  ;;  %v2664_v30 = vpack.c.bf16 %v2646_v0, %v2645_v4 }
 0x55a   : > { %v2663_v2 = vpack.c.bf16 %v2644_v19, %v2643_v26 }
 0x55c   : > { %4555 = vmatprep.mubr.msk.bf16.mxu1 %vm959_vm2, %v2663_v2  ;;  %v5814_v2 = vld [vmem:[%s6184_s7 + $0x2] ss:$0 sm:$0xff] }
 0x55d   : > { %4556 = vmatmul.mubr.msk.bf16.gmra.mxu1 %vm959_vm2, %v2664_v30 }
 0x55f   : > { %v4521_v43 = vpop.f32.mrf.mxu0 }
 0x560   : > { %v2613_v56 = vadd.f32 %v4521_v43, %v5752_v42 }
 0x561   : > { %v2604_v49 = vpop.f32.mrf.mxu0 }
 0x562   : > { %v2605_v23 = vadd.f32 %v5752_v42, %v2604_v49  ;;  %v2649_v17 = vmax.f32 %v2613_v56, 0.0 }
 0x563   : > { %v4522_v21 = vpop.f32.mrf.mxu0 }
 0x564   : > { %v2616_v57 = vadd.f32 %v4522_v21, %v5752_v42  ;;  %v2647_v12 = vmax.f32 %v2605_v23, 0.0 }
 0x565   : > { %v2607_v52 = vpop.f32.mrf.mxu0 }
 0x566   : > { %v2608_v27 = vadd.f32 %v5752_v42, %v2607_v52  ;;  %v2650_v15 = vmax.f32 %v2616_v57, 0.0 }
 0x568   : > { %v2648_v8 = vmax.f32 %v2608_v27, 0.0  ;;  %v2666_v26 = vpack.c.bf16 %v2650_v15, %v2649_v17 }
 0x56a   : > { %v2665_v0 = vpack.c.bf16 %v2648_v8, %v2647_v12 }
 0x56c   : > { %4559 = vmatprep.mubr.msk.bf16.mxu1 %vm959_vm2, %v2665_v0 }
 0x56d   : > { %4560 = vmatmul.mubr.msk.bf16.gmra.mxu1 %vm959_vm2, %v2666_v26 }
 0x5bd   : > { %v4533_v19 = vpop.f32.mrf.mxu1 }
 0x5be   : > { %v2799_v49 = vadd.f32 %v4533_v19, %v5814_v2 }
 0x5bf   : > { %v2790_v4 = vpop.f32.mrf.mxu1 }
 0x5c0   : > { %v2791_v42 = vadd.f32 %v5814_v2, %v2790_v4  ;;  %v2919_v27 = vadd.f32 %v2799_v49, %v5545_v35 }
 0x5c1   : > { %v4534_v30 = vpop.f32.mrf.mxu1 }
 0x5c2   : > { %v2802_v43 = vadd.f32 %v4534_v30, %v5814_v2  ;;  %v2917_v56 = vadd.f32 %v2791_v42, %v5540_v39 }
 0x5c3   : > { %v2793_v21 = vpop.f32.mrf.mxu1 }
 0x5c4   : > { %v2794_v23 = vadd.f32 %v5814_v2, %v2793_v21  ;;  %v2920_v57 = vadd.f32 %v2802_v43, %v5542_v31 }
 0x5c6   : > { %v2918_v52 = vadd.f32 %v2794_v23, %v5547_v58  ;;  %v2950_v12 = vpack.c.bf16 %v2920_v57, %v2919_v27 }
 0x5c8   : > { %v2949_v15 = vpack.c.bf16 %v2918_v52, %v2917_v56 }
 0x5ca   : > { %4571 = vmatprep.mubr.msk.bf16.mxu0 %vm959_vm2, %v2949_v15 }
 0x5cb   : > { %4572 = vmatmul.mubr.msk.bf16.vlgmr.msra.gmra.mxu0 %vm959_vm2, %v2950_v12 }
 0x5cd   : > { %v4537_v8 = vpop.f32.mrf.mxu1 }
 0x5ce   : > { %v2815_v31 = vadd.f32 %v4537_v8, %v5814_v2 }
 0x5cf   : > { %v2806_v17 = vpop.f32.mrf.mxu1 }
 0x5d0   : > { %v2807_v26 = vadd.f32 %v5814_v2, %v2806_v17  ;;  %v2923_v42 = vadd.f32 %v2815_v31, %v5571_v63 }
 0x5d1   : > { %v4538_v0 = vpop.f32.mrf.mxu1 }
 0x5d2   : > { %v2818_v19 = vadd.f32 %v4538_v0, %v5814_v2  ;;  %v2921_v4 = vadd.f32 %v2807_v26, %v5566_v38 }
 0x5d3   : > { %v2809_v39 = vpop.f32.mrf.mxu1 }
 0x5d4   : > { %v2810_v58 = vadd.f32 %v5814_v2, %v2809_v39  ;;  %v2924_v35 = vadd.f32 %v2818_v19, %v5568_v29 }
 0x5d6   : > { %v2922_v30 = vadd.f32 %v2810_v58, %v5573_v5  ;;  %v2952_v49 = vpack.c.bf16 %v2924_v35, %v2923_v42 }
 0x5d8   : > { %v2951_v43 = vpack.c.bf16 %v2922_v30, %v2921_v4 }
 0x5da   : > { %4575 = vmatprep.mubr.msk.bf16.mxu0 %vm959_vm2, %v2951_v43 }
 0x5db   : > { %4576 = vmatmul.mubr.msk.bf16.gmra.mxu0 %vm959_vm2, %v2952_v49 }
 0x5dd   : > { %v4541_v21 = vpop.f32.mrf.mxu1 }
 0x5de   : > { %v2831_v29 = vadd.f32 %v4541_v21, %v5814_v2 }
 0x5df   : > { %v2822_v23 = vpop.f32.mrf.mxu1 }
 0x5e0   : > { %v2823_v56 = vadd.f32 %v5814_v2, %v2822_v23  ;;  %v2927_v12 = vadd.f32 %v2831_v29, %v5597_v60 }
 0x5e1   : > { %v4542_v57 = vpop.f32.mrf.mxu1 }
 0x5e2   : > { %v2834_v52 = vadd.f32 %v4542_v57, %v5814_v2  ;;  %v2925_v27 = vadd.f32 %v2823_v56, %v5592_v9 }
 0x5e3   : > { %v2825_v38 = vpop.f32.mrf.mxu1 }
 0x5e4   : > { %v2826_v5 = vadd.f32 %v5814_v2, %v2825_v38  ;;  %v2928_v63 = vadd.f32 %v2834_v52, %v5594_v34 }
 0x5e6   : > { %v2926_v15 = vadd.f32 %v2826_v5, %v5599_v62  ;;  %v2954_v17 = vpack.c.bf16 %v2928_v63, %v2927_v12  ;;  %v4709_v63 = vld [vmem:[%s6187_s10 + $0x18] sm:$0xff]  }
 0x5e7   : > { %4603 = vmatprep.subr.bf16.mxu1 %v4709_v63 }
 0x5e8   : > { %v2953_v8 = vpack.c.bf16 %v2926_v15, %v2925_v27  ;;  %v4725_v15 = vmov 64   ;;  %4604 = vmatpush3.bf16.msra.mxu1 %v4709_v63 }
 0x5e9   : > { %4655 = vset.pattern.permute.xlu1 %v4725_v15  ;;  %4656 = vset.pattern.permute.xlu0 %v4725_v15 }
 0x5ea   : > { %4579 = vmatprep.mubr.msk.bf16.mxu0 %vm959_vm2, %v2953_v8 }
 0x5eb   : > { %4580 = vmatmul.mubr.msk.bf16.gmra.mxu0 %vm959_vm2, %v2954_v17 }
 0x5ed   : > { %v4545_v0 = vpop.f32.mrf.mxu1 }
 0x5ee   : > { %v2847_v34 = vadd.f32 %v4545_v0, %v5814_v2  ;;  %v4711_v0 = vld [vmem:[%s6187_s10 + $0x8] sm:$0xff]  }
 0x5ef   : > { %v2838_v26 = vpop.f32.mrf.mxu1 }
 0x5f0   : > { %v2839_v31 = vadd.f32 %v5814_v2, %v2838_v26  ;;  %v2931_v4 = vadd.f32 %v2847_v34, %v5623_v32 }
 0x5f1   : > { %v4546_v19 = vpop.f32.mrf.mxu1 }
 0x5f2   : > { %v2850_v39 = vadd.f32 %v4546_v19, %v5814_v2  ;;  %v2929_v58 = vadd.f32 %v2839_v31, %v5618_v53 }
 0x5f3   : > { %v2841_v9 = vpop.f32.mrf.mxu1 }
 0x5f4   : > { %v2842_v62 = vadd.f32 %v5814_v2, %v2841_v9  ;;  %v2932_v60 = vadd.f32 %v2850_v39, %v5620_v20  ;;  %v4712_v9 = vld [vmem:[%s6187_s10] sm:$0xff]  }
 0x5f6   : > { %v2930_v35 = vadd.f32 %v2842_v62, %v5625_v48  ;;  %v2956_v42 = vpack.c.bf16 %v2932_v60, %v2931_v4 }
 0x5f8   : > { %v2955_v30 = vpack.c.bf16 %v2930_v35, %v2929_v58 }
 0x5fa   : > { %4583 = vmatprep.mubr.msk.bf16.mxu0 %vm959_vm2, %v2955_v30 }
 0x5fb   : > { %4584 = vmatmul.mubr.msk.bf16.gmra.mxu0 %vm959_vm2, %v2956_v42 }
 0x5fd   : > { %v4549_v43 = vpop.f32.mrf.mxu1 }
 0x5fe   : > { %v2863_v20 = vadd.f32 %v4549_v43, %v5814_v2 }
 0x5ff   : > { %v2854_v49 = vpop.f32.mrf.mxu1 }
 0x600   : > { %v2855_v23 = vadd.f32 %v5814_v2, %v2854_v49  ;;  %v2935_v29 = vadd.f32 %v2863_v20, %v5649_v46 }
 0x601   : > { %v4550_v21 = vpop.f32.mrf.mxu1 }
 0x602   : > { %v2866_v57 = vadd.f32 %v4550_v21, %v5814_v2  ;;  %v2933_v56 = vadd.f32 %v2855_v23, %v5644_v14 }
 0x603   : > { %v2857_v53 = vpop.f32.mrf.mxu1 }
 0x604   : > { %v2858_v48 = vadd.f32 %v5814_v2, %v2857_v53  ;;  %v2936_v32 = vadd.f32 %v2866_v57, %v5646_v47  ;;  %v4710_v47 = vld [vmem:[%s6187_s10 + $0x10] sm:$0xff]  }
 0x605   : > { %4605 = vmatprep.subr.bf16.mxu1 %v4710_v47 }
 0x606   : > { %v2934_v52 = vadd.f32 %v2858_v48, %v5651_v24  ;;  %v2958_v5 = vpack.c.bf16 %v2936_v32, %v2935_v29  ;;  %4606 = vmatpush3.bf16.msra.mxu1 %v4710_v47 }
 0x607   : > { %4607 = vmatprep.subr.bf16.mxu1 %v4711_v0 }
 0x608   : > { %v2957_v38 = vpack.c.bf16 %v2934_v52, %v2933_v56 }
 0x60a   : > { %4587 = vmatprep.mubr.msk.bf16.mxu0 %vm959_vm2, %v2957_v38  ;;  %4608 = vmatpush3.bf16.msra.mxu1 %v4711_v0 }
 0x60b   : > { %4588 = vmatmul.mubr.msk.bf16.gmra.mxu0 %vm959_vm2, %v2958_v5  ;;  %4609 = vmatprep.subr.bf16.mxu1 %v4712_v9 }
 0x60d   : > { %v4553_v27 = vpop.f32.mrf.mxu1 }
 0x60e   : > { %v2879_v8 = vadd.f32 %v4553_v27, %v5814_v2  ;;  %4610 = vmatpush3.bf16.msra.mxu1 %v4712_v9  ;;  %v5911_v27 = vld [vmem:[%s6186_s9] ss:$0 sm:$0xff] }
 0x60f   : > { %v2870_v14 = vpop.f32.mrf.mxu1 }
 0x610   : > { %v2871_v24 = vadd.f32 %v5814_v2, %v2870_v14  ;;  %v2939_v34 = vadd.f32 %v2879_v8, %v5681_v59 }
 0x611   : > { %v4554_v46 = vpop.f32.mrf.mxu1 }
 0x612   : > { %v2882_v12 = vadd.f32 %v4554_v46, %v5814_v2  ;;  %v2937_v31 = vadd.f32 %v2871_v24, %v5676_v7 }
 0x613   : > { %v2873_v17 = vpop.f32.mrf.mxu1 }
 0x614   : > { %v2874_v26 = vadd.f32 %v5814_v2, %v2873_v17  ;;  %v2940_v19 = vadd.f32 %v2882_v12, %v5678_v36 }
 0x616   : > { %v2938_v39 = vadd.f32 %v2874_v26, %v5686_v45  ;;  %v2960_v60 = vpack.c.bf16 %v2940_v19, %v2939_v34 }
 0x618   : > { %v2959_v62 = vpack.c.bf16 %v2938_v39, %v2937_v31 }
 0x61a   : > { %4591 = vmatprep.mubr.msk.bf16.mxu0 %vm959_vm2, %v2959_v62 }
 0x61b   : > { %4592 = vmatmul.mubr.msk.bf16.gmra.mxu0 %vm959_vm2, %v2960_v60 }
 0x61d   : > { %v4557_v36 = vpop.f32.mrf.mxu1 }
 0x61e   : > { %v2895_v59 = vadd.f32 %v4557_v36, %v5814_v2 }
 0x61f   : > { %v2886_v58 = vpop.f32.mrf.mxu1 }
 0x620   : > { %v2887_v45 = vadd.f32 %v5814_v2, %v2886_v58  ;;  %v2943_v21 = vadd.f32 %v2895_v59, %v5710_v54 }
 0x621   : > { %v4558_v7 = vpop.f32.mrf.mxu1 }
 0x622   : > { %v2898_v35 = vadd.f32 %v4558_v7, %v5814_v2  ;;  %v2941_v43 = vadd.f32 %v2887_v45, %v5705_v37 }
 0x623   : > { %v2889_v4 = vpop.f32.mrf.mxu1 }
 0x624   : > { %v2890_v30 = vadd.f32 %v5814_v2, %v2889_v4  ;;  %v2944_v42 = vadd.f32 %v2898_v35, %v5707_v25 }
 0x626   : > { %v2942_v49 = vadd.f32 %v2890_v30, %v5712_v28  ;;  %v2962_v57 = vpack.c.bf16 %v2944_v42, %v2943_v21 }
 0x628   : > { %v2961_v23 = vpack.c.bf16 %v2942_v49, %v2941_v43 }
 0x62a   : > { %4595 = vmatprep.mubr.msk.bf16.mxu0 %vm959_vm2, %v2961_v23 }
 0x62b   : > { %4596 = vmatmul.mubr.msk.bf16.gmra.mxu0 %vm959_vm2, %v2962_v57 }
 0x62d   : > { %v4561_v20 = vpop.f32.mrf.mxu1 }
 0x62e   : > { %v2911_v25 = vadd.f32 %v4561_v20, %v5814_v2 }
 0x62f   : > { %v2902_v53 = vpop.f32.mrf.mxu1 }
 0x630   : > { %v2903_v32 = vadd.f32 %v5814_v2, %v2902_v53  ;;  %v2947_v38 = vadd.f32 %v2911_v25, %v5736_v18  ;;  %v6213_v18 = vsub.s32 1, %v4808_v6 }
 0x631   : > { %v4562_v48 = vpop.f32.mrf.mxu1 }
 0x632   : > { %v2914_v56 = vadd.f32 %v4562_v48, %v5814_v2  ;;  %v2945_v52 = vadd.f32 %v2903_v32, %v5731_v11  ;;  %v4714_v11 = vld [vmem:[%s6180_s3] sm:$0x3] }
 0x633   : > { %v2905_v37 = vpop.f32.mrf.mxu1 }
 0x634   : > { %v2906_v28 = vadd.f32 %v5814_v2, %v2905_v37  ;;  %v2948_v54 = vadd.f32 %v2914_v56, %v5733_v1 }
 0x636   : > { %v2946_v29 = vadd.f32 %v2906_v28, %v5738_v51  ;;  %v2964_v63 = vpack.c.bf16 %v2948_v54, %v2947_v38  ;;  %v5919_v51 = vrot.slane %v4714_v11, %v6213_v18 }
 0x638   : > { %v2963_v5 = vpack.c.bf16 %v2946_v29, %v2945_v52  ;;  %v680_v17 = vadd.f32 %v4909_v40, %v5919_v51  ;;  %v694_v6 = vadd.f32 %v4933_v55, %v5919_v51  ;;  %v684_v19 = vadd.f32 %v4916_v44, %v5919_v51 }
 0x639   : > { %v690_v31 = vadd.f32 %v4925_v50, %v5919_v51  ;;  %v700_v43 = vadd.f32 %v4942_v61, %v5919_v51  ;;  %v714_v23 = vadd.f32 %v4967_v16, %v5919_v51  ;;  %v710_v53 = vadd.f32 %v4959_v10, %v5919_v51 }
 0x63a   : > { %4599 = vmatprep.mubr.msk.bf16.mxu0 %vm959_vm2, %v2963_v5  ;;  %v704_v48 = vadd.f32 %v4950_v3, %v5919_v51  ;;  %v720_v11 = vadd.f32 %v4976_v22, %v5919_v51 }
 0x63b   : > { %4600 = vmatmul.mubr.msk.bf16.gmra.mxu0 %vm959_vm2, %v2964_v63 }
 0x68b   : > { %v4573_v2 = vpop.f32.mrf.mxu0 }
 0x68c   : > { %v3095_v1 = vadd.f32 %v4573_v2, %v5911_v27 }
 0x68d   : > { %v3086_v15 = vpop.f32.mrf.mxu0 }
 0x68e   : > { %v3087_v14 = vadd.f32 %v5911_v27, %v3086_v15  ;;  %3594 = vperm.xlu1 %4655, %v3095_v1   ;;  %v3219_v12 = vadd.f32 %v4838_v13, %v3095_v1 }
 0x68f   : > { %v4574_v47 = vpop.f32.mrf.mxu0 }
 0x690   : > { %v3217_v46 = vadd.f32 %v4838_v13, %v3087_v14  ;;  %v3098_v24 = vadd.f32 %v4574_v47, %v5911_v27  ;;  %3584 = vperm.xlu0 %4656, %v3087_v14   ;;  %v3251_v40 = vadd.f32 %v3219_v12, %v690_v31  ;;  %v734_v47 = vadd.f32 %v5001_v41, %v5919_v51 }
 0x691   : > { %v3089_v8 = vpop.f32.mrf.mxu0  ;;  %v730_v12 = vadd.f32 %v4993_v33, %v5919_v51 }
 0x692   : > { %v3220_v0 = vadd.f32 %v4838_v13, %v3098_v24  ;;  %v3090_v26 = vadd.f32 %v5911_v27, %v3089_v8  ;;  %v3249_v39 = vadd.f32 %v3217_v46, %v680_v17  ;;  %v3283_v58 = vmax.f32 %v3251_v40, 0.0  ;;  %v6214_v8 = vld [vmem:[#allocation2_spill] sm:$0xff] }
 0x693   : > { %v724_v17 = vadd.f32 %v6214_v8, %v5919_v51 }
 0x694   : > { %v3252_v34 = vadd.f32 %v3220_v0, %v694_v6  ;;  %v3218_v9 = vadd.f32 %v4838_v13, %v3090_v26  ;;  %3589 = vperm.xlu1 %4655, %v3090_v26   ;;  %3599 = vperm.xlu0 %4656, %v3098_v24   ;;  %v3281_v55 = vmax.f32 %v3249_v39, 0.0 }
 0x696   : > { %v3250_v62 = vadd.f32 %v3218_v9, %v684_v19  ;;  %v3284_v60 = vmax.f32 %v3252_v34, 0.0 }
 0x698   : > { %v3282_v36 = vmax.f32 %v3250_v62, 0.0  ;;  %v3314_v45 = vpack.c.bf16 %v3284_v60, %v3283_v58 }
 0x69a   : > { %v3313_v7 = vpack.c.bf16 %v3282_v36, %v3281_v55 }
 0x69b   : > { %v4577_v35 = vpop.f32.mrf.mxu0 }
 0x69c   : > { %v3111_v44 = vadd.f32 %v4577_v35, %v5911_v27  ;;  %4611 = vmatprep.mubr.msk.bf16.mxu1 %vm959_vm2, %v3313_v7 }
 0x69d   : > { %v3102_v50 = vpop.f32.mrf.mxu0  ;;  %4612 = vmatmul.mubr.msk.bf16.vlgmr.msra.gmra.mxu1 %vm959_vm2, %v3314_v45  ;;  %v6215_v45 = vld [vmem:[#allocation3_spill] sm:$0xff] }
 0x69e   : > { %v3103_v59 = vadd.f32 %v5911_v27, %v3102_v50  ;;  %3614 = vperm.xlu1 %4655, %v3111_v44   ;;  %v3223_v49 = vadd.f32 %v4838_v13, %v3111_v44  ;;  %v740_v35 = vadd.f32 %v6215_v45, %v5919_v51 }
 0x69f   : > { %v4578_v4 = vpop.f32.mrf.mxu0 }
 0x6a0   : > { %v3221_v30 = vadd.f32 %v4838_v13, %v3103_v59  ;;  %v3114_v42 = vadd.f32 %v4578_v4, %v5911_v27  ;;  %v3255_v25 = vadd.f32 %v3223_v49, %v710_v53 }
 0x6a1   : > { %v3105_v21 = vpop.f32.mrf.mxu0 }
 0x6a2   : > { %v3224_v57 = vadd.f32 %v4838_v13, %v3114_v42  ;;  %v3106_v20 = vadd.f32 %v5911_v27, %v3105_v21  ;;  %3604 = vperm.xlu1 %4655, %v3103_v59   ;;  %3619 = vperm.xlu0 %4656, %v3114_v42   ;;  %v3253_v32 = vadd.f32 %v3221_v30, %v700_v43  ;;  %v3287_v52 = vmax.f32 %v3255_v25, 0.0  ;;  %v6216_v59 = vld [vmem:[#allocation6_spill] sm:$0xff]  ;;  %v6217_v43 = vld [vmem:[#allocation5_spill] sm:$0xff]  ;;  %v6218_v21 = vld [vmem:[#allocation4_spill] sm:$0xff] }
 0x6a3   : > { %v754_v4 = vadd.f32 %v6216_v59, %v5919_v51  ;;  %v750_v49 = vadd.f32 %v6217_v43, %v5919_v51 }
 0x6a4   : > { %v3256_v61 = vadd.f32 %v3224_v57, %v714_v23  ;;  %v3222_v56 = vadd.f32 %v4838_v13, %v3106_v20  ;;  %v3285_v28 = vmax.f32 %v3253_v32, 0.0  ;;  %v744_v23 = vadd.f32 %v6218_v21, %v5919_v51 }
 0x6a6   : > { %v3254_v37 = vadd.f32 %v3222_v56, %v704_v48  ;;  %3609 = vperm.xlu0 %4656, %v3106_v20   ;;  %v3288_v16 = vmax.f32 %v3256_v61, 0.0 }
 0x6a8   : > { %v3286_v54 = vmax.f32 %v3254_v37, 0.0  ;;  %v3316_v38 = vpack.c.bf16 %v3288_v16, %v3287_v52 }
 0x6aa   : > { %v3315_v29 = vpack.c.bf16 %v3286_v54, %v3285_v28 }
 0x6ab   : > { %v4581_v5 = vpop.f32.mrf.mxu0 }
 0x6ac   : > { %v3127_v63 = vadd.f32 %v4581_v5, %v5911_v27  ;;  %4615 = vmatprep.mubr.msk.bf16.mxu1 %vm959_vm2, %v3315_v29 }
 0x6ad   : > { %v3118_v10 = vpop.f32.mrf.mxu0  ;;  %4616 = vmatmul.mubr.msk.bf16.gmra.mxu1 %vm959_vm2, %v3316_v38 }
 0x6ae   : > { %v3119_v3 = vadd.f32 %v5911_v27, %v3118_v10  ;;  %3634 = vperm.xlu1 %4655, %v3127_v63   ;;  %v3227_v18 = vadd.f32 %v4838_v13, %v3127_v63 }
 0x6af   : > { %v4582_v2 = vpop.f32.mrf.mxu0 }
 0x6b0   : > { %v3225_v1 = vadd.f32 %v4838_v13, %v3119_v3  ;;  %v3130_v15 = vadd.f32 %v4582_v2, %v5911_v27  ;;  %v3259_v26 = vadd.f32 %v3227_v18, %v730_v12  ;;  %v6222_v12 = vld [vmem:[#allocation8_spill] sm:$0xff] }
 0x6b1   : > { %v3121_v14 = vpop.f32.mrf.mxu0  ;;  %v764_v8 = vadd.f32 %v6222_v12, %v5919_v51  ;;  %v6230_v12 = vld [vmem:[#allocation16_spill] sm:$0xff] }
 0x6b2   : > { %v3228_v46 = vadd.f32 %v4838_v13, %v3130_v15  ;;  %v3122_v24 = vadd.f32 %v5911_v27, %v3121_v14  ;;  %3624 = vperm.xlu1 %4655, %v3119_v3   ;;  %3639 = vperm.xlu0 %4656, %v3130_v15   ;;  %v3257_v6 = vadd.f32 %v3225_v1, %v720_v11  ;;  %v3291_v34 = vmax.f32 %v3259_v26, 0.0  ;;  %v6219_v3 = vld [vmem:[#allocation7_spill] sm:$0xff]  ;;  %v6220_v11 = vld [vmem:[#allocation10_spill] sm:$0xff] }
 0x6b3   : > { %v760_v2 = vadd.f32 %v6219_v3, %v5919_v51  ;;  %v774_v18 = vadd.f32 %v6220_v11, %v5919_v51  ;;  %v6229_v11 = vld [vmem:[#allocation18_spill] sm:$0xff] }
 0x6b4   : > { %v3260_v22 = vadd.f32 %v3228_v46, %v734_v47  ;;  %v3226_v0 = vadd.f32 %v4838_v13, %v3122_v24  ;;  %v3289_v31 = vmax.f32 %v3257_v6, 0.0  ;;  %v6221_v46 = vld [vmem:[#allocation9_spill] sm:$0xff] }
 0x6b6   : > { %v3258_v19 = vadd.f32 %v3226_v0, %v724_v17  ;;  %3629 = vperm.xlu0 %4656, %v3122_v24   ;;  %v3292_v41 = vmax.f32 %v3260_v22, 0.0  ;;  %v770_v24 = vadd.f32 %v6221_v46, %v5919_v51 }
 0x6b8   : > { %v3290_v39 = vmax.f32 %v3258_v19, 0.0  ;;  %v3318_v40 = vpack.c.bf16 %v3292_v41, %v3291_v34 }
 0x6ba   : > { %v3317_v9 = vpack.c.bf16 %v3290_v39, %v3289_v31 }
 0x6bb   : > { %v4585_v62 = vpop.f32.mrf.mxu0 }
 0x6bc   : > { %v3143_v60 = vadd.f32 %v4585_v62, %v5911_v27  ;;  %4619 = vmatprep.mubr.msk.bf16.mxu1 %vm959_vm2, %v3317_v9 }
 0x6bd   : > { %v3134_v33 = vpop.f32.mrf.mxu0  ;;  %4620 = vmatmul.mubr.msk.bf16.gmra.mxu1 %vm959_vm2, %v3318_v40 }
 0x6be   : > { %v3135_v55 = vadd.f32 %v5911_v27, %v3134_v33  ;;  %3654 = vperm.xlu1 %4655, %v3143_v60   ;;  %v3231_v44 = vadd.f32 %v4838_v13, %v3143_v60 }
 0x6bf   : > { %v4586_v36 = vpop.f32.mrf.mxu0 }
 0x6c0   : > { %v3229_v58 = vadd.f32 %v4838_v13, %v3135_v55  ;;  %v3146_v7 = vadd.f32 %v4586_v36, %v5911_v27  ;;  %v3263_v48 = vadd.f32 %v3231_v44, %v750_v49  ;;  %v6226_v49 = vld [vmem:[#allocation12_spill] sm:$0xff] }
 0x6c1   : > { %v3137_v50 = vpop.f32.mrf.mxu0  ;;  %v784_v21 = vadd.f32 %v6226_v49, %v5919_v51 }
 0x6c2   : > { %v3232_v30 = vadd.f32 %v4838_v13, %v3146_v7  ;;  %v3138_v42 = vadd.f32 %v5911_v27, %v3137_v50  ;;  %3644 = vperm.xlu1 %4655, %v3135_v55   ;;  %3659 = vperm.xlu0 %4656, %v3146_v7   ;;  %v3261_v57 = vadd.f32 %v3229_v58, %v740_v35  ;;  %v3295_v37 = vmax.f32 %v3263_v48, 0.0  ;;  %v6223_v7 = vld [vmem:[#allocation11_spill] sm:$0xff]  ;;  %v6224_v50 = vld [vmem:[#allocation14_spill] sm:$0xff] }
 0x6c3   : > { %v780_v45 = vadd.f32 %v6223_v7, %v5919_v51  ;;  %v794_v59 = vadd.f32 %v6224_v50, %v5919_v51 }
 0x6c4   : > { %v3264_v20 = vadd.f32 %v3232_v30, %v754_v4  ;;  %v3230_v53 = vadd.f32 %v4838_v13, %v3138_v42  ;;  %v3293_v56 = vmax.f32 %v3261_v57, 0.0 }
 0x6c6   : > { %v3262_v32 = vadd.f32 %v3230_v53, %v744_v23  ;;  %3649 = vperm.xlu0 %4656, %v3138_v42   ;;  %v3296_v61 = vmax.f32 %v3264_v20, 0.0  ;;  %v6225_v42 = vld [vmem:[#allocation13_spill] sm:$0xff] }
 0x6c7   : > { %v790_v43 = vadd.f32 %v6225_v42, %v5919_v51 }
 0x6c8   : > { %v3294_v25 = vmax.f32 %v3262_v32, 0.0  ;;  %v3320_v28 = vpack.c.bf16 %v3296_v61, %v3295_v37 }
 0x6ca   : > { %v3319_v16 = vpack.c.bf16 %v3294_v25, %v3293_v56 }
 0x6cb   : > { %v4589_v54 = vpop.f32.mrf.mxu0 }
 0x6cc   : > { %v3159_v52 = vadd.f32 %v4589_v54, %v5911_v27  ;;  %4623 = vmatprep.mubr.msk.bf16.mxu1 %vm959_vm2, %v3319_v16 }
 0x6cd   : > { %v3150_v29 = vpop.f32.mrf.mxu0  ;;  %4624 = vmatmul.mubr.msk.bf16.gmra.mxu1 %vm959_vm2, %v3320_v28 }
 0x6ce   : > { %v3151_v38 = vadd.f32 %v5911_v27, %v3150_v29  ;;  %3674 = vperm.xlu1 %4655, %v3159_v52   ;;  %v3235_v1 = vadd.f32 %v4838_v13, %v3159_v52 }
 0x6cf   : > { %v4590_v5 = vpop.f32.mrf.mxu0 }
 0x6d0   : > { %v3233_v63 = vadd.f32 %v4838_v13, %v3151_v38  ;;  %v3162_v10 = vadd.f32 %v4590_v5, %v5911_v27  ;;  %v3267_v0 = vadd.f32 %v3235_v1, %v770_v24  ;;  %v6228_v1 = vld [vmem:[#allocation15_spill] sm:$0xff] }
 0x6d1   : > { %v3153_v15 = vpop.f32.mrf.mxu0 }
 0x6d2   : > { %v3236_v14 = vadd.f32 %v4838_v13, %v3162_v10  ;;  %v3154_v47 = vadd.f32 %v5911_v27, %v3153_v15  ;;  %3664 = vperm.xlu1 %4655, %v3151_v38   ;;  %3679 = vperm.xlu0 %4656, %v3162_v10   ;;  %v3265_v17 = vadd.f32 %v3233_v63, %v760_v2  ;;  %v3299_v39 = vmax.f32 %v3267_v0, 0.0  ;;  %v6227_v63 = vld [vmem:[#allocation17_spill] sm:$0xff] }
 0x6d3   : > { %v810_v10 = vadd.f32 %v6227_v63, %v5919_v51  ;;  %v800_v15 = vadd.f32 %v6228_v1, %v5919_v51 }
 0x6d4   : > { %v3268_v6 = vadd.f32 %v3236_v14, %v774_v18  ;;  %v3234_v22 = vadd.f32 %v4838_v13, %v3154_v47  ;;  %v3297_v41 = vmax.f32 %v3265_v17, 0.0  ;;  %v814_v18 = vadd.f32 %v6229_v11, %v5919_v51 }
 0x6d6   : > { %v3266_v26 = vadd.f32 %v3234_v22, %v764_v8  ;;  %3669 = vperm.xlu0 %4656, %v3154_v47   ;;  %v3300_v19 = vmax.f32 %v3268_v6, 0.0  ;;  %v804_v8 = vadd.f32 %v6230_v12, %v5919_v51 }
 0x6d8   : > { %v3298_v31 = vmax.f32 %v3266_v26, 0.0  ;;  %v3322_v9 = vpack.c.bf16 %v3300_v19, %v3299_v39 }
 0x6da   : > { %v3321_v34 = vpack.c.bf16 %v3298_v31, %v3297_v41 }
 0x6db   : > { %v4593_v40 = vpop.f32.mrf.mxu0 }
 0x6dc   : > { %v3175_v62 = vadd.f32 %v4593_v40, %v5911_v27  ;;  %4627 = vmatprep.mubr.msk.bf16.mxu1 %vm959_vm2, %v3321_v34 }
 0x6dd   : > { %v3166_v60 = vpop.f32.mrf.mxu0  ;;  %4628 = vmatmul.mubr.msk.bf16.gmra.mxu1 %vm959_vm2, %v3322_v9 }
 0x6de   : > { %v3167_v33 = vadd.f32 %v5911_v27, %v3166_v60  ;;  %3694 = vperm.xlu1 %4655, %v3175_v62   ;;  %v3239_v35 = vadd.f32 %v4838_v13, %v3175_v62 }
 0x6df   : > { %v4594_v55 = vpop.f32.mrf.mxu0 }
 0x6e0   : > { %v3237_v36 = vadd.f32 %v4838_v13, %v3167_v33  ;;  %v3178_v58 = vadd.f32 %v4594_v55, %v5911_v27  ;;  %v3271_v53 = vadd.f32 %v3239_v35, %v790_v43  ;;  %v6234_v43 = vld [vmem:[#allocation21_spill] sm:$0xff] }
 0x6e1   : > { %v3169_v44 = vpop.f32.mrf.mxu0  ;;  %v830_v49 = vadd.f32 %v6234_v43, %v5919_v51 }
 0x6e2   : > { %v3240_v4 = vadd.f32 %v4838_v13, %v3178_v58  ;;  %v3170_v30 = vadd.f32 %v5911_v27, %v3169_v44  ;;  %3684 = vperm.xlu1 %4655, %v3167_v33   ;;  %3699 = vperm.xlu0 %4656, %v3178_v58   ;;  %v3269_v23 = vadd.f32 %v3237_v36, %v780_v45  ;;  %v3303_v25 = vmax.f32 %v3271_v53, 0.0  ;;  %v6231_v45 = vld [vmem:[#allocation19_spill] sm:$0xff]  ;;  %v6232_v44 = vld [vmem:[#allocation22_spill] sm:$0xff] }
 0x6e3   : > { %v820_v35 = vadd.f32 %v6231_v45, %v5919_v51  ;;  %v834_v50 = vadd.f32 %v6232_v44, %v5919_v51 }
 0x6e4   : > { %v3272_v57 = vadd.f32 %v3240_v4, %v794_v59  ;;  %v3238_v20 = vadd.f32 %v4838_v13, %v3170_v30  ;;  %v3301_v61 = vmax.f32 %v3269_v23, 0.0 }
 0x6e6   : > { %v3270_v48 = vadd.f32 %v3238_v20, %v784_v21  ;;  %3689 = vperm.xlu0 %4656, %v3170_v30   ;;  %v3304_v32 = vmax.f32 %v3272_v57, 0.0  ;;  %v6233_v30 = vld [vmem:[#allocation20_spill] sm:$0xff] }
 0x6e7   : > { %v824_v42 = vadd.f32 %v6233_v30, %v5919_v51  ;;  %v6235_v51 = vlaneseq }
 0x6e8   : > { %v3302_v56 = vmax.f32 %v3270_v48, 0.0  ;;  %v3324_v16 = vpack.c.bf16 %v3304_v32, %v3303_v25 }
 0x6ea   : > { %v3323_v37 = vpack.c.bf16 %v3302_v56, %v3301_v61 }
 0x6eb   : > { %v4597_v28 = vpop.f32.mrf.mxu0 }
 0x6ec   : > { %v3191_v54 = vadd.f32 %v4597_v28, %v5911_v27  ;;  %4631 = vmatprep.mubr.msk.bf16.mxu1 %vm959_vm2, %v3323_v37  ;;  %v3578_v37 = vand.u32 127, %v6235_v51 }
 0x6ed   : > { %v3182_v52 = vpop.f32.mrf.mxu0  ;;  %4632 = vmatmul.mubr.msk.bf16.gmra.mxu1 %vm959_vm2, %v3324_v16  ;;  %v4726_v16 = vmov 0.0  }
 0x6ee   : > { %v3243_v29 = vadd.f32 %v4838_v13, %v3191_v54  ;;  %v3183_v38 = vadd.f32 %v5911_v27, %v3182_v52  ;;  %3714 = vperm.xlu1 %4655, %v3191_v54   ;;  %vm3579_vm3 = vcmp.eq.s32.totalorder %v3578_v37, 16  ;;  %v6070_v52 = vld [vmem:[%s6188_s11] ss:$0 sm:$0xff] }
 0x6ef   : > { %v4598_v5 = vpop.f32.mrf.mxu0  ;;  %v6065_v28 = vsel %vm3579_vm3, 1.0, %v4726_v16 }
 0x6f0   : > { %v3241_v3 = vadd.f32 %v4838_v13, %v3183_v38  ;;  %v3194_v2 = vadd.f32 %v4598_v5, %v5911_v27  ;;  %v3275_v47 = vadd.f32 %v3243_v29, %v810_v10 }
 0x6f1   : > { %v3185_v14 = vpop.f32.mrf.mxu0 }
 0x6f2   : > { %v3244_v46 = vadd.f32 %v4838_v13, %v3194_v2  ;;  %v3186_v24 = vadd.f32 %v5911_v27, %v3185_v14  ;;  %3704 = vperm.xlu1 %4655, %v3183_v38   ;;  %3719 = vperm.xlu0 %4656, %v3194_v2   ;;  %v3273_v17 = vadd.f32 %v3241_v3, %v800_v15  ;;  %v3307_v0 = vmax.f32 %v3275_v47, 0.0 }
 0x6f4   : > { %v3276_v6 = vadd.f32 %v3244_v46, %v814_v18  ;;  %v3242_v22 = vadd.f32 %v4838_v13, %v3186_v24  ;;  %v3305_v41 = vmax.f32 %v3273_v17, 0.0 }
 0x6f6   : > { %v3308_v26 = vmax.f32 %v3276_v6, 0.0  ;;  %v3274_v19 = vadd.f32 %v3242_v22, %v804_v8  ;;  %3709 = vperm.xlu0 %4656, %v3186_v24  }
 0x6f8   : > { %v3326_v31 = vpack.c.bf16 %v3308_v26, %v3307_v0  ;;  %v3306_v39 = vmax.f32 %v3274_v19, 0.0 }
 0x6fa   : > { %v3325_v34 = vpack.c.bf16 %v3306_v39, %v3305_v41 }
 0x6fb   : > { %v4601_v9 = vpop.f32.mrf.mxu0 }
 0x6fc   : > { %4635 = vmatprep.mubr.msk.bf16.mxu1 %vm959_vm2, %v3325_v34  ;;  %v3207_v40 = vadd.f32 %v4601_v9, %v5911_v27 }
 0x6fd   : > { %v3198_v62 = vpop.f32.mrf.mxu0  ;;  %4636 = vmatmul.mubr.msk.bf16.gmra.mxu1 %vm959_vm2, %v3326_v31 }
 0x6fe   : > { %v3199_v60 = vadd.f32 %v5911_v27, %v3198_v62  ;;  %v3247_v58 = vadd.f32 %v4838_v13, %v3207_v40 }
 0x6ff   : > { %v4602_v33 = vpop.f32.mrf.mxu0 }
 0x700   : > { %v3245_v55 = vadd.f32 %v4838_v13, %v3199_v60  ;;  %v3210_v36 = vadd.f32 %v4602_v33, %v5911_v27  ;;  %3724 = vperm.xlu1 %4655, %v3199_v60   ;;  %v3279_v20 = vadd.f32 %v3247_v58, %v830_v49 }
 0x701   : > { %v3201_v7 = vpop.f32.mrf.mxu0 }
 0x702   : > { %v3248_v59 = vadd.f32 %v4838_v13, %v3210_v36  ;;  %v3202_v4 = vadd.f32 %v5911_v27, %v3201_v7  ;;  %v3277_v21 = vadd.f32 %v3245_v55, %v820_v35  ;;  %v3311_v27 = vmax.f32 %v3279_v20, 0.0 }
 0x704   : > { %v3280_v23 = vadd.f32 %v3248_v59, %v834_v50  ;;  %v3246_v57 = vadd.f32 %v4838_v13, %v3202_v4  ;;  %3734 = vperm.xlu1 %4655, %v3207_v40   ;;  %3729 = vperm.xlu0 %4656, %v3202_v4   ;;  %v3309_v32 = vmax.f32 %v3277_v21, 0.0 }
 0x706   : > { %v3278_v53 = vadd.f32 %v3246_v57, %v824_v42  ;;  %v3312_v48 = vmax.f32 %v3280_v23, 0.0 }
 0x708   : > { %v3310_v61 = vmax.f32 %v3278_v53, 0.0  ;;  %3739 = vperm.xlu0 %4656, %v3210_v36   ;;  %v3328_v25 = vpack.c.bf16 %v3312_v48, %v3311_v27 }
 0x709   : > { %v3595_v54 = vpop.permute.xlu1 %3594 }
 0x70a   : > { %v3327_v56 = vpack.c.bf16 %v3310_v61, %v3309_v32  ;;  %v3744_v38 = vmul.f32 %v6065_v28, %v3595_v54 }
 0x70b   : > { %v3585_v13 = vpop.permute.xlu0 %3584 }
 0x70c   : > { %4639 = vmatprep.mubr.msk.bf16.mxu1 %vm959_vm2, %v3327_v56  ;;  %v3742_v3 = vmul.f32 %v6065_v28, %v3585_v13 }
 0x70d   : > { %4640 = vmatmul.mubr.msk.bf16.gmra.mxu1 %vm959_vm2, %v3328_v25 }
 0x70f   : > { %v3600_v63 = vpop.permute.xlu0 %3599  ;;  %v3590_v15 = vpop.permute.xlu1 %3589 }
 0x710   : > { %v3745_v18 = vmul.f32 %v6065_v28, %v3600_v63  ;;  %v3743_v24 = vmul.f32 %v6065_v28, %v3590_v15 }
 0x719   : > { %v3615_v6 = vpop.permute.xlu1 %3614 }
 0x71a   : > { %v3748_v19 = vmul.f32 %v6065_v28, %v3615_v6 }
 0x71d   : > { %v3620_v22 = vpop.permute.xlu0 %3619  ;;  %v3605_v0 = vpop.permute.xlu1 %3604 }
 0x71e   : > { %v3746_v39 = vmul.f32 %v6065_v28, %v3605_v0  ;;  %v3749_v60 = vmul.f32 %v6065_v28, %v3620_v22 }
 0x721   : > { %v3610_v40 = vpop.permute.xlu0 %3609 }
 0x722   : > { %v3747_v58 = vmul.f32 %v6065_v28, %v3610_v40 }
 0x729   : > { %v3635_v44 = vpop.permute.xlu1 %3634 }
 0x72a   : > { %v3752_v4 = vmul.f32 %v6065_v28, %v3635_v44 }
 0x72d   : > { %v3640_v50 = vpop.permute.xlu0 %3639  ;;  %v3625_v30 = vpop.permute.xlu1 %3624 }
 0x72e   : > { %v3750_v21 = vmul.f32 %v6065_v28, %v3625_v30  ;;  %v3753_v53 = vmul.f32 %v6065_v28, %v3640_v50 }
 0x731   : > { %v3630_v57 = vpop.permute.xlu0 %3629 }
 0x732   : > { %v3751_v27 = vmul.f32 %v6065_v28, %v3630_v57 }
 0x739   : > { %v3655_v51 = vpop.permute.xlu1 %3654 }
 0x73d   : > { %v3660_v13 = vpop.permute.xlu0 %3659  ;;  %v3645_v16 = vpop.permute.xlu1 %3644 }
 0x73e   : > { %v3754_v63 = vmul.f32 %v6065_v28, %v3645_v16  ;;  %v3757_v15 = vmul.f32 %v6065_v28, %v3660_v13 }
 0x75d   : > { %v4613_v29 = vpop.f32.mrf.mxu1 }
 0x75e   : > { %v3459_v5 = vadd.f32 %v4613_v29, %v6070_v52  ;;  %v3756_v29 = vmul.f32 %v6065_v28, %v3655_v51 }
 0x75f   : > { %v3450_v10 = vpop.f32.mrf.mxu1 }
 0x760   : > { %v3776_v2 = vadd.f32 %v3744_v38, %v3459_v5  ;;  %v3451_v1 = vadd.f32 %v6070_v52, %v3450_v10 }
 0x761   : > { %v4614_v11 = vpop.f32.mrf.mxu1 }
 0x762   : > { %3808 = vst [vmem:[%s6078_s18 + $0x10] sm:$0xff] %v3776_v2  ;;  %v3774_v14 = vadd.f32 %v3742_v3, %v3451_v1  ;;  %v3462_v47 = vadd.f32 %v4614_v11, %v6070_v52  ;;  %v3650_v2 = vpop.permute.xlu0 %3649 }
 0x763   : > { %v3453_v46 = vpop.f32.mrf.mxu1 }
 0x764   : > { %3806 = vst [vmem:[%s6078_s18] sm:$0xff] %v3774_v14  ;;  %v3777_v12 = vadd.f32 %v3745_v18, %v3462_v47  ;;  %v3454_v8 = vadd.f32 %v6070_v52, %v3453_v46  ;;  %v3755_v47 = vmul.f32 %v6065_v28, %v3650_v2 }
 0x766   : > { %3809 = vst [vmem:[%s6078_s18 + $0x18] sm:$0xff] %v3777_v12  ;;  %v3775_v17 = vadd.f32 %v3743_v24, %v3454_v8  ;;  %v3675_v8 = vpop.permute.xlu1 %3674 }
 0x767   : > { %v3760_v0 = vmul.f32 %v6065_v28, %v3675_v8 }
 0x768   : > { %3807 = vst [vmem:[%s6078_s18 + $0x8] sm:$0xff] %v3775_v17  ;;  %v3680_v17 = vpop.permute.xlu0 %3679 }
 0x769   : > { %v3761_v40 = vmul.f32 %v6065_v28, %v3680_v17 }
 0x76a   : > { %v3665_v6 = vpop.permute.xlu1 %3664 }
 0x76d   : > { %v4617_v26 = vpop.f32.mrf.mxu1 }
 0x76e   : > { %v3475_v41 = vadd.f32 %v4617_v26, %v6070_v52 }
 0x76f   : > { %v3466_v31 = vpop.f32.mrf.mxu1 }
 0x770   : > { %v3780_v34 = vadd.f32 %v3748_v19, %v3475_v41  ;;  %v3467_v9 = vadd.f32 %v6070_v52, %v3466_v31  ;;  %v3758_v41 = vmul.f32 %v6065_v28, %v3665_v6 }
 0x771   : > { %v4618_v62 = vpop.f32.mrf.mxu1 }
 0x772   : > { %3812 = vst [vmem:[%s6078_s18 + $0x30] sm:$0xff] %v3780_v34  ;;  %v3778_v33 = vadd.f32 %v3746_v39, %v3467_v9  ;;  %v3478_v55 = vadd.f32 %v4618_v62, %v6070_v52  ;;  %v3670_v34 = vpop.permute.xlu0 %3669 }
 0x773   : > { %v3469_v36 = vpop.f32.mrf.mxu1 }
 0x774   : > { %3810 = vst [vmem:[%s6078_s18 + $0x20] sm:$0xff] %v3778_v33  ;;  %v3781_v7 = vadd.f32 %v3749_v60, %v3478_v55  ;;  %v3470_v45 = vadd.f32 %v6070_v52, %v3469_v36  ;;  %v3759_v55 = vmul.f32 %v6065_v28, %v3670_v34 }
 0x776   : > { %3813 = vst [vmem:[%s6078_s18 + $0x38] sm:$0xff] %v3781_v7  ;;  %v3779_v35 = vadd.f32 %v3747_v58, %v3470_v45  ;;  %v3695_v45 = vpop.permute.xlu1 %3694 }
 0x778   : > { %3811 = vst [vmem:[%s6078_s18 + $0x28] sm:$0xff] %v3779_v35  ;;  %v3700_v35 = vpop.permute.xlu0 %3699 }
 0x779   : > { %v3765_v57 = vmul.f32 %v6065_v28, %v3700_v35 }
 0x77a   : > { %v3685_v44 = vpop.permute.xlu1 %3684 }
 0x77d   : > { %v4621_v59 = vpop.f32.mrf.mxu1 }
 0x77e   : > { %v3491_v42 = vadd.f32 %v4621_v59, %v6070_v52  ;;  %v3764_v59 = vmul.f32 %v6065_v28, %v3695_v45 }
 0x77f   : > { %v3482_v49 = vpop.f32.mrf.mxu1 }
 0x780   : > { %v3784_v43 = vadd.f32 %v3752_v4, %v3491_v42  ;;  %v3483_v23 = vadd.f32 %v6070_v52, %v3482_v49  ;;  %v3762_v42 = vmul.f32 %v6065_v28, %v3685_v44 }
 0x781   : > { %v4622_v20 = vpop.f32.mrf.mxu1 }
 0x782   : > { %3816 = vst [vmem:[%s6078_s18 + $0x50] sm:$0xff] %v3784_v43  ;;  %v3782_v48 = vadd.f32 %v3750_v21, %v3483_v23  ;;  %v3494_v32 = vadd.f32 %v4622_v20, %v6070_v52  ;;  %v3690_v21 = vpop.permute.xlu0 %3689 }
 0x783   : > { %v3485_v61 = vpop.f32.mrf.mxu1 }
 0x784   : > { %3814 = vst [vmem:[%s6078_s18 + $0x40] sm:$0xff] %v3782_v48  ;;  %v3785_v56 = vadd.f32 %v3753_v53, %v3494_v32  ;;  %v3486_v25 = vadd.f32 %v6070_v52, %v3485_v61  ;;  %v3763_v32 = vmul.f32 %v6065_v28, %v3690_v21 }
 0x786   : > { %3817 = vst [vmem:[%s6078_s18 + $0x58] sm:$0xff] %v3785_v56  ;;  %v3783_v37 = vadd.f32 %v3751_v27, %v3486_v25  ;;  %v3715_v25 = vpop.permute.xlu1 %3714  ;;  %v3720_v51 = vpop.permute.xlu0 %3719 }
 0x787   : > { %v3768_v16 = vmul.f32 %v6065_v28, %v3715_v25  ;;  %v3769_v2 = vmul.f32 %v6065_v28, %v3720_v51 }
 0x788   : > { %3815 = vst [vmem:[%s6078_s18 + $0x48] sm:$0xff] %v3783_v37 }
 0x78a   : > { %v3705_v37 = vpop.permute.xlu1 %3704 }
 0x78d   : > { %v4625_v54 = vpop.f32.mrf.mxu1 }
 0x78e   : > { %v3507_v38 = vadd.f32 %v4625_v54, %v6070_v52 }
 0x78f   : > { %v3498_v5 = vpop.f32.mrf.mxu1 }
 0x790   : > { %v3788_v10 = vadd.f32 %v3756_v29, %v3507_v38  ;;  %v3499_v3 = vadd.f32 %v6070_v52, %v3498_v5  ;;  %v3766_v38 = vmul.f32 %v6065_v28, %v3705_v37 }
 0x791   : > { %v4626_v1 = vpop.f32.mrf.mxu1 }
 0x792   : > { %3820 = vst [vmem:[%s6078_s18 + $0x70] sm:$0xff] %v3788_v10  ;;  %v3786_v11 = vadd.f32 %v3754_v63, %v3499_v3  ;;  %v3510_v18 = vadd.f32 %v4626_v1, %v6070_v52  ;;  %v3710_v10 = vpop.permute.xlu0 %3709 }
 0x793   : > { %v3501_v14 = vpop.f32.mrf.mxu1 }
 0x794   : > { %3818 = vst [vmem:[%s6078_s18 + $0x60] sm:$0xff] %v3786_v11  ;;  %v3789_v46 = vadd.f32 %v3757_v15, %v3510_v18  ;;  %v3502_v24 = vadd.f32 %v6070_v52, %v3501_v14  ;;  %v3767_v18 = vmul.f32 %v6065_v28, %v3710_v10 }
 0x796   : > { %3821 = vst [vmem:[%s6078_s18 + $0x78] sm:$0xff] %v3789_v46  ;;  %v3787_v12 = vadd.f32 %v3755_v47, %v3502_v24  ;;  %v3725_v46 = vpop.permute.xlu1 %3724 }
 0x798   : > { %3819 = vst [vmem:[%s6078_s18 + $0x68] sm:$0xff] %v3787_v12  ;;  %v3730_v12 = vpop.permute.xlu0 %3729 }
 0x79a   : > { %v3735_v8 = vpop.permute.xlu1 %3734 }
 0x79b   : > { %v3772_v6 = vmul.f32 %v6065_v28, %v3735_v8 }
 0x79d   : > { %v4629_v22 = vpop.f32.mrf.mxu1 }
 0x79e   : > { %v3523_v26 = vadd.f32 %v4629_v22, %v6070_v52 }
 0x79f   : > { %v3514_v19 = vpop.f32.mrf.mxu1 }
 0x7a0   : > { %v3792_v31 = vadd.f32 %v3760_v0, %v3523_v26  ;;  %v3515_v39 = vadd.f32 %v6070_v52, %v3514_v19  ;;  %v3740_v0 = vpop.permute.xlu0 %3739  ;;  %v3770_v19 = vmul.f32 %v6065_v28, %v3725_v46 }
 0x7a1   : > { %v4630_v9 = vpop.f32.mrf.mxu1  ;;  %v3773_v34 = vmul.f32 %v6065_v28, %v3740_v0 }
 0x7a2   : > { %3824 = vst [vmem:[%s6078_s18 + $0x90] sm:$0xff] %v3792_v31  ;;  %v3790_v62 = vadd.f32 %v3758_v41, %v3515_v39  ;;  %v3526_v60 = vadd.f32 %v4630_v9, %v6070_v52 }
 0x7a3   : > { %v3517_v33 = vpop.f32.mrf.mxu1 }
 0x7a4   : > { %3822 = vst [vmem:[%s6078_s18 + $0x80] sm:$0xff] %v3790_v62  ;;  %v3793_v36 = vadd.f32 %v3761_v40, %v3526_v60  ;;  %v3518_v58 = vadd.f32 %v6070_v52, %v3517_v33  ;;  %v3771_v60 = vmul.f32 %v6065_v28, %v3730_v12 }
 0x7a6   : > { %3825 = vst [vmem:[%s6078_s18 + $0x98] sm:$0xff] %v3793_v36  ;;  %v3791_v7 = vadd.f32 %v3759_v55, %v3518_v58 }
 0x7a8   : > { %3823 = vst [vmem:[%s6078_s18 + $0x88] sm:$0xff] %v3791_v7 }
 0x7ad   : > { %v4633_v50 = vpop.f32.mrf.mxu1 }
 0x7ae   : > { %v3539_v4 = vadd.f32 %v4633_v50, %v6070_v52 }
 0x7af   : > { %v3530_v30 = vpop.f32.mrf.mxu1 }
 0x7b0   : > { %v3796_v43 = vadd.f32 %v3764_v59, %v3539_v4  ;;  %v3531_v49 = vadd.f32 %v6070_v52, %v3530_v30 }
 0x7b1   : > { %v4634_v23 = vpop.f32.mrf.mxu1 }
 0x7b2   : > { %3828 = vst [vmem:[%s6078_s18 + $0xb0] sm:$0xff] %v3796_v43  ;;  %v3794_v20 = vadd.f32 %v3762_v42, %v3531_v49  ;;  %v3542_v53 = vadd.f32 %v4634_v23, %v6070_v52 }
 0x7b3   : > { %v3533_v48 = vpop.f32.mrf.mxu1 }
 0x7b4   : > { %3826 = vst [vmem:[%s6078_s18 + $0xa0] sm:$0xff] %v3794_v20  ;;  %v3797_v61 = vadd.f32 %v3765_v57, %v3542_v53  ;;  %v3534_v27 = vadd.f32 %v6070_v52, %v3533_v48 }
 0x7b6   : > { %3829 = vst [vmem:[%s6078_s18 + $0xb8] sm:$0xff] %v3797_v61  ;;  %v3795_v56 = vadd.f32 %v3763_v32, %v3534_v27 }
 0x7b8   : > { %3827 = vst [vmem:[%s6078_s18 + $0xa8] sm:$0xff] %v3795_v56 }
 0x7bd   : > { %v4637_v13 = vpop.f32.mrf.mxu1 }
 0x7be   : > { %v3555_v54 = vadd.f32 %v4637_v13, %v6070_v52 }
 0x7bf   : > { %v3546_v29 = vpop.f32.mrf.mxu1 }
 0x7c0   : > { %v3800_v5 = vadd.f32 %v3768_v16, %v3555_v54  ;;  %v3547_v63 = vadd.f32 %v6070_v52, %v3546_v29 }
 0x7c1   : > { %v4638_v3 = vpop.f32.mrf.mxu1 }
 0x7c2   : > { %3832 = vst [vmem:[%s6078_s18 + $0xd0] sm:$0xff] %v3800_v5  ;;  %v3798_v1 = vadd.f32 %v3766_v38, %v3547_v63  ;;  %v3558_v15 = vadd.f32 %v4638_v3, %v6070_v52 }
 0x7c3   : > { %v3549_v11 = vpop.f32.mrf.mxu1 }
 0x7c4   : > { %3830 = vst [vmem:[%s6078_s18 + $0xc0] sm:$0xff] %v3798_v1  ;;  %v3801_v14 = vadd.f32 %v3769_v2, %v3558_v15  ;;  %v3550_v47 = vadd.f32 %v6070_v52, %v3549_v11 }
 0x7c6   : > { %3833 = vst [vmem:[%s6078_s18 + $0xd8] sm:$0xff] %v3801_v14  ;;  %v3799_v24 = vadd.f32 %v3767_v18, %v3550_v47 }
 0x7c8   : > { %3831 = vst [vmem:[%s6078_s18 + $0xc8] sm:$0xff] %v3799_v24 }
 0x7cd   : > { %v4641_v17 = vpop.f32.mrf.mxu1 }
 0x7ce   : > { %v3571_v22 = vadd.f32 %v4641_v17, %v6070_v52 }
 0x7cf   : > { %v3562_v26 = vpop.f32.mrf.mxu1 }
 0x7d0   : > { %v3804_v41 = vadd.f32 %v3772_v6, %v3571_v22  ;;  %v3563_v31 = vadd.f32 %v6070_v52, %v3562_v26 }
 0x7d1   : > { %v4642_v39 = vpop.f32.mrf.mxu1 }
 0x7d2   : > { %3836 = vst [vmem:[%s6078_s18 + $0xf0] sm:$0xff] %v3804_v41  ;;  %v3802_v9 = vadd.f32 %v3770_v19, %v3563_v31  ;;  %v3574_v40 = vadd.f32 %v4642_v39, %v6070_v52 }
 0x7d3   : > { %v3565_v62 = vpop.f32.mrf.mxu1 }
 0x7d4   : > { %3834 = vst [vmem:[%s6078_s18 + $0xe0] sm:$0xff] %v3802_v9  ;;  %v3805_v33 = vadd.f32 %v3773_v34, %v3574_v40  ;;  %v3566_v55 = vadd.f32 %v6070_v52, %v3565_v62 }
 0x7d6   : > { %3837 = vst [vmem:[%s6078_s18 + $0xf8] sm:$0xff] %v3805_v33  ;;  %v3803_v36 = vadd.f32 %v3771_v60, %v3566_v55 }
 0x7d8   : > { %3835 = vst [vmem:[%s6078_s18 + $0xe8] sm:$0xff] %v3803_v36 }
 0x7d9 PF: > { %s22_s21 = sadd.s32 1, %s4721_s21  }
 0x7da   : > { %p19_p4 = scmp.ge.s32.totalorder %s22_s21, 4  }
 0x7dc   :  { %21 = sbr.rel (!%p19_p4) target bundleno = 1 (0x1), region = 109 }

</bundles_post_ra>
